<compile_context>
chip_gen: v7x
topology: tpu7x:2x2x1
jax: 0.10.0
libtpu: 0.0.40
codegen_flags: <defaults>
</compile_context>

<pallas_src>
import functools

import jax
import jax.numpy as jnp
from jax import lax
from jax.experimental import pallas as pl
from jax.experimental.pallas import tpu as pltpu


# ----------------------------------------------------------------------------
# Fused GAT + MLP kernel (per dst-node tile).
# ----------------------------------------------------------------------------
def gat_mlp_kernel(x_full_ref, x_tile_ref, w_ref, a_dst_ref, a_src_ref,
                   adj_ref, bgat_ref, temb_ref,
                   w1_ref, b1_ref, g1_ref, bb1_ref,
                   w2_ref, b2_ref, g2_ref, bb2_ref,
                   out_ref, stats_ref, *, heads, hid):
    f32 = jnp.float32
    bf16 = jnp.bfloat16
    neg = jnp.float32(-1e30)
    eps = jnp.float32(1e-5)

    # ---- GAT linear transform (bf16 MXU, f32 accumulate) --------------------
    h_all = jnp.dot(x_full_ref[...], w_ref[...],
                    preferred_element_type=f32)             # [N, heads*hid]
    h_tile = jnp.dot(x_tile_ref[...], w_ref[...],
                     preferred_element_type=f32)            # [T, heads*hid]
    h_all_b = h_all.astype(bf16)
    h_tile_b = h_tile.astype(bf16)

    # Attention projections for ALL heads in one matmul each (block-diagonal
    # a_dst / a_src matrices built in the wrapper).
    alpha_dst = jnp.dot(h_tile_b, a_dst_ref[...],
                        preferred_element_type=f32)         # [T, heads]
    alpha_src_t = lax.dot_general(h_tile_b, a_src_ref[...],
                                  (((1,), (1,)), ((), ())),
                                  preferred_element_type=f32)   # [T, heads]
    alpha_src_rows = lax.dot_general(a_src_ref[...], h_all_b,
                                     (((1,), (1,)), ((), ())),
                                     preferred_element_type=f32)  # [heads, N]

    mask = adj_ref[...].astype(f32) > 0.0                   # [T, N], adj is int8

    tile_n = x_tile_ref.shape[0]
    acc = jnp.zeros((tile_n, hid), f32)
    maxs = []
    denoms = []
    # heads is small (2); unrolled loop is fine.
    # TODO(synk): switch to lax.fori_loop + VMEM scratch accumulator if heads >> 2.
    for h in range(heads):
        h_src = h_all_b[:, h * hid:(h + 1) * hid]           # [N, hid] bf16
        s = alpha_dst[:, h:h + 1] + alpha_src_rows[h:h + 1, :]   # [T, N] f32
        s = jnp.where(s > 0.0, s, 0.2 * s)                  # leaky_relu(0.2)
        sm = jnp.where(mask, s, neg)
        m = jnp.max(sm, axis=-1, keepdims=True)             # [T, 1]
        e = jnp.where(mask, jnp.exp(sm - m), 0.0)
        d = jnp.sum(e, axis=-1, keepdims=True)              # [T, 1]
        d = jnp.where(d == 0.0, 1.0, d)                     # guard isolated nodes
        attn = e * pl.reciprocal(d, approx=True)            # [T, N]
        acc = acc + jnp.dot(attn.astype(bf16), h_src,
                            preferred_element_type=f32)     # [T, hid]
        maxs.append(m)
        denoms.append(d)

    gat = acc * (1.0 / heads) + bgat_ref[...]               # mean over heads + bias
    gat = jnp.maximum(gat, 0.0)                             # F.relu after GAT

    # Per-node softmax stats so the wrapper can rebuild per-edge scores /
    # weights without dense [heads, N, N] HBM traffic.
    stats_ref[...] = jnp.concatenate(
        [alpha_dst, alpha_src_t] + maxs + denoms, axis=-1)  # [T, 4*heads]

    # ---- fused MLP: Linear -> ReLU -> LN -> Linear -> ReLU -> LN ------------
    x_cat = jnp.concatenate([gat, temb_ref[...]], axis=-1)  # [T, 2*hid]
    y = jnp.dot(x_cat.astype(bf16), w1_ref[...],
                preferred_element_type=f32) + b1_ref[...]
    y = jnp.maximum(y, 0.0)
    mu = jnp.mean(y, axis=-1, keepdims=True)
    var = jnp.mean((y - mu) * (y - mu), axis=-1, keepdims=True)
    y = (y - mu) * lax.rsqrt(var + eps) * g1_ref[...] + bb1_ref[...]

    z = jnp.dot(y.astype(bf16), w2_ref[...],
                preferred_element_type=f32) + b2_ref[...]
    z = jnp.maximum(z, 0.0)
    mu2 = jnp.mean(z, axis=-1, keepdims=True)
    var2 = jnp.mean((z - mu2) * (z - mu2), axis=-1, keepdims=True)
    out_ref[...] = (z - mu2) * lax.rsqrt(var2 + eps) * g2_ref[...] + bb2_ref[...]


# ----------------------------------------------------------------------------
# Wrapper
# ----------------------------------------------------------------------------
def _pick_tile(n):
    for t in (512, 256, 128):
        if n > t and n % t == 0:
            return t
    return n


def regular_gat_forward(params, x, edge_index, labels):
    """Returns (x_out [N, C], attention_scores [E, heads], attention_weights [E, heads])."""
    n, fin = x.shape
    emb = params["emb"]
    hid = emb.shape[1]                         # static (from array shape)
    heads = params["w_gat"].shape[1] // hid    # static
    out_c = params["w2"].shape[1]              # static
    tile_n = _pick_tile(n)
    grid = (n // tile_n,)

    # Label embedding lookup (XLA glue; plain gather).
    t_idx = jnp.argmax(labels, axis=1)
    t_emb = jnp.take(emb, t_idx, axis=0)                        # [N, hid] f32

    # Dense int8 adjacency: adj[dst, src] = 1 iff edge src -> dst exists.
    # TODO(synk): for static graphs build this once outside the per-call jit.
    src, dst = edge_index[0], edge_index[1]
    adj = jnp.zeros((n, n), jnp.int8).at[dst, src].set(1)

    # Block-diagonal attention-vector matrices: one matmul computes alpha for
    # every head at once instead of 2*heads degenerate 1-wide MXU calls.
    a_dst = params["a_dst"]                                     # [heads, hid]
    a_src = params["a_src"]                                     # [heads, hid]
    eye = jnp.eye(heads, dtype=jnp.float32)
    a_dst_bd = (a_dst[:, :, None] * eye[:, None, :]).reshape(heads * hid, heads)
    a_src_bd = (eye[:, :, None] * a_src[None, :, :]).reshape(heads, heads * hid)

    bf16 = jnp.bfloat16
    x_b = x.astype(bf16)

    const = lambda i: (0, 0)
    tiled = lambda i: (i, 0)

    out, stats = pl.pallas_call(
        functools.partial(gat_mlp_kernel, heads=heads, hid=hid),
        grid=grid,
        in_specs=[
            pl.BlockSpec((n, fin), const),                # x (all src rows, resident)
            pl.BlockSpec((tile_n, fin), tiled),           # x (dst tile rows)
            pl.BlockSpec((fin, heads * hid), const),      # W_gat
            pl.BlockSpec((heads * hid, heads), const),    # a_dst block-diag
            pl.BlockSpec((heads, heads * hid), const),    # a_src block-diag
            pl.BlockSpec((tile_n, n), tiled),             # adjacency rows (int8)
            pl.BlockSpec((1, hid), const),                # GAT bias
            pl.BlockSpec((tile_n, hid), tiled),           # label embedding
            pl.BlockSpec((2 * hid, hid), const),          # w1
            pl.BlockSpec((1, hid), const),                # b1
            pl.BlockSpec((1, hid), const),                # g1
            pl.BlockSpec((1, hid), const),                # bb1
            pl.BlockSpec((hid, out_c), const),            # w2
            pl.BlockSpec((1, out_c), const),              # b2
            pl.BlockSpec((1, out_c), const),              # g2
            pl.BlockSpec((1, out_c), const),              # bb2
        ],
        out_specs=(
            pl.BlockSpec((tile_n, out_c), tiled),
            pl.BlockSpec((tile_n, 4 * heads), tiled),
        ),
        out_shape=(
            jax.ShapeDtypeStruct((n, out_c), jnp.float32),
            jax.ShapeDtypeStruct((n, 4 * heads), jnp.float32),
        ),
        compiler_params=pltpu.CompilerParams(
            dimension_semantics=("parallel",)),
    )(x_b, x_b, params["w_gat"].astype(bf16),
      a_dst_bd.astype(bf16), a_src_bd.astype(bf16),
      adj, params["b_gat"], t_emb,
      params["w1"].astype(bf16), params["b1"], params["g1"], params["bb1"],
      params["w2"].astype(bf16), params["b2"], params["g2"], params["bb2"])

    # Per-edge attention scores / weights from per-node stats (cheap O(E*heads)
    # gathers instead of a fancy-gather over a dense [heads, N, N] array).
    alpha_dst_n = stats[:, 0:heads]
    alpha_src_n = stats[:, heads:2 * heads]
    row_max = stats[:, 2 * heads:3 * heads]
    row_den = stats[:, 3 * heads:4 * heads]
    logit = alpha_dst_n[dst] + alpha_src_n[src]                 # [E, heads]
    attention_scores = jnp.where(logit > 0.0, logit, 0.2 * logit)
    attention_weights = jnp.exp(attention_scores - row_max[dst]) / row_den[dst]

    # TODO(synk): dropout is identity (inference mode).
    return out, attention_scores, attention_weights


def init_params(key, in_channels_x, in_channels_t, out_channels,
                hidden_channels, heads):
    def xavier(k, shape):
        limit = jnp.sqrt(6.0 / (shape[0] + shape[1]))
        return jax.random.uniform(k, shape, jnp.float32, -limit, limit)

    ks = jax.random.split(key, 6)
    hid = hidden_channels
    return {
        # Embedding (torch default: N(0,1))
        "emb": jax.random.normal(ks[0], (in_channels_t, hid), jnp.float32),
        # GAT parameters
        "w_gat": xavier(ks[1], (in_channels_x, heads * hid)),
        "a_src": xavier(ks[2], (heads, hid)),
        "a_dst": xavier(ks[3], (heads, hid)),
        "b_gat": jnp.zeros((1, hid), jnp.float32),
        # MLP: Linear(2H, H) -> ReLU -> LN(H) -> Linear(H, C) -> ReLU -> LN(C)
        "w1": xavier(ks[4], (2 * hid, hid)),
        "b1": jnp.zeros((1, hid), jnp.float32),
        "g1": jnp.ones((1, hid), jnp.float32),
        "bb1": jnp.zeros((1, hid), jnp.float32),
        "w2": xavier(ks[5], (hid, out_channels)),
        "b2": jnp.zeros((1, out_channels), jnp.float32),
        "g2": jnp.ones((1, out_channels), jnp.float32),
        "bb2": jnp.zeros((1, out_channels), jnp.float32),
    }


if __name__ == "__main__":
    # Small synthetic graph; N chosen so the dst-tile grid has >1 step.
    N = 256              # nodes
    E = 512              # edges
    IN_X = 16            # in_channels_x
    IN_T = 6             # in_channels_t (number of label classes)
    HID = 32             # hidden_channels
    OUT_C = 8            # out_channels
    HEADS = 2

    key = jax.random.PRNGKey(0)
    k_p, k_x, k_t, k_e1, k_e2 = jax.random.split(key, 5)

    params = init_params(k_p, IN_X, IN_T, OUT_C, HID, HEADS)

    x = jax.random.normal(k_x, (N, IN_X), jnp.float32)
    labels = jax.random.normal(k_t, (N, IN_T), jnp.float32)   # argmax -> class idx
    edge_index = jnp.stack([
        jax.random.randint(k_e1, (E,), 0, N),
        jax.random.randint(k_e2, (E,), 0, N),
    ], axis=0).astype(jnp.int32)

    x_out, att_scores, att_weights = jax.jit(regular_gat_forward)(
        params, x, edge_index, labels)
    jax.block_until_ready((x_out, att_scores, att_weights))

    assert x_out.shape == (N, OUT_C)
    assert att_scores.shape == (E, HEADS)
    assert att_weights.shape == (E, HEADS)
    assert bool(jnp.all(jnp.isfinite(x_out)))
    assert bool(jnp.all(jnp.isfinite(att_weights)))
    print("KERNEL_OK")
</pallas_src>

<mosaic_0001>
module attributes {stable_mosaic.version = 11 : i64} {
  func.func @gat_mlp_kernel(%arg0: i32, %arg1: memref<256x16xbf16, #tpu.memory_space<vmem>>, %arg2: memref<128x16xbf16, #tpu.memory_space<vmem>>, %arg3: memref<16x64xbf16, #tpu.memory_space<vmem>>, %arg4: memref<64x2xbf16, #tpu.memory_space<vmem>>, %arg5: memref<2x64xbf16, #tpu.memory_space<vmem>>, %arg6: memref<128x256xi8, #tpu.memory_space<vmem>>, %arg7: memref<1x32xf32, #tpu.memory_space<vmem>>, %arg8: memref<128x32xf32, #tpu.memory_space<vmem>>, %arg9: memref<64x32xbf16, #tpu.memory_space<vmem>>, %arg10: memref<1x32xf32, #tpu.memory_space<vmem>>, %arg11: memref<1x32xf32, #tpu.memory_space<vmem>>, %arg12: memref<1x32xf32, #tpu.memory_space<vmem>>, %arg13: memref<32x8xbf16, #tpu.memory_space<vmem>>, %arg14: memref<1x8xf32, #tpu.memory_space<vmem>>, %arg15: memref<1x8xf32, #tpu.memory_space<vmem>>, %arg16: memref<1x8xf32, #tpu.memory_space<vmem>>, %arg17: memref<128x8xf32, #tpu.memory_space<vmem>>, %arg18: memref<128x8xf32, #tpu.memory_space<vmem>>) attributes {dimension_semantics = [#tpu.dimension_semantics<parallel>], iteration_bounds = array<i64: 2>, scalar_prefetch = 0 : i64, scratch_operands = 0 : i64, tpu.core_type = #tpu.core_type<tc>, window_params = [{pipeline_mode = #tpu.pipeline_mode<synchronous>, transform_indices = @transform_0, window_bounds = array<i64: 256, 16>}, {transform_indices = @transform_1, window_bounds = array<i64: 128, 16>}, {pipeline_mode = #tpu.pipeline_mode<synchronous>, transform_indices = @transform_2, window_bounds = array<i64: 16, 64>}, {pipeline_mode = #tpu.pipeline_mode<synchronous>, transform_indices = @transform_3, window_bounds = array<i64: 64, 2>}, {pipeline_mode = #tpu.pipeline_mode<synchronous>, transform_indices = @transform_4, window_bounds = array<i64: 2, 64>}, {transform_indices = @transform_5, window_bounds = array<i64: 128, 256>}, {pipeline_mode = #tpu.pipeline_mode<synchronous>, transform_indices = @transform_6, window_bounds = array<i64: 1, 32>}, {transform_indices = @transform_7, window_bounds = array<i64: 128, 32>}, {pipeline_mode = #tpu.pipeline_mode<synchronous>, transform_indices = @transform_8, window_bounds = array<i64: 64, 32>}, {pipeline_mode = #tpu.pipeline_mode<synchronous>, transform_indices = @transform_9, window_bounds = array<i64: 1, 32>}, {pipeline_mode = #tpu.pipeline_mode<synchronous>, transform_indices = @transform_10, window_bounds = array<i64: 1, 32>}, {pipeline_mode = #tpu.pipeline_mode<synchronous>, transform_indices = @transform_11, window_bounds = array<i64: 1, 32>}, {pipeline_mode = #tpu.pipeline_mode<synchronous>, transform_indices = @transform_12, window_bounds = array<i64: 32, 8>}, {pipeline_mode = #tpu.pipeline_mode<synchronous>, transform_indices = @transform_13, window_bounds = array<i64: 1, 8>}, {pipeline_mode = #tpu.pipeline_mode<synchronous>, transform_indices = @transform_14, window_bounds = array<i64: 1, 8>}, {pipeline_mode = #tpu.pipeline_mode<synchronous>, transform_indices = @transform_15, window_bounds = array<i64: 1, 8>}, {transform_indices = @transform_16, window_bounds = array<i64: 128, 8>}, {transform_indices = @transform_17, window_bounds = array<i64: 128, 8>}]} {
    %c0 = arith.constant 0 : index
    %c0_0 = arith.constant 0 : index
    %0 = vector.load %arg1[%c0, %c0_0] : memref<256x16xbf16, #tpu.memory_space<vmem>>, vector<256x16xbf16>
    %c0_1 = arith.constant 0 : index
    %c0_2 = arith.constant 0 : index
    %1 = vector.load %arg3[%c0_1, %c0_2] : memref<16x64xbf16, #tpu.memory_space<vmem>>, vector<16x64xbf16>
    %cst = arith.constant dense<0.000000e+00> : vector<256x64xf32>
    %2 = tpu.matmul %0, %1, %cst {dimension_numbers = #tpu.dot_dimension_numbers<[1], [0], [0], [1], [0, 0, 1, 1], [], []>} : vector<256x16xbf16>, vector<16x64xbf16>, vector<256x64xf32> -> vector<256x64xf32>
    %c0_3 = arith.constant 0 : index
    %c0_4 = arith.constant 0 : index
    %3 = vector.load %arg2[%c0_3, %c0_4] : memref<128x16xbf16, #tpu.memory_space<vmem>>, vector<128x16xbf16>
    %c0_5 = arith.constant 0 : index
    %c0_6 = arith.constant 0 : index
    %4 = vector.load %arg3[%c0_5, %c0_6] : memref<16x64xbf16, #tpu.memory_space<vmem>>, vector<16x64xbf16>
    %cst_7 = arith.constant dense<0.000000e+00> : vector<128x64xf32>
    %5 = tpu.matmul %3, %4, %cst_7 {dimension_numbers = #tpu.dot_dimension_numbers<[1], [0], [0], [1], [0, 0, 1, 1], [], []>} : vector<128x16xbf16>, vector<16x64xbf16>, vector<128x64xf32> -> vector<128x64xf32>
    %6 = arith.truncf %2 : vector<256x64xf32> to vector<256x64xbf16>
    %7 = arith.truncf %5 : vector<128x64xf32> to vector<128x64xbf16>
    %c0_8 = arith.constant 0 : index
    %c0_9 = arith.constant 0 : index
    %8 = vector.load %arg4[%c0_8, %c0_9] : memref<64x2xbf16, #tpu.memory_space<vmem>>, vector<64x2xbf16>
    %cst_10 = arith.constant dense<0.000000e+00> : vector<128x2xf32>
    %9 = tpu.matmul %7, %8, %cst_10 {dimension_numbers = #tpu.dot_dimension_numbers<[1], [0], [0], [1], [0, 0, 1, 1], [], []>} : vector<128x64xbf16>, vector<64x2xbf16>, vector<128x2xf32> -> vector<128x2xf32>
    %c0_11 = arith.constant 0 : index
    %c0_12 = arith.constant 0 : index
    %10 = vector.load %arg5[%c0_11, %c0_12] : memref<2x64xbf16, #tpu.memory_space<vmem>>, vector<2x64xbf16>
    %cst_13 = arith.constant dense<0.000000e+00> : vector<128x2xf32>
    %11 = tpu.matmul %7, %10, %cst_13 {dimension_numbers = #tpu.dot_dimension_numbers<[1], [1], [0], [0], [0, 0, 1, 0], [], []>} : vector<128x64xbf16>, vector<2x64xbf16>, vector<128x2xf32> -> vector<128x2xf32>
    %c0_14 = arith.constant 0 : index
    %c0_15 = arith.constant 0 : index
    %12 = vector.load %arg5[%c0_14, %c0_15] : memref<2x64xbf16, #tpu.memory_space<vmem>>, vector<2x64xbf16>
    %cst_16 = arith.constant dense<0.000000e+00> : vector<2x256xf32>
    %13 = tpu.matmul %12, %6, %cst_16 {dimension_numbers = #tpu.dot_dimension_numbers<[1], [1], [0], [0], [0, 0, 1, 0], [], []>} : vector<2x64xbf16>, vector<256x64xbf16>, vector<2x256xf32> -> vector<2x256xf32>
    %c0_17 = arith.constant 0 : index
    %c0_18 = arith.constant 0 : index
    %14 = vector.load %arg6[%c0_17, %c0_18] : memref<128x256xi8, #tpu.memory_space<vmem>>, vector<128x256xi8>
    %15 = arith.sitofp %14 : vector<128x256xi8> to vector<128x256xf32>
    %cst_19 = arith.constant 0.000000e+00 : f32
    %16 = vector.broadcast %cst_19 : f32 to vector<128x256xf32>
    %17 = arith.cmpf ogt, %15, %16 : vector<128x256xf32>
    %cst_20 = arith.constant 0.000000e+00 : f32
    %18 = vector.broadcast %cst_20 : f32 to vector<128x32xf32>
    %19 = vector.extract_strided_slice %6 {offsets = [0, 0], sizes = [256, 32], strides = [1, 1]} : vector<256x64xbf16> to vector<256x32xbf16>
    %20 = vector.extract_strided_slice %9 {offsets = [0, 0], sizes = [128, 1], strides = [1, 1]} : vector<128x2xf32> to vector<128x1xf32>
    %21 = vector.extract_strided_slice %13 {offsets = [0, 0], sizes = [1, 256], strides = [1, 1]} : vector<2x256xf32> to vector<1x256xf32>
    %22 = vector.broadcast %20 : vector<128x1xf32> to vector<128x256xf32>
    %23 = vector.broadcast %21 : vector<1x256xf32> to vector<128x256xf32>
    %24 = arith.addf %22, %23 : vector<128x256xf32>
    %cst_21 = arith.constant 0.000000e+00 : f32
    %25 = vector.broadcast %cst_21 : f32 to vector<128x256xf32>
    %26 = arith.cmpf ogt, %24, %25 : vector<128x256xf32>
    %cst_22 = arith.constant 2.000000e-01 : f32
    %27 = vector.broadcast %cst_22 : f32 to vector<128x256xf32>
    %28 = arith.mulf %27, %24 : vector<128x256xf32>
    %29 = arith.select %26, %24, %28 : vector<128x256xi1>, vector<128x256xf32>
    %cst_23 = arith.constant -1.000000e+30 : f32
    %30 = vector.broadcast %cst_23 : f32 to vector<128x256xf32>
    %31 = arith.select %17, %29, %30 : vector<128x256xi1>, vector<128x256xf32>
    %cst_24 = arith.constant dense<0xFF800000> : vector<128xf32>
    %32 = vector.multi_reduction <maximumf>, %31, %cst_24 [1] : vector<128x256xf32> to vector<128xf32>
    %33 = vector.shape_cast %32 : vector<128xf32> to vector<128x1xf32>
    %34 = vector.broadcast %33 : vector<128x1xf32> to vector<128x256xf32>
    %35 = arith.subf %31, %34 : vector<128x256xf32>
    %36 = math.exp %35 : vector<128x256xf32>
    %cst_25 = arith.constant 0.000000e+00 : f32
    %37 = vector.broadcast %cst_25 : f32 to vector<128x256xf32>
    %38 = arith.select %17, %36, %37 : vector<128x256xi1>, vector<128x256xf32>
    %cst_26 = arith.constant dense<0.000000e+00> : vector<128xf32>
    %39 = vector.multi_reduction <add>, %38, %cst_26 [1] : vector<128x256xf32> to vector<128xf32>
    %40 = vector.shape_cast %39 : vector<128xf32> to vector<128x1xf32>
    %cst_27 = arith.constant 0.000000e+00 : f32
    %41 = vector.broadcast %cst_27 : f32 to vector<128x1xf32>
    %42 = arith.cmpf oeq, %40, %41 : vector<128x1xf32>
    %cst_28 = arith.constant 1.000000e+00 : f32
    %43 = vector.broadcast %cst_28 : f32 to vector<128x1xf32>
    %44 = arith.select %42, %43, %40 : vector<128x1xi1>, vector<128x1xf32>
    %45 = tpu.reciprocal %44 {approx = true} : vector<128x1xf32> -> vector<128x1xf32>
    %46 = vector.broadcast %45 : vector<128x1xf32> to vector<128x256xf32>
    %47 = arith.mulf %38, %46 : vector<128x256xf32>
    %48 = arith.truncf %47 : vector<128x256xf32> to vector<128x256xbf16>
    %cst_29 = arith.constant dense<0.000000e+00> : vector<128x32xf32>
    %49 = tpu.matmul %48, %19, %cst_29 {dimension_numbers = #tpu.dot_dimension_numbers<[1], [0], [0], [1], [0, 0, 1, 1], [], []>} : vector<128x256xbf16>, vector<256x32xbf16>, vector<128x32xf32> -> vector<128x32xf32>
    %50 = arith.addf %18, %49 : vector<128x32xf32>
    %51 = vector.extract_strided_slice %6 {offsets = [0, 32], sizes = [256, 32], strides = [1, 1]} : vector<256x64xbf16> to vector<256x32xbf16>
    %52 = vector.extract_strided_slice %9 {offsets = [0, 1], sizes = [128, 1], strides = [1, 1]} : vector<128x2xf32> to vector<128x1xf32>
    %53 = vector.extract_strided_slice %13 {offsets = [1, 0], sizes = [1, 256], strides = [1, 1]} : vector<2x256xf32> to vector<1x256xf32>
    %54 = vector.broadcast %52 : vector<128x1xf32> to vector<128x256xf32>
    %55 = vector.broadcast %53 : vector<1x256xf32> to vector<128x256xf32>
    %56 = arith.addf %54, %55 : vector<128x256xf32>
    %cst_30 = arith.constant 0.000000e+00 : f32
    %57 = vector.broadcast %cst_30 : f32 to vector<128x256xf32>
    %58 = arith.cmpf ogt, %56, %57 : vector<128x256xf32>
    %cst_31 = arith.constant 2.000000e-01 : f32
    %59 = vector.broadcast %cst_31 : f32 to vector<128x256xf32>
    %60 = arith.mulf %59, %56 : vector<128x256xf32>
    %61 = arith.select %58, %56, %60 : vector<128x256xi1>, vector<128x256xf32>
    %cst_32 = arith.constant -1.000000e+30 : f32
    %62 = vector.broadcast %cst_32 : f32 to vector<128x256xf32>
    %63 = arith.select %17, %61, %62 : vector<128x256xi1>, vector<128x256xf32>
    %cst_33 = arith.constant dense<0xFF800000> : vector<128xf32>
    %64 = vector.multi_reduction <maximumf>, %63, %cst_33 [1] : vector<128x256xf32> to vector<128xf32>
    %65 = vector.shape_cast %64 : vector<128xf32> to vector<128x1xf32>
    %66 = vector.broadcast %65 : vector<128x1xf32> to vector<128x256xf32>
    %67 = arith.subf %63, %66 : vector<128x256xf32>
    %68 = math.exp %67 : vector<128x256xf32>
    %cst_34 = arith.constant 0.000000e+00 : f32
    %69 = vector.broadcast %cst_34 : f32 to vector<128x256xf32>
    %70 = arith.select %17, %68, %69 : vector<128x256xi1>, vector<128x256xf32>
    %cst_35 = arith.constant dense<0.000000e+00> : vector<128xf32>
    %71 = vector.multi_reduction <add>, %70, %cst_35 [1] : vector<128x256xf32> to vector<128xf32>
    %72 = vector.shape_cast %71 : vector<128xf32> to vector<128x1xf32>
    %cst_36 = arith.constant 0.000000e+00 : f32
    %73 = vector.broadcast %cst_36 : f32 to vector<128x1xf32>
    %74 = arith.cmpf oeq, %72, %73 : vector<128x1xf32>
    %cst_37 = arith.constant 1.000000e+00 : f32
    %75 = vector.broadcast %cst_37 : f32 to vector<128x1xf32>
    %76 = arith.select %74, %75, %72 : vector<128x1xi1>, vector<128x1xf32>
    %77 = tpu.reciprocal %76 {approx = true} : vector<128x1xf32> -> vector<128x1xf32>
    %78 = vector.broadcast %77 : vector<128x1xf32> to vector<128x256xf32>
    %79 = arith.mulf %70, %78 : vector<128x256xf32>
    %80 = arith.truncf %79 : vector<128x256xf32> to vector<128x256xbf16>
    %cst_38 = arith.constant dense<0.000000e+00> : vector<128x32xf32>
    %81 = tpu.matmul %80, %51, %cst_38 {dimension_numbers = #tpu.dot_dimension_numbers<[1], [0], [0], [1], [0, 0, 1, 1], [], []>} : vector<128x256xbf16>, vector<256x32xbf16>, vector<128x32xf32> -> vector<128x32xf32>
    %82 = arith.addf %50, %81 : vector<128x32xf32>
    %cst_39 = arith.constant 5.000000e-01 : f32
    %83 = vector.broadcast %cst_39 : f32 to vector<128x32xf32>
    %84 = arith.mulf %82, %83 : vector<128x32xf32>
    %c0_40 = arith.constant 0 : index
    %c0_41 = arith.constant 0 : index
    %85 = vector.load %arg7[%c0_40, %c0_41] : memref<1x32xf32, #tpu.memory_space<vmem>>, vector<1x32xf32>
    %86 = vector.broadcast %85 : vector<1x32xf32> to vector<128x32xf32>
    %87 = arith.addf %84, %86 : vector<128x32xf32>
    %cst_42 = arith.constant 0.000000e+00 : f32
    %88 = vector.broadcast %cst_42 : f32 to vector<128x32xf32>
    %89 = arith.maximumf %87, %88 : vector<128x32xf32>
    %90 = tpu.concatenate %9, %11, %33, %65, %44, %76 in 1 : vector<128x2xf32>, vector<128x2xf32>, vector<128x1xf32>, vector<128x1xf32>, vector<128x1xf32>, vector<128x1xf32> -> vector<128x8xf32>
    %c0_43 = arith.constant 0 : index
    %c0_44 = arith.constant 0 : index
    %91 = vector.load %arg18[%c0_43, %c0_44] : memref<128x8xf32, #tpu.memory_space<vmem>>, vector<128x8xf32>
    tpu.vector_store %arg18[%c0_43, %c0_44], %90 {strides = array<i32>} : memref<128x8xf32, #tpu.memory_space<vmem>>, vector<128x8xf32>,
    %c0_45 = arith.constant 0 : index
    %c0_46 = arith.constant 0 : index
    %92 = vector.load %arg8[%c0_45, %c0_46] : memref<128x32xf32, #tpu.memory_space<vmem>>, vector<128x32xf32>
    %93 = tpu.concatenate %89, %92 in 1 : vector<128x32xf32>, vector<128x32xf32> -> vector<128x64xf32>
    %94 = arith.truncf %93 : vector<128x64xf32> to vector<128x64xbf16>
    %c0_47 = arith.constant 0 : index
    %c0_48 = arith.constant 0 : index
    %95 = vector.load %arg9[%c0_47, %c0_48] : memref<64x32xbf16, #tpu.memory_space<vmem>>, vector<64x32xbf16>
    %cst_49 = arith.constant dense<0.000000e+00> : vector<128x32xf32>
    %96 = tpu.matmul %94, %95, %cst_49 {dimension_numbers = #tpu.dot_dimension_numbers<[1], [0], [0], [1], [0, 0, 1, 1], [], []>} : vector<128x64xbf16>, vector<64x32xbf16>, vector<128x32xf32> -> vector<128x32xf32>
    %c0_50 = arith.constant 0 : index
    %c0_51 = arith.constant 0 : index
    %97 = vector.load %arg10[%c0_50, %c0_51] : memref<1x32xf32, #tpu.memory_space<vmem>>, vector<1x32xf32>
    %98 = vector.broadcast %97 : vector<1x32xf32> to vector<128x32xf32>
    %99 = arith.addf %96, %98 : vector<128x32xf32>
    %cst_52 = arith.constant 0.000000e+00 : f32
    %100 = vector.broadcast %cst_52 : f32 to vector<128x32xf32>
    %101 = arith.maximumf %99, %100 : vector<128x32xf32>
    %cst_53 = arith.constant dense<0.000000e+00> : vector<128xf32>
    %102 = vector.multi_reduction <add>, %101, %cst_53 [1] : vector<128x32xf32> to vector<128xf32>
    %103 = vector.shape_cast %102 : vector<128xf32> to vector<128x1xf32>
    %cst_54 = arith.constant 3.200000e+01 : f32
    %104 = vector.broadcast %cst_54 : f32 to vector<128x1xf32>
    %105 = arith.divf %103, %104 : vector<128x1xf32>
    %106 = vector.broadcast %105 : vector<128x1xf32> to vector<128x32xf32>
    %107 = arith.subf %101, %106 : vector<128x32xf32>
    %108 = vector.broadcast %105 : vector<128x1xf32> to vector<128x32xf32>
    %109 = arith.subf %101, %108 : vector<128x32xf32>
    %110 = arith.mulf %107, %109 : vector<128x32xf32>
    %cst_55 = arith.constant dense<0.000000e+00> : vector<128xf32>
    %111 = vector.multi_reduction <add>, %110, %cst_55 [1] : vector<128x32xf32> to vector<128xf32>
    %112 = vector.shape_cast %111 : vector<128xf32> to vector<128x1xf32>
    %cst_56 = arith.constant 3.200000e+01 : f32
    %113 = vector.broadcast %cst_56 : f32 to vector<128x1xf32>
    %114 = arith.divf %112, %113 : vector<128x1xf32>
    %115 = vector.broadcast %105 : vector<128x1xf32> to vector<128x32xf32>
    %116 = arith.subf %101, %115 : vector<128x32xf32>
    %cst_57 = arith.constant 9.99999974E-6 : f32
    %117 = vector.broadcast %cst_57 : f32 to vector<128x1xf32>
    %118 = arith.addf %114, %117 : vector<128x1xf32>
    %119 = math.rsqrt %118 : vector<128x1xf32>
    %120 = vector.broadcast %119 : vector<128x1xf32> to vector<128x32xf32>
    %121 = arith.mulf %116, %120 : vector<128x32xf32>
    %c0_58 = arith.constant 0 : index
    %c0_59 = arith.constant 0 : index
    %122 = vector.load %arg11[%c0_58, %c0_59] : memref<1x32xf32, #tpu.memory_space<vmem>>, vector<1x32xf32>
    %123 = vector.broadcast %122 : vector<1x32xf32> to vector<128x32xf32>
    %124 = arith.mulf %121, %123 : vector<128x32xf32>
    %c0_60 = arith.constant 0 : index
    %c0_61 = arith.constant 0 : index
    %125 = vector.load %arg12[%c0_60, %c0_61] : memref<1x32xf32, #tpu.memory_space<vmem>>, vector<1x32xf32>
    %126 = vector.broadcast %125 : vector<1x32xf32> to vector<128x32xf32>
    %127 = arith.addf %124, %126 : vector<128x32xf32>
    %128 = arith.truncf %127 : vector<128x32xf32> to vector<128x32xbf16>
    %c0_62 = arith.constant 0 : index
    %c0_63 = arith.constant 0 : index
    %129 = vector.load %arg13[%c0_62, %c0_63] : memref<32x8xbf16, #tpu.memory_space<vmem>>, vector<32x8xbf16>
    %cst_64 = arith.constant dense<0.000000e+00> : vector<128x8xf32>
    %130 = tpu.matmul %128, %129, %cst_64 {dimension_numbers = #tpu.dot_dimension_numbers<[1], [0], [0], [1], [0, 0, 1, 1], [], []>} : vector<128x32xbf16>, vector<32x8xbf16>, vector<128x8xf32> -> vector<128x8xf32>
    %c0_65 = arith.constant 0 : index
    %c0_66 = arith.constant 0 : index
    %131 = vector.load %arg14[%c0_65, %c0_66] : memref<1x8xf32, #tpu.memory_space<vmem>>, vector<1x8xf32>
    %132 = vector.broadcast %131 : vector<1x8xf32> to vector<128x8xf32>
    %133 = arith.addf %130, %132 : vector<128x8xf32>
    %cst_67 = arith.constant 0.000000e+00 : f32
    %134 = vector.broadcast %cst_67 : f32 to vector<128x8xf32>
    %135 = arith.maximumf %133, %134 : vector<128x8xf32>
    %cst_68 = arith.constant dense<0.000000e+00> : vector<128xf32>
    %136 = vector.multi_reduction <add>, %135, %cst_68 [1] : vector<128x8xf32> to vector<128xf32>
    %137 = vector.shape_cast %136 : vector<128xf32> to vector<128x1xf32>
    %cst_69 = arith.constant 8.000000e+00 : f32
    %138 = vector.broadcast %cst_69 : f32 to vector<128x1xf32>
    %139 = arith.divf %137, %138 : vector<128x1xf32>
    %140 = vector.broadcast %139 : vector<128x1xf32> to vector<128x8xf32>
    %141 = arith.subf %135, %140 : vector<128x8xf32>
    %142 = vector.broadcast %139 : vector<128x1xf32> to vector<128x8xf32>
    %143 = arith.subf %135, %142 : vector<128x8xf32>
    %144 = arith.mulf %141, %143 : vector<128x8xf32>
    %cst_70 = arith.constant dense<0.000000e+00> : vector<128xf32>
    %145 = vector.multi_reduction <add>, %144, %cst_70 [1] : vector<128x8xf32> to vector<128xf32>
    %146 = vector.shape_cast %145 : vector<128xf32> to vector<128x1xf32>
    %cst_71 = arith.constant 8.000000e+00 : f32
    %147 = vector.broadcast %cst_71 : f32 to vector<128x1xf32>
    %148 = arith.divf %146, %147 : vector<128x1xf32>
    %149 = vector.broadcast %139 : vector<128x1xf32> to vector<128x8xf32>
    %150 = arith.subf %135, %149 : vector<128x8xf32>
    %cst_72 = arith.constant 9.99999974E-6 : f32
    %151 = vector.broadcast %cst_72 : f32 to vector<128x1xf32>
    %152 = arith.addf %148, %151 : vector<128x1xf32>
    %153 = math.rsqrt %152 : vector<128x1xf32>
    %154 = vector.broadcast %153 : vector<128x1xf32> to vector<128x8xf32>
    %155 = arith.mulf %150, %154 : vector<128x8xf32>
    %c0_73 = arith.constant 0 : index
    %c0_74 = arith.constant 0 : index
    %156 = vector.load %arg15[%c0_73, %c0_74] : memref<1x8xf32, #tpu.memory_space<vmem>>, vector<1x8xf32>
    %157 = vector.broadcast %156 : vector<1x8xf32> to vector<128x8xf32>
    %158 = arith.mulf %155, %157 : vector<128x8xf32>
    %c0_75 = arith.constant 0 : index
    %c0_76 = arith.constant 0 : index
    %159 = vector.load %arg16[%c0_75, %c0_76] : memref<1x8xf32, #tpu.memory_space<vmem>>, vector<1x8xf32>
    %160 = vector.broadcast %159 : vector<1x8xf32> to vector<128x8xf32>
    %161 = arith.addf %158, %160 : vector<128x8xf32>
    %c0_77 = arith.constant 0 : index
    %c0_78 = arith.constant 0 : index
    %162 = vector.load %arg17[%c0_77, %c0_78] : memref<128x8xf32, #tpu.memory_space<vmem>>, vector<128x8xf32>
    tpu.vector_store %arg17[%c0_77, %c0_78], %161 {strides = array<i32>} : memref<128x8xf32, #tpu.memory_space<vmem>>, vector<128x8xf32>,
    return
  }
  func.func @transform_0(%arg0: i32) -> (i32, i32) {
    %c0_i32 = arith.constant 0 : i32
    %c0_i32_0 = arith.constant 0 : i32
    %c0_i32_1 = arith.constant 0 : i32
    return %c0_i32, %c0_i32_0 : i32, i32
  }
  func.func @transform_1(%arg0: i32) -> (i32, i32) {
    %c0_i32 = arith.constant 0 : i32
    %c0_i32_0 = arith.constant 0 : i32
    return %arg0, %c0_i32 : i32, i32
  }
  func.func @transform_2(%arg0: i32) -> (i32, i32) {
    %c0_i32 = arith.constant 0 : i32
    %c0_i32_0 = arith.constant 0 : i32
    %c0_i32_1 = arith.constant 0 : i32
    return %c0_i32, %c0_i32_0 : i32, i32
  }
  func.func @transform_3(%arg0: i32) -> (i32, i32) {
    %c0_i32 = arith.constant 0 : i32
    %c0_i32_0 = arith.constant 0 : i32
    %c0_i32_1 = arith.constant 0 : i32
    return %c0_i32, %c0_i32_0 : i32, i32
  }
  func.func @transform_4(%arg0: i32) -> (i32, i32) {
    %c0_i32 = arith.constant 0 : i32
    %c0_i32_0 = arith.constant 0 : i32
    %c0_i32_1 = arith.constant 0 : i32
    return %c0_i32, %c0_i32_0 : i32, i32
  }
  func.func @transform_5(%arg0: i32) -> (i32, i32) {
    %c0_i32 = arith.constant 0 : i32
    %c0_i32_0 = arith.constant 0 : i32
    return %arg0, %c0_i32 : i32, i32
  }
  func.func @transform_6(%arg0: i32) -> (i32, i32) {
    %c0_i32 = arith.constant 0 : i32
    %c0_i32_0 = arith.constant 0 : i32
    %c0_i32_1 = arith.constant 0 : i32
    return %c0_i32, %c0_i32_0 : i32, i32
  }
  func.func @transform_7(%arg0: i32) -> (i32, i32) {
    %c0_i32 = arith.constant 0 : i32
    %c0_i32_0 = arith.constant 0 : i32
    return %arg0, %c0_i32 : i32, i32
  }
  func.func @transform_8(%arg0: i32) -> (i32, i32) {
    %c0_i32 = arith.constant 0 : i32
    %c0_i32_0 = arith.constant 0 : i32
    %c0_i32_1 = arith.constant 0 : i32
    return %c0_i32, %c0_i32_0 : i32, i32
  }
  func.func @transform_9(%arg0: i32) -> (i32, i32) {
    %c0_i32 = arith.constant 0 : i32
    %c0_i32_0 = arith.constant 0 : i32
    %c0_i32_1 = arith.constant 0 : i32
    return %c0_i32, %c0_i32_0 : i32, i32
  }
  func.func @transform_10(%arg0: i32) -> (i32, i32) {
    %c0_i32 = arith.constant 0 : i32
    %c0_i32_0 = arith.constant 0 : i32
    %c0_i32_1 = arith.constant 0 : i32
    return %c0_i32, %c0_i32_0 : i32, i32
  }
  func.func @transform_11(%arg0: i32) -> (i32, i32) {
    %c0_i32 = arith.constant 0 : i32
    %c0_i32_0 = arith.constant 0 : i32
    %c0_i32_1 = arith.constant 0 : i32
    return %c0_i32, %c0_i32_0 : i32, i32
  }
  func.func @transform_12(%arg0: i32) -> (i32, i32) {
    %c0_i32 = arith.constant 0 : i32
    %c0_i32_0 = arith.constant 0 : i32
    %c0_i32_1 = arith.constant 0 : i32
    return %c0_i32, %c0_i32_0 : i32, i32
  }
  func.func @transform_13(%arg0: i32) -> (i32, i32) {
    %c0_i32 = arith.constant 0 : i32
    %c0_i32_0 = arith.constant 0 : i32
    %c0_i32_1 = arith.constant 0 : i32
    return %c0_i32, %c0_i32_0 : i32, i32
  }
  func.func @transform_14(%arg0: i32) -> (i32, i32) {
    %c0_i32 = arith.constant 0 : i32
    %c0_i32_0 = arith.constant 0 : i32
    %c0_i32_1 = arith.constant 0 : i32
    return %c0_i32, %c0_i32_0 : i32, i32
  }
  func.func @transform_15(%arg0: i32) -> (i32, i32) {
    %c0_i32 = arith.constant 0 : i32
    %c0_i32_0 = arith.constant 0 : i32
    %c0_i32_1 = arith.constant 0 : i32
    return %c0_i32, %c0_i32_0 : i32, i32
  }
  func.func @transform_16(%arg0: i32) -> (i32, i32) {
    %c0_i32 = arith.constant 0 : i32
    %c0_i32_0 = arith.constant 0 : i32
    return %arg0, %c0_i32 : i32, i32
  }
  func.func @transform_17(%arg0: i32) -> (i32, i32) {
    %c0_i32 = arith.constant 0 : i32
    %c0_i32_0 = arith.constant 0 : i32
    return %arg0, %c0_i32 : i32, i32
  }
}

</mosaic_0001>

<bundles_post_ra>
// kernel: regular_gat_forward.1
= control target key start
LH: loop header
LB: loop body
LE: loop exit
PB: predicated region body
PF: predicated region fallthrough
CT: control target
= control target key end

     0   :  { %s5298_s24 = smov 0   ;;  %s7863_s0 = inlined_call_operand.vmem [shape: bf16[256,16], index: 0, kind: input, shape index: {}, may-alias: {0,1}]   ;;  %s7864_s1 = inlined_call_operand.vmem [shape: bf16[256,16], index: 1, kind: input, shape index: {}, may-alias: {0,1}]   ;;  %s7865_s2 = inlined_call_operand.vmem [shape: bf16[16,64], index: 2, kind: input, shape index: {}]   ;;  %s7866_s3 = inlined_call_operand.vmem [shape: bf16[64,2], index: 3, kind: input, shape index: {}]   ;;  %s7867_s4 = inlined_call_operand.vmem [shape: bf16[2,64], index: 4, kind: input, shape index: {}]   ;;  %s7868_s5 = inlined_call_operand.vmem [shape: s8[256,256], index: 5, kind: input, shape index: {}]   ;;  %s7869_s6 = inlined_call_operand.vmem [shape: f32[1,32], index: 6, kind: input, shape index: {}]   ;;  %s7870_s7 = inlined_call_operand.vmem [shape: f32[256,32], index: 7, kind: input, shape index: {}]   ;;  %s7871_s8 = inlined_call_operand.vmem [shape: bf16[64,32], index: 8, kind: input, shape index: {}]   ;;  %s7872_s9 = inlined_call_operand.vmem [shape: f32[1,32], index: 9, kind: input, shape index: {}]   ;;  %s7873_s10 = inlined_call_operand.vmem [shape: f32[1,32], index: 10, kind: input, shape index: {}]   ;;  %s7874_s11 = inlined_call_operand.vmem [shape: f32[1,32], index: 11, kind: input, shape index: {}]   ;;  %s7875_s12 = inlined_call_operand.vmem [shape: bf16[32,8], index: 12, kind: input, shape index: {}]   ;;  %s7876_s13 = inlined_call_operand.vmem [shape: f32[1,8], index: 13, kind: input, shape index: {}]   ;;  %s7877_s14 = inlined_call_operand.vmem [shape: f32[1,8], index: 14, kind: input, shape index: {}]   ;;  %s7878_s15 = inlined_call_operand.vmem [shape: f32[1,8], index: 15, kind: input, shape index: {}]   ;;  %s7879_s16 = inlined_call_operand.vmem [shape: f32[256,8], index: 16, kind: output, shape index: {0}]   ;;  %s7880_s17 = inlined_call_operand.vmem [shape: f32[256,8], index: 17, kind: output, shape index: {1}]  }
   0x1   :  { %8061 = sst [smem:[#allocation99_spill]] %s7863_s0 }
   0x2   :  { %8062 = sst [smem:[#allocation100_spill]] %s7864_s1 }
   0x3 LB: > { %s4289_s25 = sadd.s32 4294967295, %s5201_s24   ;;  %p4293_p0 = scmp.ge.s32.totalorder %s5201_s24, 1  ;;  %s5201_s24 = sphi %s5298_s24, %s28_s24  }
   0x4   : > { %p514_p1 = scmp.lt.s32.totalorder %s5201_s24, 3 }
   0x6   : > { %p515_p2 = pnand %p4293_p0, %p514_p1 }
   0x8   : > { %518 = sbr.rel (%p515_p2) target bundleno = 2363 (0x93b), region = 84 }
   0xf   : > { %v4904_v0 = vld [vmem:[%s7865_s2] sm:$0xff]   ;;  %vm734_vm0 = vcmask 130048   ;;  %s8063_s0 = sld [smem:[#allocation99_spill]]  ;;  %s4294_s30 = sshll.u32 %s4289_s25, 4  ;;  %v4930_v20 = vld [vmem:[%s7866_s3 + $0x8] sm:$0xff]   ;;  %v4931_v27 = vld [vmem:[%s7866_s3 + $0x10] sm:$0xff]  }
  0x10   : > { %4677 = vmatprep.subr.bf16.mxu0 %v4904_v0  ;;  %4815 = vmatprep.subr.bf16.mxu1 %v4904_v0  ;;  %p583_p3 = scmp.lt.s32.totalorder %s4294_s30, 31  ;;  %s8064_s20 = sld [smem:[#allocation100_spill]]  ;;  %v4929_v19 = vld [vmem:[%s7866_s3] sm:$0xff]   ;;  %v4932_v28 = vld [vmem:[%s7866_s3 + $0x18] sm:$0xff]   ;;  %vm7898_vm1 = vcmask 523264  }
  0x11   : > { %4678 = vmatpush3.bf16.msra.mxu0 %v4904_v0  ;;  %4816 = vmatpush3.bf16.msra.mxu1 %v4904_v0  ;;  %v5414_v29 = vld [vmem:[%s7867_s4] sm:$0x1] }
  0x12   : > { %s8407_s30 = smov (!%p583_p3, %s4294_s30), 31  ;;  %4711 = vmatprep.subr.bf16.mxu1 %v4904_v0  ;;  %4817 = vmatprep.subr.msk.bf16.mxu0 %vm7898_vm1, %v5414_v29  ;;  %v1301_v30 = vsel %vm7898_vm1, %v5414_v29, 0 }
  0x13   : > { %s4295_s28 = sshll.u32 %s8407_s30, 2 }
  0x14   : > { %s5658_s22 = scalar_lea.vmem %s7868_s5, %s4295_s28 }
  0x15   : > { %v4905_v1 = vld [vmem:[%s8063_s0] sm:$0xff]   ;;  %v4907_v3 = vld [vmem:[%s8063_s0 + $0x8] sm:$0xff]   ;;  %v4909_v5 = vld [vmem:[%s8063_s0 + $0x10] sm:$0xff]  }
  0x16   : > { %v4906_v2 = vld [vmem:[%s8063_s0 + $0x60] sm:$0xff]   ;;  %4679 = vmatprep.mubr.msk.bf16.mxu0 %vm734_vm0, %v4905_v1  ;;  %v4908_v4 = vld [vmem:[%s8063_s0 + $0x68] sm:$0xff]   ;;  %v4910_v6 = vld [vmem:[%s8063_s0 + $0x70] sm:$0xff]   ;;  %s5344_s21 = scalar_lea.vmem %s8064_s20, %s4295_s28  ;;  %s6750_s28 = sshll.u32 %s8407_s30, 3 }
  0x17   : > { %4703 = vmatprep.mubr.msk.bf16.mxu1 %vm734_vm0, %v4906_v2  ;;  %4680 = vmatmul.mubr.msk.bf16.vlgmr.msra.gmra.mrb[0].mxu0 %vm734_vm0, %v4907_v3  ;;  %v4911_v7 = vld [vmem:[%s8063_s0 + $0x18] sm:$0xff]   ;;  %v4913_v9 = vld [vmem:[%s8063_s0 + $0x20] sm:$0xff]   ;;  %v4915_v11 = vld [vmem:[%s8063_s0 + $0x28] sm:$0xff]   ;;  %s6758_s26 = scalar_lea.vmem %s7870_s7, %s6750_s28  ;;  %s5206_s30 = smov 32  }
  0x18   : > { %4704 = vmatmul.mubr.msk.bf16.vlgmr.msra.gmra.mrb[0].mxu1 %vm734_vm0, %v4908_v4  ;;  %4683 = vmatprep.mubr.msk.bf16.mxu0 %vm734_vm0, %v4909_v5  ;;  %v4912_v8 = vld [vmem:[%s8063_s0 + $0x78] sm:$0xff]   ;;  %v4914_v10 = vld [vmem:[%s5344_s21] sm:$0xff]   ;;  %v4916_v12 = vld [vmem:[%s5344_s21 + $0x8] sm:$0xff]   ;;  %s7757_s23 = scalar_lea.vmem %s7879_s16, %s6750_s28 }
  0x19   : > { %4712 = vmatpush3.bf16.msra.mxu1 %v4904_v0  ;;  %4707 = vmatprep.mubr.msk.bf16.mxu1 %vm734_vm0, %v4910_v6  ;;  %v4917_v13 = vld [vmem:[%s8063_s0 + $0x30] sm:$0xff]   ;;  %v4918_v15 = vld [vmem:[%s8063_s0 + $0x38] sm:$0xff]   ;;  %v4921_v17 = vld [vmem:[%s8063_s0 + $0x40] sm:$0xff]  }
  0x1a   : > { %v4919_v14 = vld [vmem:[%s5344_s21 + $0x10] sm:$0xff]   ;;  %v4920_v16 = vld [vmem:[%s5344_s21 + $0x18] sm:$0xff]   ;;  %v4925_v18 = vld [vmem:[%s5344_s21 + $0x20] sm:$0xff]   ;;  %4729 = vmatprep.subr.bf16.mxu1 %v4929_v19  ;;  %4754 = vmatpush3.bf16.xpose.msra.mxu0 %v1301_v30 }
  0x1b   : > { %v4922_v21 = vld [vmem:[%s8063_s0 + $0x48] sm:$0xff]   ;;  %v4923_v23 = vld [vmem:[%s8063_s0 + $0x50] sm:$0xff]   ;;  %v4924_v25 = vld [vmem:[%s8063_s0 + $0x58] sm:$0xff]  }
  0x1c   : > { %v4926_v22 = vld [vmem:[%s5344_s21 + $0x28] sm:$0xff]   ;;  %v4927_v24 = vld [vmem:[%s5344_s21 + $0x30] sm:$0xff]   ;;  %v4928_v26 = vld [vmem:[%s5344_s21 + $0x38] sm:$0xff]   ;;  %s5203_s21 = smov 96  }
  0x1f   : > { %4684 = vmatmul.mubr.msk.bf16.gmra.mrb[4].mxu0 %vm734_vm0, %v4911_v7 }
  0x20   : > { %4708 = vmatmul.mubr.msk.bf16.gmra.mrb[4].mxu1 %vm734_vm0, %v4912_v8  ;;  %4687 = vmatprep.mubr.msk.bf16.mxu0 %vm734_vm0, %v4913_v9 }
  0x21   : > { %4713 = vmatprep.mubr.msk.bf16.mxu1 %vm734_vm0, %v4914_v10 }
  0x27   : > { %4688 = vmatmul.mubr.msk.bf16.gmra.mrb[8].mxu0 %vm734_vm0, %v4915_v11 }
  0x28   : > { %4714 = vmatmul.mubr.msk.bf16.vlgmr.msra.gmra.mrb[8].mxu1 %vm734_vm0, %v4916_v12  ;;  %4691 = vmatprep.mubr.msk.bf16.mxu0 %vm734_vm0, %v4917_v13 }
  0x29   : > { %4717 = vmatprep.mubr.msk.bf16.mxu1 %vm734_vm0, %v4919_v14  ;;  %4730 = vmatpush3.bf16.msra.mxu1 %v4929_v19 }
  0x2a   : > { %4731 = vmatprep.subr.bf16.mxu1 %v4930_v20 }
  0x2d   : > { %4732 = vmatpush3.bf16.msra.mxu1 %v4930_v20 }
  0x2e   : > { %4733 = vmatprep.subr.bf16.mxu1 %v4931_v27 }
  0x2f   : > { %4692 = vmatmul.mubr.msk.bf16.gmra.mrb[12].mxu0 %vm734_vm0, %v4918_v15 }
  0x30   : > { %4718 = vmatmul.mubr.msk.bf16.gmra.mrb[12].mxu1 %vm734_vm0, %v4920_v16  ;;  %4695 = vmatprep.mubr.msk.bf16.mxu0 %vm734_vm0, %v4921_v17 }
  0x31   : > { %4721 = vmatprep.mubr.msk.bf16.mxu1 %vm734_vm0, %v4925_v18  ;;  %4734 = vmatpush3.bf16.msra.mxu1 %v4931_v27 }
  0x32   : > { %4735 = vmatprep.subr.bf16.mxu1 %v4932_v28 }
  0x35   : > { %4736 = vmatpush3.bf16.msra.mxu1 %v4932_v28 }
  0x37   : > { %4696 = vmatmul.mubr.msk.bf16.gmra.mrb[16].mxu0 %vm734_vm0, %v4922_v21 }
  0x38   : > { %4722 = vmatmul.mubr.msk.bf16.gmra.mrb[16].mxu1 %vm734_vm0, %v4926_v22  ;;  %4699 = vmatprep.mubr.msk.bf16.mxu0 %vm734_vm0, %v4923_v23 }
  0x39   : > { %4725 = vmatprep.mubr.msk.bf16.mxu1 %vm734_vm0, %v4927_v24 }
  0x3f   : > { %4700 = vmatmul.mubr.msk.bf16.gmra.mrb[20].mxu0 %vm734_vm0, %v4924_v25 }
  0x40   : > { %4726 = vmatmul.mubr.msk.bf16.gmra.mrb[20].mxu1 %vm734_vm0, %v4928_v26 }
  0xea   : > { %v4681_v31 = vpop.f32.mrb[0].mxu0 }
  0xeb   : > { %v4705_v32 = vpop.f32.mrb[0].mxu1  ;;  %v817_v33 = vpop.f32.mrb[1].mxu0 }
  0xec   : > { %v913_v34 = vpop.f32.mrb[1].mxu1  ;;  %v4682_v35 = vpop.f32.mrb[2].mxu0 }
  0xed   : > { %v4706_v36 = vpop.f32.mrb[2].mxu1  ;;  %v5420_v37 = vpack.c.bf16 %v4682_v35, %v4681_v31  ;;  %v820_v40 = vpop.f32.mrb[3].mxu0 }
  0xee   : > { %v5422_v38 = vpack.c.bf16 %v4706_v36, %v4705_v32  ;;  %v916_v39 = vpop.f32.mrb[3].mxu1  ;;  %v5426_v42 = vpack.c.bf16 %v820_v40, %v817_v33 }
  0xef   : > { %v5424_v41 = vpack.c.bf16 %v916_v39, %v913_v34  ;;  %2739 = vrot.lane.b32.xlu0 %v5420_v37, %s5203_s21 }
  0xf0   : > { %2763 = vrot.lane.b32.xlu1 %v5422_v38, %s5203_s21  ;;  %v1401_v26 = vsel %vm7898_vm1, %v5426_v42, 0 }
  0xf2   : > { %v4685_v43 = vpop.f32.mrb[4].mxu0 }
  0xf3   : > { %v4709_v44 = vpop.f32.mrb[4].mxu1  ;;  %2761 = vrot.lane.b32.xlu0 %v5424_v41, %s5203_s21  ;;  %v833_v46 = vpop.f32.mrb[5].mxu0 }
  0xf4   : > { %v929_v45 = vpop.f32.mrb[5].mxu1  ;;  %2737 = vrot.lane.b32.xlu1 %v5426_v42, %s5203_s21  ;;  %v4686_v47 = vpop.f32.mrb[6].mxu0 }
  0xf5   : > { %v4710_v48 = vpop.f32.mrb[6].mxu1  ;;  %v5436_v49 = vpack.c.bf16 %v4686_v47, %v4685_v43  ;;  %v836_v52 = vpop.f32.mrb[7].mxu0 }
  0xf6   : > { %v5438_v50 = vpack.c.bf16 %v4710_v48, %v4709_v44  ;;  %v932_v51 = vpop.f32.mrb[7].mxu1  ;;  %v5442_v54 = vpack.c.bf16 %v836_v52, %v833_v46  ;;  %v1404_v44 = vsel %vm7898_vm1, %v5420_v37, 0  ;;  %v5204_v46 = vmov 0  }
  0xf7   : > { %v5440_v53 = vpack.c.bf16 %v932_v51, %v929_v45  ;;  %2743 = vrot.lane.b32.xlu0 %v5436_v49, %s5203_s21  ;;  %v1410_v48 = vsel %vm7898_vm1, %v5436_v49, 0 }
  0xf8   : > { %8065 = vst [vmem:[#allocation2_spill] sm:$0xff] %v5438_v50  ;;  %2741 = vrot.lane.b32.xlu1 %v5442_v54, %s5203_s21  ;;  %4839 = vset.pattern.permute.xlu0 %v5204_v46  ;;  %v1407_v47 = vsel %vm7898_vm1, %v5442_v54, 0 }
  0xfa   : > { %v4689_v56 = vpop.f32.mrb[8].mxu0 }
  0xfb   : > { %v4715_v55 = vpop.f32.mrb[8].mxu1  ;;  %2765 = vrot.lane.b32.xlu0 %v5440_v53, %s5203_s21  ;;  %v849_v58 = vpop.f32.mrb[9].mxu0 }
  0xfc   : > { %v1058_v57 = vpop.f32.mrb[9].mxu1  ;;  %v4690_v60 = vpop.f32.mrb[10].mxu0 }
  0xfd   : > { %v4716_v59 = vpop.f32.mrb[10].mxu1  ;;  %v5450_v63 = vpack.c.bf16 %v4690_v60, %v4689_v56  ;;  %v852_v0 = vpop.f32.mrb[11].mxu0 }
  0xfe   : > { %v1138_v61 = vpack.c.bf16 %v4716_v59, %v4715_v55  ;;  %v1061_v62 = vpop.f32.mrb[11].mxu1  ;;  %v5452_v2 = vpack.c.bf16 %v852_v0, %v849_v58 }
  0xff   : > { %v1137_v1 = vpack.c.bf16 %v1061_v62, %v1058_v57  ;;  %2747 = vrot.lane.b32.xlu0 %v5450_v63, %s5203_s21  ;;  %v1416_v52 = vsel %vm7898_vm1, %v5450_v63, 0  ;;  %v5205_v57 = vmov 1  }
 0x100   : > { %2745 = vrot.lane.b32.xlu1 %v5452_v2, %s5203_s21  ;;  %v1413_v51 = vsel %vm7898_vm1, %v5452_v2, 0 }
 0x101   : > { %4737 = vmatprep.mubr.msk.bf16.mxu1 %vm7898_vm1, %v1137_v1  ;;  %4755 = vmatprep.mubr.msk.bf16.mxu0 %vm7898_vm1, %v1137_v1 }
 0x102   : > { %4738 = vmatmul.mubr.msk.bf16.vlgmr.msra.gmra.mrb[24].mxu1 %vm7898_vm1, %v1138_v61  ;;  %4756 = vmatmul.mubr.msk.bf16.vlgmr.msra.gmra.mrb[24].mxu0 %vm7898_vm1, %v1138_v61  ;;  %v4693_v3 = vpop.f32.mrb[12].mxu0 }
 0x103   : > { %v4719_v4 = vpop.f32.mrb[12].mxu1  ;;  %v865_v5 = vpop.f32.mrb[13].mxu0  ;;  %4842 = vset.pattern.permute.xlu1 %v5205_v57 }
 0x104   : > { %v1074_v6 = vpop.f32.mrb[13].mxu1  ;;  %v4694_v7 = vpop.f32.mrb[14].mxu0 }
 0x105   : > { %v4720_v8 = vpop.f32.mrb[14].mxu1  ;;  %v5462_v9 = vpack.c.bf16 %v4694_v7, %v4693_v3  ;;  %v868_v10 = vpop.f32.mrb[15].mxu0 }
 0x106   : > { %v1140_v11 = vpack.c.bf16 %v4720_v8, %v4719_v4  ;;  %v1077_v12 = vpop.f32.mrb[15].mxu1  ;;  %v5464_v13 = vpack.c.bf16 %v868_v10, %v865_v5 }
 0x107   : > { %8066 = vst [vmem:[#allocation3_spill] sm:$0xff] %v5462_v9  ;;  %v1139_v14 = vpack.c.bf16 %v1077_v12, %v1074_v6  ;;  %v1422_v56 = vsel %vm7898_vm1, %v5462_v9, 0 }
 0x108   : > { %2749 = vrot.lane.b32.xlu1 %v5464_v13, %s5203_s21  ;;  %v1419_v55 = vsel %vm7898_vm1, %v5464_v13, 0 }
 0x109   : > { %4741 = vmatprep.mubr.msk.bf16.mxu1 %vm7898_vm1, %v1139_v14  ;;  %4759 = vmatprep.mubr.msk.bf16.mxu0 %vm7898_vm1, %v1139_v14 }
 0x10a   : > { %4742 = vmatmul.mubr.msk.bf16.gmra.mrb[28].mxu1 %vm7898_vm1, %v1140_v11  ;;  %4760 = vmatmul.mubr.msk.bf16.gmra.mrb[28].mxu0 %vm7898_vm1, %v1140_v11  ;;  %v4697_v15 = vpop.f32.mrb[16].mxu0 }
 0x10b   : > { %v4723_v16 = vpop.f32.mrb[16].mxu1  ;;  %v881_v17 = vpop.f32.mrb[17].mxu0 }
 0x10c   : > { %v1090_v18 = vpop.f32.mrb[17].mxu1  ;;  %v4698_v19 = vpop.f32.mrb[18].mxu0 }
 0x10d   : > { %v4724_v20 = vpop.f32.mrb[18].mxu1  ;;  %v1130_v21 = vpack.c.bf16 %v4698_v19, %v4697_v15  ;;  %v884_v22 = vpop.f32.mrb[19].mxu0 }
 0x10e   : > { %v1142_v23 = vpack.c.bf16 %v4724_v20, %v4723_v16  ;;  %v1093_v24 = vpop.f32.mrb[19].mxu1  ;;  %v1129_v25 = vpack.c.bf16 %v884_v22, %v881_v17 }
 0x10f   : > { %v1141_v27 = vpack.c.bf16 %v1093_v24, %v1090_v18  ;;  %2755 = vrot.lane.b32.xlu1 %v1130_v21, %s5203_s21 }
 0x110   : > { %2753 = vrot.lane.b32.xlu0 %v1129_v25, %s5203_s21  ;;  %4818 = vmatprep.subr.msk.bf16.mxu1 %vm7898_vm1, %v1129_v25 }
 0x111   : > { %4510 = vmatpush3.bf16.xpose.msra.mxu1 %v1401_v26  ;;  %4745 = vmatprep.mubr.msk.bf16.mxu1 %vm7898_vm1, %v1141_v27 }
 0x112   : > { %v4701_v28 = vpop.f32.mrb[20].mxu0  ;;  %4819 = vmatprep.subr.msk.bf16.mxu1 %vm7898_vm1, %v1130_v21  ;;  %4746 = vmatmul.mubr.msk.bf16.gmra.mrb[32].mxu1 %vm7898_vm1, %v1142_v23 }
 0x113   : > { %v4727_v30 = vpop.f32.mrb[20].mxu1  ;;  %v897_v31 = vpop.f32.mrb[21].mxu0  ;;  %4763 = vmatprep.mubr.msk.bf16.mxu0 %vm7898_vm1, %v1141_v27 }
 0x114   : > { %v1106_v32 = vpop.f32.mrb[21].mxu1  ;;  %v4702_v33 = vpop.f32.mrb[22].mxu0  ;;  %4764 = vmatmul.mubr.msk.bf16.gmra.mrb[32].mxu0 %vm7898_vm1, %v1142_v23 }
 0x115   : > { %v4728_v34 = vpop.f32.mrb[22].mxu1  ;;  %v1132_v35 = vpack.c.bf16 %v4702_v33, %v4701_v28  ;;  %v900_v36 = vpop.f32.mrb[23].mxu0 }
 0x116   : > { %v1144_v39 = vpack.c.bf16 %v4728_v34, %v4727_v30  ;;  %v1109_v40 = vpop.f32.mrb[23].mxu1  ;;  %v1131_v43 = vpack.c.bf16 %v900_v36, %v897_v31 }
 0x117   : > { %v1143_v45 = vpack.c.bf16 %v1109_v40, %v1106_v32  ;;  %2759 = vrot.lane.b32.xlu1 %v1132_v35, %s5203_s21  ;;  %v1681_v40 = vlaneseq }
 0x118   : > { %2757 = vrot.lane.b32.xlu0 %v1131_v43, %s5203_s21 }
 0x119   : > { %4749 = vmatprep.mubr.msk.bf16.mxu1 %vm7898_vm1, %v1143_v45  ;;  %4512 = vmatpush3.bf16.xpose.msra.mxu1 %v1404_v44  ;;  %v1682_v44 = vshrl.u32 %v1681_v40, 7  ;;  %v4459_v40 = vld [vmem:[%s5658_s22 + $0x28] sm:$0xff]  }
 0x11a   : > { %4767 = vmatprep.mubr.msk.bf16.mxu0 %vm7898_vm1, %v1143_v45  ;;  %4820 = vmatprep.subr.msk.bf16.mxu1 %vm7898_vm1, %v1131_v43  ;;  %v4408_v45 = vld [vmem:[%s5658_s22] sm:$0xff]  }
 0x11b   : > { %4750 = vmatmul.mubr.msk.bf16.gmra.mrb[36].mxu1 %vm7898_vm1, %v1144_v39 }
 0x11c   : > { %4525 = vmatprep.mubr.msk.bf16.mxu1 %vm7898_vm1, %v5414_v29  ;;  %4768 = vmatmul.mubr.msk.bf16.gmra.mrb[36].mxu0 %vm7898_vm1, %v1144_v39 }
 0x121   : > { %4514 = vmatpush3.bf16.xpose.msra.mxu1 %v1407_v47 }
 0x122   : > { %4821 = vmatprep.subr.msk.bf16.mxu1 %vm7898_vm1, %v1132_v35 }
 0x129   : > { %4516 = vmatpush3.bf16.xpose.msra.mxu1 %v1410_v48  ;;  %v4457_v48 = vld [vmem:[%s5658_s22 + $0x18] sm:$0xff]  }
 0x12a   : > { %4822 = vmatprep.subr.msk.bf16.mxu1 %vm7898_vm1, %v5424_v41 }
 0x131   : > { %4518 = vmatpush3.bf16.xpose.msra.mxu1 %v1413_v51  ;;  %v4456_v51 = vld [vmem:[%s5658_s22 + $0x10] sm:$0xff]  }
 0x132   : > { %4823 = vmatprep.subr.msk.bf16.mxu1 %vm7898_vm1, %v5422_v38 }
 0x139   : > { %4520 = vmatpush3.bf16.xpose.msra.mxu1 %v1416_v52  ;;  %v4409_v52 = vunpack.c.0.s8 %v4408_v45 }
 0x13a   : > { %4824 = vmatprep.subr.msk.bf16.mxu1 %vm7898_vm1, %v5440_v53 }
 0x141   : > { %4522 = vmatpush3.bf16.xpose.msra.mxu1 %v1419_v55  ;;  %v4410_v55 = vunpack.c.1.s8 %v4408_v45 }
 0x142   : > { %4825 = vmatprep.subr.msk.bf16.mxu1 %vm7898_vm1, %v5438_v50 }
 0x149   : > { %4524 = vmatpush3.bf16.xpose.msra.mxu1 %v1422_v56 }
 0x14a   : > { %4591 = vmatprep.subr.bf16.mxu1 %v1129_v25 }
 0x150   : > { %4526 = vmatmul.mubr.msk.bf16.vlgmr.msra.gmra.mrb[40].mxu1 %vm7898_vm1, %v5414_v29 }
 0x151   : > { %4592 = vmatpush3.bf16.msra.mxu1 %v5426_v42 }
 0x152   : > { %4593 = vmatprep.subr.bf16.mxu1 %v1130_v21 }
 0x155   : > { %4594 = vmatpush3.bf16.msra.mxu1 %v5420_v37 }
 0x156   : > { %4595 = vmatprep.subr.bf16.mxu1 %v1131_v43  ;;  %v4455_v43 = vld [vmem:[%s5658_s22 + $0x8] sm:$0xff]  }
 0x157   : > { %v4416_v47 = vunpack.c.1.s8 %v4455_v43  ;;  %v4417_v56 = vunpack.c.2.s8 %v4455_v43 }
 0x159   : > { %4596 = vmatpush3.bf16.msra.mxu1 %v5442_v54 }
 0x15a   : > { %4597 = vmatprep.subr.bf16.mxu1 %v1132_v35 }
 0x15d   : > { %4598 = vmatpush3.bf16.msra.mxu1 %v5436_v49 }
 0x15e   : > { %4599 = vmatprep.subr.bf16.mxu1 %v5424_v41 }
 0x161   : > { %4600 = vmatpush3.bf16.msra.mxu1 %v5452_v2  ;;  %v2740_v42 = vpop.permute.xlu0 %2739 }
 0x162   : > { %4601 = vmatprep.subr.bf16.mxu1 %v5422_v38  ;;  %v2764_v29 = vpop.permute.xlu1 %2763 }
 0x165   : > { %4602 = vmatpush3.bf16.msra.mxu1 %v5450_v63  ;;  %v2762_v54 = vpop.permute.xlu0 %2761 }
 0x166   : > { %4603 = vmatprep.subr.bf16.mxu1 %v5440_v53  ;;  %v2738_v37 = vpop.permute.xlu1 %2737 }
 0x169   : > { %4604 = vmatpush3.bf16.msra.mxu1 %v5464_v13  ;;  %v2744_v41 = vpop.permute.xlu0 %2743 }
 0x16a   : > { %4605 = vmatprep.subr.bf16.mxu1 %v5438_v50  ;;  %v2742_v49 = vpop.permute.xlu1 %2741 }
 0x16d   : > { %4606 = vmatpush3.bf16.msra.mxu1 %v5462_v9  ;;  %v2766_v59 = vpop.permute.xlu0 %2765 }
 0x171   : > { %v2748_v60 = vpop.permute.xlu0 %2747 }
 0x172   : > { %v2746_v58 = vpop.permute.xlu1 %2745 }
 0x17a   : > { %v2750_v38 = vpop.permute.xlu1 %2749 }
 0x181   : > { %v2756_v62 = vpop.permute.xlu1 %2755 }
 0x182   : > { %v2754_v61 = vpop.permute.xlu0 %2753 }
 0x183   : > { %4527 = vmatprep.subr.bf16.mxu0 %v2754_v61  ;;  %v4423_v61 = vunpack.c.2.s8 %v4456_v51 }
 0x184   : > { %4528 = vmatpush3.bf16.msra.mxu0 %v2738_v37  ;;  %v4411_v37 = vunpack.c.2.s8 %v4408_v45 }
 0x185   : > { %4529 = vmatprep.subr.bf16.mxu0 %v2756_v62  ;;  %v4424_v62 = vunpack.c.3.s8 %v4456_v51 }
 0x188   : > { %4530 = vmatpush3.bf16.msra.mxu0 %v2740_v42  ;;  %v2235_v42 = vsub.s32 1, %v1682_v44 }
 0x189   : > { %v2760_v63 = vpop.permute.xlu1 %2759 }
 0x18a   : > { %v2758_v53 = vpop.permute.xlu0 %2757 }
 0x18b   : > { %4531 = vmatprep.subr.bf16.mxu0 %v2758_v53  ;;  %v5668_v53 = vcvt.s32.f32 %v4409_v52 }
 0x18c   : > { %4532 = vmatpush3.bf16.msra.mxu0 %v2742_v49  ;;  %v4427_v49 = vunpack.c.0.s8 %v4457_v48 }
 0x18d   : > { %4533 = vmatprep.subr.bf16.mxu0 %v2760_v63  ;;  %8101 = vst [vmem:[#allocation38_spill] sm:$0xff] %v5668_v53  ;;  %v5670_v63 = vcvt.s32.f32 %v4410_v55  ;;  %v5691_v55 = vld [vmem:[%s5658_s22 + $0x38] sm:$0xff]   ;;  %vm1569_vm4 = vcmp.gt.f32.partialorder %v5668_v53, 0.0 }
 0x18f   : > { %8102 = vst [vmem:[#allocation39_spill] sm:$0xff] %v5670_v63  ;;  %vm1570_vm5 = vcmp.gt.f32.partialorder %v5670_v63, 0.0 }
 0x190   : > { %4534 = vmatpush3.bf16.msra.mxu0 %v2744_v41  ;;  %v4428_v41 = vunpack.c.1.s8 %v4457_v48 }
 0x191   : > { %4535 = vmatprep.subr.bf16.mxu0 %v2762_v54  ;;  %v4412_v54 = vunpack.c.3.s8 %v4408_v45  ;;  %v4429_v45 = vunpack.c.2.s8 %v4457_v48 }
 0x194   : > { %4536 = vmatpush3.bf16.msra.mxu0 %v2746_v58  ;;  %v4421_v58 = vunpack.c.0.s8 %v4456_v51 }
 0x195   : > { %4537 = vmatprep.subr.bf16.mxu0 %v2764_v29  ;;  %v1683_v29 = vsub.s32 0, %v1682_v44  ;;  %v5679_v44 = vcvt.s32.f32 %v4412_v54 }
 0x197   : > { %8106 = vst [vmem:[#allocation43_spill] sm:$0xff] %v5679_v44  ;;  %vm7921_vm0 = vcmp.gt.f32.partialorder %v5679_v44, 0.0 }
 0x198   : > { %4538 = vmatpush3.bf16.msra.mxu0 %v2748_v60 }
 0x199   : > { %4539 = vmatprep.subr.bf16.mxu0 %v2766_v59  ;;  %v4422_v59 = vunpack.c.1.s8 %v4456_v51  ;;  %v5686_v51 = vcvt.s32.f32 %v4421_v58  ;;  %v5699_v58 = vcvt.s32.f32 %v4429_v45 }
 0x19b   : > { %8109 = vst [vmem:[#allocation46_spill] sm:$0xff] %v5686_v51  ;;  %v5688_v52 = vcvt.s32.f32 %v4422_v59  ;;  %8113 = vst [vmem:[#allocation50_spill] sm:$0xff] %v5699_v58 }
 0x19c   : > { %4540 = vmatpush3.bf16.msra.mxu0 %v2750_v38  ;;  %v5666_v38 = vcvt.s32.f32 %v4416_v47  ;;  %v4458_v47 = vld [vmem:[%s5658_s22 + $0x20] sm:$0xff]  }
 0x19d   : > { %8110 = vst [vmem:[#allocation47_spill] sm:$0xff] %v5688_v52  ;;  %v4434_v54 = vunpack.c.1.s8 %v4458_v47 }
 0x19e   : > { %8100 = vst [vmem:[#allocation37_spill] sm:$0xff] %v5666_v38  ;;  %vm7899_vm3 = vcmp.gt.f32.partialorder %v5666_v38, 0.0 }
 0x1d5   : > { %v5530_v0 = vpop.f32.mrb[24].mxu1  ;;  %v5532_v1 = vpop.f32.mrb[24].mxu0 }
 0x1d6   : > { %8067 = vst [vmem:[#allocation4_spill] sm:$0xff] %v5530_v0  ;;  %8068 = vst [vmem:[#allocation5_spill] sm:$0xff] %v5532_v1  ;;  %v5534_v2 = vpop.f32.mrb[25].mxu0  ;;  %1613 = vperm.xlu0 %4839, %v5530_v0   ;;  %v5537_v3 = vpop.f32.mrb[25].mxu1 }
 0x1d7   : > { %8069 = vst [vmem:[#allocation6_spill] sm:$0xff] %v5534_v2  ;;  %8070 = vst [vmem:[#allocation7_spill] sm:$0xff] %v5537_v3  ;;  %v5539_v4 = vpop.f32.mrb[26].mxu0  ;;  %2170 = vperm.xlu1 %4842, %v5537_v3   ;;  %v5542_v5 = vpop.f32.mrb[26].mxu1 }
 0x1d8   : > { %8071 = vst [vmem:[#allocation8_spill] sm:$0xff] %v5539_v4  ;;  %8072 = vst [vmem:[#allocation9_spill] sm:$0xff] %v5542_v5  ;;  %v5544_v6 = vpop.f32.mrb[27].mxu1  ;;  %v5546_v7 = vpop.f32.mrb[27].mxu0 }
 0x1d9   : > { %8073 = vst [vmem:[#allocation10_spill] sm:$0xff] %v5544_v6  ;;  %8074 = vst [vmem:[#allocation11_spill] sm:$0xff] %v5546_v7 }
 0x1da   : > { %4840 = vset.pattern.permute.xlu0 %v5205_v57 }
 0x1db   : > { %2178 = vperm.xlu0 %4840, %v5530_v0   ;;  %4843 = vset.pattern.permute.xlu1 %v5204_v46 }
 0x1dc   : > { %1618 = vperm.xlu1 %4843, %v5542_v5  }
 0x1dd   : > { %v5552_v8 = vpop.f32.mrb[28].mxu1  ;;  %v5554_v10 = vpop.f32.mrb[28].mxu0 }
 0x1de   : > { %8075 = vst [vmem:[#allocation12_spill] sm:$0xff] %v5552_v8  ;;  %8076 = vst [vmem:[#allocation13_spill] sm:$0xff] %v5554_v10  ;;  %v5556_v11 = vpop.f32.mrb[29].mxu1  ;;  %v5558_v12 = vpop.f32.mrb[29].mxu0 }
 0x1df   : > { %8077 = vst [vmem:[#allocation14_spill] sm:$0xff] %v5556_v11  ;;  %8078 = vst [vmem:[#allocation15_spill] sm:$0xff] %v5558_v12  ;;  %4841 = vset.pattern.permute.xlu0 %v5204_v46  ;;  %v5561_v13 = vpop.f32.mrb[30].mxu0  ;;  %v5563_v14 = vpop.f32.mrb[30].mxu1 }
 0x1e0   : > { %8079 = vst [vmem:[#allocation16_spill] sm:$0xff] %v5561_v13  ;;  %8080 = vst [vmem:[#allocation17_spill] sm:$0xff] %v5563_v14  ;;  %1603 = vperm.xlu0 %4841, %v5537_v3   ;;  %4844 = vset.pattern.permute.xlu1 %v5205_v57  ;;  %v5567_v15 = vpop.f32.mrb[31].mxu0  ;;  %v5569_v16 = vpop.f32.mrb[31].mxu1 }
 0x1e1   : > { %8081 = vst [vmem:[#allocation18_spill] sm:$0xff] %v5567_v15  ;;  %8082 = vst [vmem:[#allocation19_spill] sm:$0xff] %v5569_v16  ;;  %2182 = vperm.xlu1 %4844, %v5542_v5  }
 0x1e4   : > { %1608 = vperm.xlu0 %4841, %v5544_v6  }
 0x1e5   : > { %2174 = vperm.xlu1 %4844, %v5544_v6   ;;  %v5574_v17 = vpop.f32.mrb[32].mxu1 }
 0x1e6   : > { %8083 = vst [vmem:[#allocation20_spill] sm:$0xff] %v5574_v17  ;;  %v5576_v18 = vpop.f32.mrb[33].mxu1 }
 0x1e7   : > { %8084 = vst [vmem:[#allocation21_spill] sm:$0xff] %v5576_v18  ;;  %v5579_v19 = vpop.f32.mrb[34].mxu1  ;;  %v5581_v20 = vpop.f32.mrb[32].mxu0 }
 0x1e8   : > { %1633 = vperm.xlu0 %4841, %v5552_v8   ;;  %8085 = vst [vmem:[#allocation22_spill] sm:$0xff] %v5579_v19  ;;  %8086 = vst [vmem:[#allocation23_spill] sm:$0xff] %v5581_v20  ;;  %v5584_v21 = vpop.f32.mrb[35].mxu1  ;;  %v5586_v22 = vpop.f32.mrb[33].mxu0 }
 0x1e9   : > { %4846 = vset.pattern.permute.xlu1 %v5204_v46  ;;  %8087 = vst [vmem:[#allocation24_spill] sm:$0xff] %v5584_v21  ;;  %8088 = vst [vmem:[#allocation25_spill] sm:$0xff] %v5586_v22  ;;  %v5589_v23 = vpop.f32.mrb[34].mxu0 }
 0x1ea   : > { %1623 = vperm.xlu1 %4846, %v5556_v11   ;;  %8089 = vst [vmem:[#allocation26_spill] sm:$0xff] %v5589_v23  ;;  %v5591_v24 = vpop.f32.mrb[35].mxu0 }
 0x1eb   : > { %8090 = vst [vmem:[#allocation27_spill] sm:$0xff] %v5591_v24 }
 0x1ec   : > { %4845 = vset.pattern.permute.xlu0 %v5205_v57 }
 0x1ed   : > { %2194 = vperm.xlu0 %4845, %v5552_v8  }
 0x1ee   : > { %4847 = vset.pattern.permute.xlu1 %v5205_v57  ;;  %v5596_v25 = vpop.f32.mrb[36].mxu1 }
 0x1ef   : > { %8091 = vst [vmem:[#allocation28_spill] sm:$0xff] %v5596_v25  ;;  %2186 = vperm.xlu1 %4847, %v5556_v11   ;;  %v5599_v26 = vpop.f32.mrb[37].mxu1  ;;  %v5603_v28 = vpop.f32.mrb[36].mxu0 }
 0x1f0   : > { %8092 = vst [vmem:[#allocation29_spill] sm:$0xff] %v5599_v26  ;;  %v5601_v27 = vpop.f32.mrb[38].mxu1  ;;  %8094 = vst [vmem:[#allocation31_spill] sm:$0xff] %v5603_v28  ;;  %v5608_v31 = vpop.f32.mrb[37].mxu0  ;;  %v4451_v28 = vunpack.c.0.s8 %v5691_v55 }
 0x1f1   : > { %8093 = vst [vmem:[#allocation30_spill] sm:$0xff] %v5601_v27  ;;  %4850 = vset.pattern.permute.xlu0 %v5204_v46  ;;  %v5606_v30 = vpop.f32.mrb[39].mxu1  ;;  %8096 = vst [vmem:[#allocation33_spill] sm:$0xff] %v5608_v31  ;;  %v5611_v32 = vpop.f32.mrb[38].mxu0 }
 0x1f2   : > { %8095 = vst [vmem:[#allocation32_spill] sm:$0xff] %v5606_v30  ;;  %1628 = vperm.xlu0 %4850, %v5569_v16   ;;  %8097 = vst [vmem:[#allocation34_spill] sm:$0xff] %v5611_v32  ;;  %v5614_v33 = vpop.f32.mrb[39].mxu0  ;;  %v5693_v32 = vcvt.s32.f32 %v4423_v61  ;;  %v4452_v61 = vunpack.c.1.s8 %v5691_v55 }
 0x1f3   : > { %4848 = vset.pattern.permute.xlu1 %v5204_v46  ;;  %8098 = vst [vmem:[#allocation35_spill] sm:$0xff] %v5614_v33  ;;  %v4442_v33 = vunpack.c.3.s8 %v4459_v40 }
 0x1f4   : > { %1638 = vperm.xlu1 %4848, %v5563_v14   ;;  %8111 = vst [vmem:[#allocation48_spill] sm:$0xff] %v5693_v32 }
 0x1f6   : > { %1653 = vperm.xlu0 %4850, %v5574_v17  }
 0x1f8   : > { %4849 = vset.pattern.permute.xlu1 %v5205_v57 }
 0x1f9   : > { %2198 = vperm.xlu1 %4849, %v5563_v14  }
 0x1fa   : > { %4851 = vset.pattern.permute.xlu0 %v5205_v57 }
 0x1fb   : > { %2210 = vperm.xlu0 %4851, %v5574_v17  }
 0x1fd   : > { %2190 = vperm.xlu1 %4849, %v5569_v16  }
 0x1ff   : > { %4856 = vset.pattern.permute.xlu0 %v5204_v46 }
 0x200   : > { %1648 = vperm.xlu0 %4856, %v5584_v21  }
 0x201   : > { %4852 = vset.pattern.permute.xlu1 %v5204_v46 }
 0x202   : > { %1643 = vperm.xlu1 %4852, %v5576_v18  }
 0x204   : > { %1673 = vperm.xlu0 %4856, %v5596_v25  }
 0x206   : > { %4853 = vset.pattern.permute.xlu1 %v5205_v57 }
 0x207   : > { %2202 = vperm.xlu1 %4853, %v5576_v18   ;;  %v5736_v18 = vcvt.s32.f32 %v4452_v61 }
 0x208   : > { %4857 = vset.pattern.permute.xlu0 %v5205_v57 }
 0x209   : > { %2226 = vperm.xlu0 %4857, %v5596_v25   ;;  %v5682_v25 = vcvt.s32.f32 %v4427_v49  ;;  %v4435_v49 = vunpack.c.2.s8 %v4458_v47  ;;  %8121 = vst [vmem:[#allocation58_spill] sm:$0xff] %v5736_v18 }
 0x20b   : > { %4854 = vset.pattern.permute.xlu1 %v5204_v46  ;;  %8107 = vst [vmem:[#allocation44_spill] sm:$0xff] %v5682_v25 }
 0x20c   : > { %1658 = vperm.xlu1 %4854, %v5579_v19  }
 0x20d   : > { %4862 = vset.pattern.permute.xlu0 %v5204_v46 }
 0x20e   : > { %1668 = vperm.xlu0 %4862, %v5606_v30  }
 0x210   : > { %4855 = vset.pattern.permute.xlu1 %v5205_v57 }
 0x211   : > { %2214 = vperm.xlu1 %4855, %v5579_v19   ;;  %v5727_v19 = vcvt.s32.f32 %v4435_v49 }
 0x212   : > { %4903 = vset.pattern.permute.xlu0 %v5205_v57 }
 0x213   : > { %8118 = vst [vmem:[#allocation55_spill] sm:$0xff] %v5727_v19 }
 0x215   : > { %2206 = vperm.xlu1 %4855, %v5584_v21  }
 0x219   : > { %4858 = vset.pattern.permute.xlu1 %v5204_v46 }
 0x21a   : > { %1663 = vperm.xlu1 %4858, %v5599_v26  }
 0x21e   : > { %4859 = vset.pattern.permute.xlu1 %v5205_v57 }
 0x21f   : > { %2218 = vperm.xlu1 %4859, %v5599_v26  }
 0x223   : > { %4860 = vset.pattern.permute.xlu1 %v5204_v46  ;;  %v5646_v34 = vpop.f32.mrb[40].mxu1  ;;  %v4415_v46 = vunpack.c.0.s8 %v4455_v43 }
 0x224   : > { %1678 = vperm.xlu1 %4860, %v5601_v27   ;;  %v5648_v35 = vpop.f32.mrb[41].mxu1  ;;  %v5712_v31 = vrot.slane %v5646_v34, %v2235_v42 }
 0x225   : > { %v1486_v36 = vpop.f32.mrb[42].mxu1  ;;  %v5664_v60 = vcvt.s32.f32 %v4415_v46  ;;  %v4430_v46 = vunpack.c.3.s8 %v4457_v48  ;;  %v4433_v48 = vunpack.c.0.s8 %v4458_v47  ;;  %v5709_v26 = vrot.slane %v5648_v35, %v1683_v29 }
 0x226   : > { %v1487_v39 = vpop.f32.mrb[43].mxu1  ;;  %v5672_v36 = vcvt.s32.f32 %v4417_v56  ;;  %v4439_v56 = vunpack.c.0.s8 %v4459_v40  ;;  %v5715_v45 = vrot.slane %v5648_v35, %v2235_v42  ;;  %v5734_v42 = vcvt.s32.f32 %v4451_v28 }
 0x227   : > { %8099 = vst [vmem:[#allocation36_spill] sm:$0xff] %v5664_v60  ;;  %vm1573_vm2 = vcmp.gt.f32.partialorder %v5664_v60, 0.0  ;;  %v5701_v59 = vcvt.s32.f32 %v4430_v46  ;;  %v5723_v17 = vcvt.s32.f32 %v4433_v48 }
 0x228   : > { %4861 = vset.pattern.permute.xlu1 %v5205_v57  ;;  %v4418_v57 = vunpack.c.3.s8 %v4455_v43  ;;  %8103 = vst [vmem:[#allocation40_spill] sm:$0xff] %v5672_v36  ;;  %v5677_v43 = vcvt.s32.f32 %v4411_v37  ;;  %v5695_v37 = vcvt.s32.f32 %v4424_v62  ;;  %v5706_v62 = vrot.slane %v5646_v34, %v1683_v29  ;;  %v5732_v34 = vld [vmem:[%s5658_s22 + $0x30] sm:$0xff]   ;;  %8120 = vst [vmem:[#allocation57_spill] sm:$0xff] %v5734_v42 }
 0x229   : > { %2230 = vperm.xlu1 %4861, %v5601_v27   ;;  %v5684_v27 = vcvt.s32.f32 %v4428_v41  ;;  %v4436_v41 = vunpack.c.3.s8 %v4458_v47  ;;  %8114 = vst [vmem:[#allocation51_spill] sm:$0xff] %v5701_v59  ;;  %v5718_v46 = vcvt.s32.f32 %v4439_v56  ;;  %v5725_v29 = vcvt.s32.f32 %v4434_v54 }
 0x22a   : > { %v5674_v39 = vcvt.s32.f32 %v4418_v57  ;;  %8105 = vst [vmem:[#allocation42_spill] sm:$0xff] %v5677_v43  ;;  %v4440_v57 = vunpack.c.1.s8 %v4459_v40  ;;  %8112 = vst [vmem:[#allocation49_spill] sm:$0xff] %v5695_v37  ;;  %v4445_v56 = vunpack.c.0.s8 %v5732_v34  ;;  %v4447_v61 = vunpack.c.2.s8 %v5732_v34 }
 0x22b   : > { %8108 = vst [vmem:[#allocation45_spill] sm:$0xff] %v5684_v27  ;;  %8115 = vst [vmem:[#allocation52_spill] sm:$0xff] %v5718_v46  ;;  %v4448_v14 = vunpack.c.3.s8 %v5732_v34  ;;  %vm7912_vm10 = vcmp.gt.f32.partialorder %v5672_v36, 0.0  ;;  %vm7954_vm14 = vcmp.gt.f32.partialorder %v5677_v43, 0.0 }
 0x22c   : > { %8104 = vst [vmem:[#allocation41_spill] sm:$0xff] %v5674_v39  ;;  %v5720_v47 = vcvt.s32.f32 %v4440_v57  ;;  %8117 = vst [vmem:[#allocation54_spill] sm:$0xff] %v5725_v29  ;;  %v4446_v57 = vunpack.c.1.s8 %v5732_v34  ;;  %vm7913_vm13 = vcmp.gt.f32.partialorder %v5674_v39, 0.0 }
 0x22d   : > { %2222 = vperm.xlu1 %4861, %v5606_v30   ;;  %v4441_v30 = vunpack.c.2.s8 %v4459_v40  ;;  %v5729_v40 = vcvt.s32.f32 %v4436_v41  ;;  %v5744_v41 = vcvt.s32.f32 %v4442_v33 }
 0x22e   : > { %8116 = vst [vmem:[#allocation53_spill] sm:$0xff] %v5720_v47 }
 0x22f   : > { %8119 = vst [vmem:[#allocation56_spill] sm:$0xff] %v5729_v40  ;;  %v5742_v49 = vcvt.s32.f32 %v4441_v30  ;;  %8123 = vst [vmem:[#allocation60_spill] sm:$0xff] %v5744_v41  ;;  %v5752_v30 = vcvt.s32.f32 %v4446_v57 }
 0x231   : > { %8122 = vst [vmem:[#allocation59_spill] sm:$0xff] %v5742_v49  ;;  %8125 = vst [vmem:[#allocation62_spill] sm:$0xff] %v5752_v30 }
 0x255   : > { %v1614_v35 = vpop.permute.xlu0 %1613 }
 0x256   : > { %v1693_v48 = vadd.f32 %v5706_v62, %v1614_v35  ;;  %v1694_v54 = vadd.f32 %v5709_v26, %v1614_v35  ;;  %v2171_v21 = vpop.permute.xlu1 %2170  ;;  %v5750_v35 = vcvt.s32.f32 %v4445_v56 }
 0x257   : > { %v2241_v8 = vadd.f32 %v5712_v31, %v2171_v21  ;;  %v2242_v28 = vadd.f32 %v5715_v45, %v2171_v21 }
 0x258   : > { %vm1725_vm6 = vcmp.gt.f32.partialorder %v1693_v48, 0.0  ;;  %vm1726_vm7 = vcmp.gt.f32.partialorder %v1694_v54, 0.0  ;;  %v1757_v11 = vmul.f32 0.2, %v1693_v48  ;;  %v1758_v16 = vmul.f32 0.2, %v1694_v54 }
 0x259   : > { %vm2273_vm8 = vcmp.gt.f32.partialorder %v2241_v8, 0.0  ;;  %v2305_v0 = vmul.f32 0.2, %v2241_v8  ;;  %8124 = vst [vmem:[#allocation61_spill] sm:$0xff] %v5750_v35  ;;  %vm2274_vm9 = vcmp.gt.f32.partialorder %v2242_v28, 0.0 }
 0x25a   : > { %v2179_v33 = vpop.permute.xlu0 %2178  ;;  %v1789_v5 = vsel %vm1725_vm6, %v1693_v48, %v1757_v11  ;;  %v1790_v6 = vsel %vm1726_vm7, %v1694_v54, %v1758_v16  ;;  %v2306_v3 = vmul.f32 0.2, %v2242_v28  ;;  %v5769_v48 = vcvt.s32.f32 %v4447_v61 }
 0x25b   : > { %v2245_v21 = vadd.f32 %v5712_v31, %v2179_v33  ;;  %v2246_v23 = vadd.f32 %v5715_v45, %v2179_v33  ;;  %v1619_v34 = vpop.permute.xlu1 %1618  ;;  %v5758_v20 = vsel %vm1573_vm2, %v1789_v5, -1e+30  ;;  %v5762_v56 = vsel %vm7899_vm3, %v1790_v6, -1e+30 }
 0x25c   : > { %v1695_v57 = vadd.f32 %v5706_v62, %v1619_v34  ;;  %v1855_v11 = vmax.f32 %v5758_v20, %v5762_v56  ;;  %v2337_v16 = vsel %vm2273_vm8, %v2241_v8, %v2305_v0  ;;  %v1696_v6 = vadd.f32 %v5709_v26, %v1619_v34 }
 0x25d   : > { %vm2277_vm11 = vcmp.gt.f32.partialorder %v2245_v21, 0.0  ;;  %vm2278_vm12 = vcmp.gt.f32.partialorder %v2246_v23, 0.0  ;;  %v2309_v54 = vmul.f32 0.2, %v2245_v21  ;;  %v2310_v5 = vmul.f32 0.2, %v2246_v23 }
 0x25e   : > { %1856 = vmax.xlane.f32.xlu0 %v1855_v11  ;;  %v2338_v33 = vsel %vm2274_vm9, %v2242_v28, %v2306_v3  ;;  %v5776_v24 = vsel %vm1569_vm4, %v2337_v16, -1e+30  ;;  %vm1727_vm15 = vcmp.gt.f32.partialorder %v1695_v57, 0.0  ;;  %v1759_v34 = vmul.f32 0.2, %v1695_v57 }
 0x25f   : > { %v1604_v0 = vpop.permute.xlu0 %1603  ;;  %v2341_v8 = vsel %vm2277_vm11, %v2245_v21, %v2309_v54  ;;  %v2342_v61 = vsel %vm2278_vm12, %v2246_v23, %v2310_v5  ;;  %v5781_v22 = vsel %vm1570_vm5, %v2338_v33, -1e+30  ;;  %v5798_v33 = vcvt.s32.f32 %v4448_v14 }
 0x260   : > { %v1689_v11 = vadd.f32 %v5706_v62, %v1604_v0  ;;  %v1690_v3 = vadd.f32 %v5709_v26, %v1604_v0  ;;  %v2183_v28 = vpop.permute.xlu1 %2182  ;;  %v5788_v16 = vsel %vm1573_vm2, %v2341_v8, -1e+30  ;;  %v5792_v21 = vsel %vm7899_vm3, %v2342_v61, -1e+30 }
 0x261   : > { %v2247_v23 = vadd.f32 %v5712_v31, %v2183_v28  ;;  %v2248_v54 = vadd.f32 %v5715_v45, %v2183_v28  ;;  %v2407_v5 = vmax.f32 %v5788_v16, %v5792_v21  ;;  %v2401_v8 = vmax.f32 %v5776_v24, %v5781_v22 }
 0x262   : > { %vm1721_vm6 = vcmp.gt.f32.partialorder %v1689_v11, 0.0  ;;  %vm1722_vm7 = vcmp.gt.f32.partialorder %v1690_v3, 0.0  ;;  %v1753_v0 = vmul.f32 0.2, %v1689_v11  ;;  %v1754_v13 = vmul.f32 0.2, %v1690_v3 }
 0x263   : > { %v1609_v10 = vpop.permute.xlu0 %1608  ;;  %2408 = vmax.xlane.f32.xlu0 %v2407_v5  ;;  %vm1728_vm8 = vcmp.gt.f32.partialorder %v1696_v6, 0.0  ;;  %v1760_v61 = vmul.f32 0.2, %v1696_v6  ;;  %v1791_v15 = vsel %vm1727_vm15, %v1695_v57, %v1759_v34  ;;  %vm7920_vm9 = vcmp.gt.f32.partialorder %v5682_v25, 0.0 }
 0x264   : > { %vm7953_vm11 = vcmp.gt.f32.partialorder %v5684_v27, 0.0  ;;  %v1691_v14 = vadd.f32 %v5706_v62, %v1609_v10  ;;  %v1692_v28 = vadd.f32 %v5709_v26, %v1609_v10  ;;  %v2175_v12 = vpop.permute.xlu1 %2174  ;;  %v1785_v4 = vsel %vm1721_vm6, %v1689_v11, %v1753_v0 }
 0x265   : > { %v1786_v1 = vsel %vm1722_vm7, %v1690_v3, %v1754_v13  ;;  %v5809_v5 = vsel %vm1569_vm4, %v1785_v4, -1e+30  ;;  %vm2279_vm12 = vcmp.gt.f32.partialorder %v2247_v23, 0.0  ;;  %vm2280_vm15 = vcmp.gt.f32.partialorder %v2248_v54, 0.0 }
 0x266   : > { %v5813_v2 = vsel %vm1570_vm5, %v1786_v1, -1e+30  ;;  %vm1723_vm1 = vcmp.gt.f32.partialorder %v1691_v14, 0.0  ;;  %vm1724_vm3 = vcmp.gt.f32.partialorder %v1692_v28, 0.0  ;;  %v1755_v34 = vmul.f32 0.2, %v1691_v14 }
 0x267   : > { %v1849_v57 = vmax.f32 %v5809_v5, %v5813_v2  ;;  %v1634_v10 = vpop.permute.xlu0 %1633  ;;  %2402 = vmax.xlane.f32.xlu0 %v2401_v8  ;;  %v1756_v11 = vmul.f32 0.2, %v1692_v28  ;;  %v1792_v13 = vsel %vm1728_vm8, %v1696_v6, %v1760_v61  ;;  %v5820_v4 = vsel %vm7912_vm10, %v1791_v15, -1e+30 }
 0x268   : > { %v2311_v3 = vmul.f32 0.2, %v2247_v23  ;;  %v1701_v1 = vadd.f32 %v5706_v62, %v1634_v10  ;;  %v1702_v0 = vadd.f32 %v5709_v26, %v1634_v10  ;;  %v1787_v7 = vsel %vm1723_vm1, %v1691_v14, %v1755_v34 }
 0x269   : > { %1850 = vmax.xlane.f32.xlu1 %v1849_v57  ;;  %v5826_v9 = vsel %vm7913_vm13, %v1792_v13, -1e+30  ;;  %v2243_v8 = vadd.f32 %v5712_v31, %v2175_v12  ;;  %v1624_v50 = vpop.permute.xlu1 %1623  ;;  %v1788_v63 = vsel %vm1724_vm3, %v1692_v28, %v1756_v11  ;;  %v5831_v6 = vsel %vm7954_vm14, %v1787_v7, -1e+30 }
 0x26a   : > { %8126 = vst [vmem:[#allocation63_spill] sm:$0xff] %v5831_v6  ;;  %v2312_v15 = vmul.f32 0.2, %v2248_v54  ;;  %v2244_v61 = vadd.f32 %v5715_v45, %v2175_v12  ;;  %v5836_v10 = vsel %vm7921_vm0, %v1788_v63, -1e+30  ;;  %v1858_v14 = vmax.f32 %v5820_v4, %v5826_v9 }
 0x26b   : > { %8127 = vst [vmem:[#allocation64_spill] sm:$0xff] %v5836_v10  ;;  %vm1733_vm1 = vcmp.gt.f32.partialorder %v1701_v1, 0.0  ;;  %v1852_v57 = vmax.f32 %v5831_v6, %v5836_v10  ;;  %vm1734_vm6 = vcmp.gt.f32.partialorder %v1702_v0, 0.0  ;;  %v1765_v28 = vmul.f32 0.2, %v1701_v1 }
 0x26c   : > { %v1766_v34 = vmul.f32 0.2, %v1702_v0  ;;  %v2195_v11 = vpop.permute.xlu0 %2194  ;;  %v2343_v7 = vsel %vm2279_vm12, %v2247_v23, %v2311_v3  ;;  %v2344_v12 = vsel %vm2280_vm15, %v2248_v54, %v2312_v15  ;;  %v4453_v13 = vunpack.c.2.s8 %v5691_v55 }
 0x26d   : > { %1859 = vmax.xlane.f32.xlu1 %v1858_v14  ;;  %v2253_v53 = vadd.f32 %v5712_v31, %v2195_v11  ;;  %v2254_v38 = vadd.f32 %v5715_v45, %v2195_v11  ;;  %1853 = vmax.xlane.f32.xlu0 %v1852_v57  ;;  %v1797_v60 = vsel %vm1733_vm1, %v1701_v1, %v1765_v28  ;;  %vm7941_vm3 = vcmp.gt.f32.partialorder %v5686_v51, 0.0 }
 0x26e   : > { %v1798_v10 = vsel %vm1734_vm6, %v1702_v0, %v1766_v34  ;;  %v1697_v6 = vadd.f32 %v5706_v62, %v1624_v50  ;;  %v2187_v14 = vpop.permute.xlu1 %2186  ;;  %v5852_v23 = vsel %vm7920_vm9, %v1797_v60, -1e+30  ;;  %v5860_v3 = vsel %vm7912_vm10, %v2343_v7, -1e+30 }
 0x26f   : > { %v5856_v54 = vsel %vm7953_vm11, %v1798_v10, -1e+30  ;;  %vm7932_vm7 = vcmp.gt.f32.partialorder %v5688_v52, 0.0  ;;  %v5867_v0 = vsel %vm7913_vm13, %v2344_v12, -1e+30  ;;  %vm2275_vm8 = vcmp.gt.f32.partialorder %v2243_v8, 0.0 }
 0x270   : > { %8128 = vst [vmem:[#allocation65_spill] sm:$0xff] %v5856_v54  ;;  %v1867_v1 = vmax.f32 %v5852_v23, %v5856_v54  ;;  %8129 = vst [vmem:[#allocation66_spill] sm:$0xff] %v5867_v0  ;;  %vm2276_vm12 = vcmp.gt.f32.partialorder %v2244_v61, 0.0  ;;  %vm7942_vm15 = vcmp.gt.f32.partialorder %v5699_v58, 0.0  ;;  %v2410_v60 = vmax.f32 %v5860_v3, %v5867_v0 }
 0x271   : > { %v2307_v15 = vmul.f32 0.2, %v2243_v8  ;;  %v2308_v10 = vmul.f32 0.2, %v2244_v61  ;;  %vm2285_vm1 = vcmp.gt.f32.partialorder %v2253_v53, 0.0  ;;  %vm7952_vm6 = vcmp.gt.f32.partialorder %v5701_v59, 0.0  ;;  %v1629_v28 = vpop.permute.xlu0 %1628 }
 0x272   : > { %v1698_v57 = vadd.f32 %v5709_v26, %v1624_v50  ;;  %1868 = vmax.xlane.f32.xlu0 %v1867_v1  ;;  %vm2286_vm10 = vcmp.gt.f32.partialorder %v2254_v38, 0.0  ;;  %v2317_v34 = vmul.f32 0.2, %v2253_v53  ;;  %v2318_v11 = vmul.f32 0.2, %v2254_v38  ;;  %2411 = vmax.xlane.f32.xlu1 %v2410_v60 }
 0x273   : > { %v2249_v7 = vadd.f32 %v5712_v31, %v2187_v14  ;;  %v2339_v12 = vsel %vm2275_vm8, %v2243_v8, %v2307_v15  ;;  %v2340_v63 = vsel %vm2276_vm12, %v2244_v61, %v2308_v10  ;;  %vm1729_vm13 = vcmp.gt.f32.partialorder %v1697_v6, 0.0  ;;  %v1639_v39 = vpop.permute.xlu1 %1638 }
 0x274   : > { %v5879_v36 = vsel %vm7954_vm14, %v2339_v12, -1e+30  ;;  %v5883_v50 = vsel %vm7921_vm0, %v2340_v63, -1e+30  ;;  %v2349_v1 = vsel %vm2285_vm1, %v2253_v53, %v2317_v34  ;;  %v2350_v54 = vsel %vm2286_vm10, %v2254_v38, %v2318_v11 }
 0x275   : > { %v1703_v0 = vadd.f32 %v5706_v62, %v1639_v39  ;;  %v1704_v60 = vadd.f32 %v5709_v26, %v1639_v39  ;;  %v2404_v8 = vmax.f32 %v5879_v36, %v5883_v50  ;;  %v5892_v61 = vsel %vm7920_vm9, %v2349_v1, -1e+30  ;;  %v1654_v10 = vpop.permute.xlu0 %1653 }
 0x276   : > { %v2250_v15 = vadd.f32 %v5715_v45, %v2187_v14  ;;  %v5897_v63 = vsel %vm7953_vm11, %v2350_v54, -1e+30  ;;  %vm1730_vm8 = vcmp.gt.f32.partialorder %v1698_v57, 0.0  ;;  %v1761_v38 = vmul.f32 0.2, %v1697_v6 }
 0x277   : > { %2405 = vmax.xlane.f32.xlu1 %v2404_v8  ;;  %v2419_v53 = vmax.f32 %v5892_v61, %v5897_v63  ;;  %v1762_v39 = vmul.f32 0.2, %v1698_v57  ;;  %vm2281_vm10 = vcmp.gt.f32.partialorder %v2249_v7, 0.0  ;;  %vm7948_vm12 = vcmp.gt.f32.partialorder %v5718_v46, 0.0 }
 0x278   : > { %vm7947_vm1 = vcmp.gt.f32.partialorder %v5720_v47, 0.0  ;;  %v5903_v34 = vcvt.s32.f32 %v4453_v13  ;;  %v1793_v14 = vsel %vm1729_vm13, %v1697_v6, %v1761_v38  ;;  %vm1735_vm9 = vcmp.gt.f32.partialorder %v1703_v0, 0.0  ;;  %v2199_v12 = vpop.permute.xlu1 %2198 }
 0x279   : > { %vm1736_vm0 = vcmp.gt.f32.partialorder %v1704_v60, 0.0  ;;  %v1767_v54 = vmul.f32 0.2, %v1703_v0  ;;  %v1709_v11 = vadd.f32 %v5706_v62, %v1654_v10  ;;  %2420 = vmax.xlane.f32.xlu0 %v2419_v53  ;;  %v1794_v1 = vsel %vm1730_vm8, %v1698_v57, %v1762_v39 }
 0x27a   : > { %v5910_v8 = vsel %vm7941_vm3, %v1793_v14, -1e+30  ;;  %v1768_v27 = vmul.f32 0.2, %v1704_v60  ;;  %v1710_v25 = vadd.f32 %v5709_v26, %v1654_v10  ;;  %v5915_v13 = vsel %vm7932_vm7, %v1794_v1, -1e+30  ;;  %v2211_v53 = vpop.permute.xlu0 %2210 }
 0x27b   : > { %8130 = vst [vmem:[#allocation67_spill] sm:$0xff] %v5910_v8  ;;  %8131 = vst [vmem:[#allocation68_spill] sm:$0xff] %v5915_v13  ;;  %v1799_v6 = vsel %vm1735_vm9, %v1703_v0, %v1767_v54  ;;  %vm2282_vm13 = vcmp.gt.f32.partialorder %v2250_v15, 0.0  ;;  %v1861_v38 = vmax.f32 %v5910_v8, %v5915_v13  ;;  %v2313_v39 = vmul.f32 0.2, %v2249_v7 }
 0x27c   : > { %v1800_v44 = vsel %vm1736_vm0, %v1704_v60, %v1768_v27  ;;  %v5921_v57 = vsel %vm7942_vm15, %v1799_v6, -1e+30  ;;  %v5924_v14 = vadd.f32 %v5706_v62, %v1629_v28  ;;  %v2255_v10 = vadd.f32 %v5712_v31, %v2199_v12  ;;  %v2191_v60 = vpop.permute.xlu1 %2190 }
 0x27d   : > { %8132 = vst [vmem:[#allocation69_spill] sm:$0xff] %v5921_v57  ;;  %v5929_v1 = vsel %vm7952_vm6, %v1800_v44, -1e+30  ;;  %v2314_v0 = vmul.f32 0.2, %v2250_v15  ;;  %v5932_v54 = vadd.f32 %v5709_v26, %v1629_v28  ;;  %v2256_v27 = vadd.f32 %v5715_v45, %v2199_v12  ;;  %1862 = vmax.xlane.f32.xlu0 %v1861_v38 }
 0x27e   : > { %8133 = vst [vmem:[#allocation70_spill] sm:$0xff] %v5929_v1  ;;  %v1870_v6 = vmax.f32 %v5921_v57, %v5929_v1  ;;  %v2345_v43 = vsel %vm2281_vm10, %v2249_v7, %v2313_v39  ;;  %vm1741_vm0 = vcmp.gt.f32.partialorder %v1709_v11, 0.0  ;;  %vm1742_vm9 = vcmp.gt.f32.partialorder %v1710_v25, 0.0 }
 0x27f   : > { %v2346_v13 = vsel %vm2282_vm13, %v2250_v15, %v2314_v0  ;;  %v5941_v8 = vsel %vm7941_vm3, %v2345_v43, -1e+30  ;;  %v2261_v44 = vadd.f32 %v5712_v31, %v2211_v53  ;;  %v1773_v12 = vmul.f32 0.2, %v1709_v11  ;;  %v5953_v15 = vpop.permute.xlu0 %1648 }
 0x280   : > { %8134 = vst [vmem:[#allocation71_spill] sm:$0xff] %v5941_v8  ;;  %1871 = vmax.xlane.f32.xlu1 %v1870_v6  ;;  %v5946_v28 = vsel %vm7932_vm7, %v2346_v13, -1e+30  ;;  %v1774_v38 = vmul.f32 0.2, %v1710_v25  ;;  %vm1579_vm8 = vcmp.gt.f32.partialorder %v5693_v32, 0.0  ;;  %v2262_v7 = vadd.f32 %v5715_v45, %v2211_v53 }
 0x281   : > { %8135 = vst [vmem:[#allocation72_spill] sm:$0xff] %v5946_v28  ;;  %vm1580_vm10 = vcmp.gt.f32.partialorder %v5695_v37, 0.0  ;;  %v2413_v43 = vmax.f32 %v5941_v8, %v5946_v28  ;;  %vm2287_vm13 = vcmp.gt.f32.partialorder %v2255_v10, 0.0  ;;  %v2319_v39 = vmul.f32 0.2, %v2255_v10  ;;  %v1644_v52 = vpop.permute.xlu1 %1643 }
 0x282   : > { %v5956_v0 = vadd.f32 %v5712_v31, %v2191_v60  ;;  %v1805_v13 = vsel %vm1741_vm0, %v1709_v11, %v1773_v12  ;;  %v1806_v6 = vsel %vm1742_vm9, %v1710_v25, %v1774_v38  ;;  %vm2288_vm7 = vcmp.gt.f32.partialorder %v2256_v27, 0.0 }
 0x283   : > { %2414 = vmax.xlane.f32.xlu0 %v2413_v43  ;;  %v5960_v51 = vsel %vm7948_vm12, %v1805_v13, -1e+30  ;;  %v5964_v53 = vsel %vm7947_vm1, %v1806_v6, -1e+30  ;;  %v2320_v28 = vmul.f32 0.2, %v2256_v27  ;;  %v2351_v8 = vsel %vm2287_vm13, %v2255_v10, %v2319_v39  ;;  %v1674_v38 = vpop.permute.xlu0 %1673 }
 0x284   : > { %8136 = vst [vmem:[#allocation73_spill] sm:$0xff] %v5960_v51  ;;  %8137 = vst [vmem:[#allocation74_spill] sm:$0xff] %v5964_v53  ;;  %v2252_v1 = vadd.f32 %v5715_v45, %v2191_v60  ;;  %v5969_v57 = vadd.f32 %v5706_v62, %v5953_v15  ;;  %v1879_v25 = vmax.f32 %v5960_v51, %v5964_v53  ;;  %v5975_v11 = vsel %vm7942_vm15, %v2351_v8, -1e+30 }
 0x285   : > { %v2352_v12 = vsel %vm2288_vm7, %v2256_v27, %v2320_v28  ;;  %vm2293_vm0 = vcmp.gt.f32.partialorder %v2261_v44, 0.0  ;;  %vm2294_vm9 = vcmp.gt.f32.partialorder %v2262_v7, 0.0  ;;  %v2325_v43 = vmul.f32 0.2, %v2261_v44 }
 0x286   : > { %vm7969_vm13 = vcmp.gt.f32.partialorder %v5723_v17, 0.0  ;;  %vm7966_vm3 = vcmp.gt.f32.partialorder %v5725_v29, 0.0  ;;  %v1705_v10 = vadd.f32 %v5706_v62, %v1644_v52  ;;  %v1706_v60 = vadd.f32 %v5709_v26, %v1644_v52  ;;  %v2203_v53 = vpop.permute.xlu1 %2202 }
 0x287   : > { %v5983_v39 = vsel %vm7952_vm6, %v2352_v12, -1e+30  ;;  %v2326_v13 = vmul.f32 0.2, %v2262_v7  ;;  %1880 = vmax.xlane.f32.xlu0 %v1879_v25  ;;  %v2357_v27 = vsel %vm2293_vm0, %v2261_v44, %v2325_v43  ;;  %vm1731_vm7 = vcmp.gt.f32.partialorder %v5924_v14, 0.0 }
 0x288   : > { %v2422_v8 = vmax.f32 %v5975_v11, %v5983_v39  ;;  %vm1732_vm15 = vcmp.gt.f32.partialorder %v5932_v54, 0.0  ;;  %v5991_v6 = vsel %vm7948_vm12, %v2357_v27, -1e+30  ;;  %v1763_v52 = vmul.f32 0.2, %v5924_v14 }
 0x289   : > { %v2358_v28 = vsel %vm2294_vm9, %v2262_v7, %v2326_v13  ;;  %8138 = vst [vmem:[#allocation75_spill] sm:$0xff] %v5991_v6  ;;  %v1764_v12 = vmul.f32 0.2, %v5932_v54  ;;  %v1717_v25 = vadd.f32 %v5706_v62, %v1674_v38  ;;  %v1718_v51 = vadd.f32 %v5709_v26, %v1674_v38 }
 0x28a   : > { %2423 = vmax.xlane.f32.xlu1 %v2422_v8  ;;  %v5999_v44 = vsel %vm7947_vm1, %v2358_v28, -1e+30  ;;  %v2257_v7 = vadd.f32 %v5712_v31, %v2203_v53  ;;  %v1795_v13 = vsel %vm1731_vm7, %v5924_v14, %v1763_v52  ;;  %v2258_v46 = vadd.f32 %v5715_v45, %v2203_v53  ;;  %v2227_v8 = vpop.permute.xlu0 %2226 }
 0x28b   : > { %8139 = vst [vmem:[#allocation76_spill] sm:$0xff] %v5999_v44  ;;  %v2431_v43 = vmax.f32 %v5991_v6, %v5999_v44  ;;  %v1796_v27 = vsel %vm1732_vm15, %v5932_v54, %v1764_v12  ;;  %vm7972_vm0 = vcmp.gt.f32.partialorder %v5734_v42, 0.0  ;;  %v6010_v38 = vsel %vm1579_vm8, %v1795_v13, -1e+30 }
 0x28c   : > { %v6014_v28 = vsel %vm1580_vm10, %v1796_v27, -1e+30  ;;  %vm2283_vm9 = vcmp.gt.f32.partialorder %v5956_v0, 0.0  ;;  %vm2284_vm1 = vcmp.gt.f32.partialorder %v2252_v1, 0.0  ;;  %vm7980_vm7 = vcmp.gt.f32.partialorder %v5736_v18, 0.0  ;;  %v1659_v27 = vpop.permute.xlu1 %1658 }
 0x28d   : > { %2432 = vmax.xlane.f32.xlu0 %v2431_v43  ;;  %v1864_v14 = vmax.f32 %v6010_v38, %v6014_v28  ;;  %v2315_v54 = vmul.f32 0.2, %v5956_v0  ;;  %v2316_v53 = vmul.f32 0.2, %v2252_v1  ;;  %vm1737_vm15 = vcmp.gt.f32.partialorder %v1705_v10, 0.0 }
 0x28e   : > { %v6022_v52 = vadd.f32 %v5712_v31, %v2227_v8  ;;  %vm1738_vm12 = vcmp.gt.f32.partialorder %v1706_v60, 0.0  ;;  %v1769_v12 = vmul.f32 0.2, %v1705_v10  ;;  %v1770_v13 = vmul.f32 0.2, %v1706_v60 }
 0x28f   : > { %1865 = vmax.xlane.f32.xlu1 %v1864_v14  ;;  %v2270_v47 = vadd.f32 %v5715_v45, %v2227_v8  ;;  %v2347_v44 = vsel %vm2283_vm9, %v5956_v0, %v2315_v54  ;;  %v2348_v43 = vsel %vm2284_vm1, %v2252_v1, %v2316_v53  ;;  %vm2289_vm6 = vcmp.gt.f32.partialorder %v2257_v7, 0.0 }
 0x290   : > { %vm7982_vm11 = vcmp.gt.f32.partialorder %v5742_v49, 0.0  ;;  %vm7981_vm14 = vcmp.gt.f32.partialorder %v5744_v41, 0.0  ;;  %v6030_v6 = vsel %vm1579_vm8, %v2347_v44, -1e+30  ;;  %v6034_v59 = vsel %vm1580_vm10, %v2348_v43, -1e+30 }
 0x291   : > { %v1801_v58 = vsel %vm1737_vm15, %v1705_v10, %v1769_v12  ;;  %v1802_v14 = vsel %vm1738_vm12, %v1706_v60, %v1770_v13  ;;  %v2416_v8 = vmax.f32 %v6030_v6, %v6034_v59  ;;  %v1711_v44 = vadd.f32 %v5706_v62, %v1659_v27  ;;  %v2215_v12 = vpop.permute.xlu1 %2214 }
 0x292   : > { %v6040_v1 = vsel %vm7969_vm13, %v1801_v58, -1e+30  ;;  %v6044_v0 = vsel %vm7966_vm3, %v1802_v14, -1e+30  ;;  %v1712_v53 = vadd.f32 %v5709_v26, %v1659_v27  ;;  %vm2290_vm1 = vcmp.gt.f32.partialorder %v2258_v46, 0.0 }
 0x293   : > { %8140 = vst [vmem:[#allocation77_spill] sm:$0xff] %v6040_v1  ;;  %8141 = vst [vmem:[#allocation78_spill] sm:$0xff] %v6044_v0  ;;  %v1873_v54 = vmax.f32 %v6040_v1, %v6044_v0  ;;  %v2321_v10 = vmul.f32 0.2, %v2257_v7  ;;  %2417 = vmax.xlane.f32.xlu1 %v2416_v8  ;;  %v2322_v60 = vmul.f32 0.2, %v2258_v46  ;;  %v2263_v43 = vadd.f32 %v5712_v31, %v2215_v12 }
 0x294   : > { %vm1749_vm12 = vcmp.gt.f32.partialorder %v1717_v25, 0.0  ;;  %vm1750_vm9 = vcmp.gt.f32.partialorder %v1718_v51, 0.0  ;;  %v1781_v58 = vmul.f32 0.2, %v1717_v25  ;;  %v2264_v14 = vadd.f32 %v5715_v45, %v2215_v12 }
 0x295   : > { %1874 = vmax.xlane.f32.xlu0 %v1873_v54  ;;  %v2353_v13 = vsel %vm2289_vm6, %v2257_v7, %v2321_v10  ;;  %v1782_v37 = vmul.f32 0.2, %v1718_v51  ;;  %v2354_v32 = vsel %vm2290_vm1, %v2258_v46, %v2322_v60  ;;  %vm1743_vm15 = vcmp.gt.f32.partialorder %v1711_v44, 0.0  ;;  %v2207_v10 = vpop.permute.xlu1 %2206 }
 0x296   : > { %v6055_v27 = vsel %vm7969_vm13, %v2353_v13, -1e+30  ;;  %v1813_v0 = vsel %vm1749_vm12, %v1717_v25, %v1781_v58  ;;  %v6059_v8 = vsel %vm7966_vm3, %v2354_v32, -1e+30  ;;  %vm1744_vm6 = vcmp.gt.f32.partialorder %v1712_v53, 0.0 }
 0x297   : > { %v1814_v1 = vsel %vm1750_vm9, %v1718_v51, %v1782_v37  ;;  %v6063_v7 = vsel %vm7972_vm0, %v1813_v0, -1e+30  ;;  %v2425_v54 = vmax.f32 %v6055_v27, %v6059_v8  ;;  %v1775_v25 = vmul.f32 0.2, %v1711_v44 }
 0x298   : > { %v6069_v46 = vsel %vm7980_vm7, %v1814_v1, -1e+30  ;;  %v1776_v60 = vmul.f32 0.2, %v1712_v53  ;;  %vm1587_vm1 = vcmp.gt.f32.partialorder %v5727_v19, 0.0  ;;  %v1708_v32 = vadd.f32 %v5709_v26, %v5953_v15 }
 0x299   : > { %v1891_v51 = vmax.f32 %v6063_v7, %v6069_v46  ;;  %v2259_v37 = vadd.f32 %v5712_v31, %v2207_v10  ;;  %vm2301_vm12 = vcmp.gt.f32.partialorder %v6022_v52, 0.0  ;;  %vm7994_vm9 = vcmp.gt.f32.partialorder %v5729_v40, 0.0  ;;  %2426 = vmax.xlane.f32.xlu0 %v2425_v54 }
 0x29a   : > { %v1807_v1 = vsel %vm1743_vm15, %v1711_v44, %v1775_v25  ;;  %v1808_v0 = vsel %vm1744_vm6, %v1712_v53, %v1776_v60  ;;  %vm2302_vm3 = vcmp.gt.f32.partialorder %v2270_v47, 0.0  ;;  %v2333_v12 = vmul.f32 0.2, %v6022_v52  ;;  %v1664_v25 = vpop.permute.xlu1 %1663 }
 0x29b   : > { %v2260_v58 = vadd.f32 %v5715_v45, %v2207_v10  ;;  %v6084_v15 = vsel %vm7982_vm11, %v1807_v1, -1e+30  ;;  %v6088_v13 = vsel %vm7981_vm14, %v1808_v0, -1e+30  ;;  %v2334_v29 = vmul.f32 0.2, %v2270_v47 }
 0x29c   : > { %v1882_v54 = vmax.f32 %v6084_v15, %v6088_v13  ;;  %v2365_v44 = vsel %vm2301_vm12, %v6022_v52, %v2333_v12  ;;  %vm2295_vm15 = vcmp.gt.f32.partialorder %v2263_v43, 0.0  ;;  %vm2296_vm6 = vcmp.gt.f32.partialorder %v2264_v14, 0.0 }
 0x29d   : > { %v2366_v53 = vsel %vm2302_vm3, %v2270_v47, %v2334_v29  ;;  %v6095_v10 = vsel %vm7972_vm0, %v2365_v44, -1e+30  ;;  %v2327_v60 = vmul.f32 0.2, %v2263_v43  ;;  %v2328_v1 = vmul.f32 0.2, %v2264_v14  ;;  %1892 = vmax.xlane.f32.xlu0 %v1891_v51  ;;  %v1669_v44 = vpop.permute.xlu0 %1668 }
 0x29e   : > { %8142 = vst [vmem:[#allocation79_spill] sm:$0xff] %v6095_v10  ;;  %vm7993_vm13 = vcmp.gt.f32.partialorder %v5750_v35, 0.0  ;;  %1883 = vmax.xlane.f32.xlu1 %v1882_v54  ;;  %v6100_v0 = vsel %vm7980_vm7, %v2366_v53, -1e+30  ;;  %v1713_v52 = vadd.f32 %v5706_v62, %v1664_v25  ;;  %v1714_v12 = vadd.f32 %v5709_v26, %v1664_v25 }
 0x29f   : > { %8143 = vst [vmem:[#allocation80_spill] sm:$0xff] %v6100_v0  ;;  %vm7988_vm3 = vcmp.gt.f32.partialorder %v5752_v30, 0.0  ;;  %v8144_v47 = vunpack.c.3.s8 %v5691_v55  ;;  %v2359_v42 = vsel %vm2295_vm15, %v2263_v43, %v2327_v60  ;;  %v2360_v51 = vsel %vm2296_vm6, %v2264_v14, %v2328_v1 }
 0x2a0   : > { %vm1739_vm12 = vcmp.gt.f32.partialorder %v5969_v57, 0.0  ;;  %vm1740_vm0 = vcmp.gt.f32.partialorder %v1708_v32, 0.0  ;;  %v2443_v54 = vmax.f32 %v6095_v10, %v6100_v0  ;;  %v6116_v53 = vsel %vm7982_vm11, %v2359_v42, -1e+30  ;;  %v2219_v42 = vpop.permute.xlu1 %2218 }
 0x2a1   : > { %v6107_v29 = vcvt.s32.f32 %v8144_v47  ;;  %v6120_v55 = vsel %vm7981_vm14, %v2360_v51, -1e+30  ;;  %v1771_v25 = vmul.f32 0.2, %v5969_v57  ;;  %v1772_v14 = vmul.f32 0.2, %v1708_v32 }
 0x2a2   : > { %v2434_v43 = vmax.f32 %v6116_v53, %v6120_v55  ;;  %vm2291_vm15 = vcmp.gt.f32.partialorder %v2259_v37, 0.0  ;;  %vm2292_vm6 = vcmp.gt.f32.partialorder %v2260_v58, 0.0  ;;  %v6126_v60 = vadd.f32 %v5706_v62, %v1669_v44  ;;  %2444 = vmax.xlane.f32.xlu0 %v2443_v54 }
 0x2a3   : > { %v1803_v1 = vsel %vm1739_vm12, %v5969_v57, %v1771_v25  ;;  %v2323_v47 = vmul.f32 0.2, %v2259_v37  ;;  %v2324_v18 = vmul.f32 0.2, %v2260_v58  ;;  %v1804_v51 = vsel %vm1740_vm0, %v1708_v32, %v1772_v14 }
 0x2a4   : > { %2435 = vmax.xlane.f32.xlu1 %v2434_v43  ;;  %v6132_v41 = vsel %vm1587_vm1, %v1803_v1, -1e+30  ;;  %v2265_v49 = vadd.f32 %v5712_v31, %v2219_v42  ;;  %v2266_v0 = vadd.f32 %v5715_v45, %v2219_v42  ;;  %vm1599_vm7 = vcmp.gt.f32.partialorder %v5903_v34, 0.0 }
 0x2a5   : > { %v6139_v54 = vsel %vm7994_vm9, %v1804_v51, -1e+30  ;;  %v2355_v57 = vsel %vm2291_vm15, %v2259_v37, %v2323_v47  ;;  %v2356_v25 = vsel %vm2292_vm6, %v2260_v58, %v2324_v18  ;;  %vm1745_vm12 = vcmp.gt.f32.partialorder %v1713_v52, 0.0  ;;  %v1679_v58 = vpop.permute.xlu1 %1678 }
 0x2a6   : > { %v1876_v32 = vmax.f32 %v6132_v41, %v6139_v54  ;;  %v6145_v43 = vsel %vm1587_vm1, %v2355_v57, -1e+30  ;;  %vm1746_vm0 = vcmp.gt.f32.partialorder %v1714_v12, 0.0  ;;  %v1777_v14 = vmul.f32 0.2, %v1713_v52 }
 0x2a7   : > { %v6149_v1 = vsel %vm7994_vm9, %v2356_v25, -1e+30  ;;  %v1778_v42 = vmul.f32 0.2, %v1714_v12  ;;  %vm2297_vm14 = vcmp.gt.f32.partialorder %v2265_v49, 0.0  ;;  %vm2298_vm11 = vcmp.gt.f32.partialorder %v2266_v0, 0.0 }
 0x2a8   : > { %v1716_v37 = vadd.f32 %v5709_v26, %v1669_v44  ;;  %1877 = vmax.xlane.f32.xlu1 %v1876_v32  ;;  %v1809_v18 = vsel %vm1745_vm12, %v1713_v52, %v1777_v14  ;;  %v2329_v47 = vmul.f32 0.2, %v2265_v49  ;;  %v2330_v51 = vmul.f32 0.2, %v2266_v0 }
 0x2a9   : > { %v1810_v10 = vsel %vm1746_vm0, %v1714_v12, %v1778_v42  ;;  %v6154_v57 = vsel %vm7993_vm13, %v1809_v18, -1e+30  ;;  %v1719_v19 = vadd.f32 %v5706_v62, %v1679_v58  ;;  %v1720_v25 = vadd.f32 %v5709_v26, %v1679_v58 }
 0x2aa   : > { %v2428_v40 = vmax.f32 %v6145_v43, %v6149_v1  ;;  %v6162_v44 = vsel %vm7988_vm3, %v1810_v10, -1e+30  ;;  %v2361_v52 = vsel %vm2297_vm14, %v2265_v49, %v2329_v47  ;;  %v2362_v32 = vsel %vm2298_vm11, %v2266_v0, %v2330_v51  ;;  %v2231_v0 = vpop.permute.xlu1 %2230 }
 0x2ab   : > { %v1885_v12 = vmax.f32 %v6154_v57, %v6162_v44  ;;  %v6168_v14 = vsel %vm7993_vm13, %v2361_v52, -1e+30  ;;  %v6172_v62 = vsel %vm7988_vm3, %v2362_v32, -1e+30  ;;  %vm1751_vm15 = vcmp.gt.f32.partialorder %v1719_v19, 0.0 }
 0x2ac   : > { %2429 = vmax.xlane.f32.xlu1 %v2428_v40  ;;  %vm1600_vm6 = vcmp.gt.f32.partialorder %v6107_v29, 0.0  ;;  %vm1752_vm12 = vcmp.gt.f32.partialorder %v1720_v25, 0.0  ;;  %v1783_v26 = vmul.f32 0.2, %v1719_v19  ;;  %v1784_v10 = vmul.f32 0.2, %v1720_v25 }
 0x2ad   : > { %1886 = vmax.xlane.f32.xlu0 %v1885_v12  ;;  %v2437_v49 = vmax.f32 %v6168_v14, %v6172_v62  ;;  %vm1747_vm14 = vcmp.gt.f32.partialorder %v6126_v60, 0.0  ;;  %vm1748_vm11 = vcmp.gt.f32.partialorder %v1716_v37, 0.0  ;;  %v1779_v42 = vmul.f32 0.2, %v6126_v60 }
 0x2ae   : > { %v2271_v18 = vadd.f32 %v5712_v31, %v2231_v0  ;;  %v2272_v58 = vadd.f32 %v5715_v45, %v2231_v0  ;;  %v1815_v40 = vsel %vm1751_vm15, %v1719_v19, %v1783_v26  ;;  %v1816_v47 = vsel %vm1752_vm12, %v1720_v25, %v1784_v10  ;;  %v2223_v35 = vpop.permute.xlu1 %2222 }
 0x2af   : > { %v6183_v51 = vsel %vm1599_vm7, %v1815_v40, -1e+30  ;;  %v6187_v52 = vsel %vm1600_vm6, %v1816_v47, -1e+30  ;;  %v1780_v32 = vmul.f32 0.2, %v1716_v37  ;;  %v2267_v19 = vadd.f32 %v5712_v31, %v2223_v35 }
 0x2b0   : > { %v1894_v12 = vmax.f32 %v6183_v51, %v6187_v52  ;;  %vm2303_vm0 = vcmp.gt.f32.partialorder %v2271_v18, 0.0  ;;  %vm2304_vm3 = vcmp.gt.f32.partialorder %v2272_v58, 0.0  ;;  %v2335_v30 = vmul.f32 0.2, %v2271_v18 }
 0x2b1   : > { %2438 = vmax.xlane.f32.xlu0 %v2437_v49  ;;  %v2336_v0 = vmul.f32 0.2, %v2272_v58  ;;  %vm1595_vm15 = vcmp.gt.f32.partialorder %v5769_v48, 0.0  ;;  %v2268_v25 = vadd.f32 %v5715_v45, %v2223_v35  ;;  %vm1596_vm12 = vcmp.gt.f32.partialorder %v5798_v33, 0.0 }
 0x2b2   : > { %1895 = vmax.xlane.f32.xlu1 %v1894_v12  ;;  %v2367_v26 = vsel %vm2303_vm0, %v2271_v18, %v2335_v30  ;;  %v1811_v49 = vsel %vm1747_vm14, %v6126_v60, %v1779_v42  ;;  %v1812_v47 = vsel %vm1748_vm11, %v1716_v37, %v1780_v32  ;;  %vm2299_vm13 = vcmp.gt.f32.partialorder %v2267_v19, 0.0 }
 0x2b3   : > { %v2368_v10 = vsel %vm2304_vm3, %v2272_v58, %v2336_v0  ;;  %v6197_v40 = vsel %vm1599_vm7, %v2367_v26, -1e+30  ;;  %vm2300_vm9 = vcmp.gt.f32.partialorder %v2268_v25, 0.0  ;;  %v2331_v45 = vmul.f32 0.2, %v2267_v19 }
 0x2b4   : > { %v6205_v31 = vsel %vm1600_vm6, %v2368_v10, -1e+30  ;;  %v2332_v30 = vmul.f32 0.2, %v2268_v25  ;;  %v6211_v18 = vsel %vm1595_vm15, %v1811_v49, -1e+30 }
 0x2b5   : > { %v2446_v35 = vmax.f32 %v6197_v40, %v6205_v31  ;;  %v6215_v60 = vsel %vm1596_vm12, %v1812_v47, -1e+30  ;;  %v2363_v37 = vsel %vm2299_vm13, %v2267_v19, %v2331_v45 }
 0x2b6   : > { %v2364_v42 = vsel %vm2300_vm9, %v2268_v25, %v2332_v30  ;;  %v1888_v58 = vmax.f32 %v6211_v18, %v6215_v60  ;;  %v6221_v32 = vsel %vm1595_vm15, %v2363_v37, -1e+30 }
 0x2b7   : > { %2447 = vmax.xlane.f32.xlu1 %v2446_v35  ;;  %v6225_v12 = vsel %vm1596_vm12, %v2364_v42, -1e+30 }
 0x2b8   : > { %v2440_v0 = vmax.f32 %v6221_v32, %v6225_v12 }
 0x2bb   : > { %1889 = vmax.xlane.f32.xlu1 %v1888_v58 }
 0x2bf   : > { %2441 = vmax.xlane.f32.xlu1 %v2440_v0 }
 0x2eb   : > { %v6229_v26 = vpop.xlane.xlu0 %1856 }
 0x2ec   : > { %8145 = vst [vmem:[#allocation81_spill] sm:$0xff] %v6229_v26  ;;  %v1901_v19 = vsub.f32 %v5758_v20, %v6229_v26  ;;  %v1902_v25 = vsub.f32 %v5762_v56, %v6229_v26 }
 0x2ee   : > { %v1937_v10 = vmul.f32 1.442695, %v1901_v19  ;;  %v1939_v49 = vmul.f32 1.442695, %v1902_v25 }
 0x2f0   : > { %4939 = vpow2.f32 %v1937_v10  ;;  %v6235_v47 = vpop.xlane.xlu0 %2408 }
 0x2f1   : > { %8146 = vst [vmem:[#allocation82_spill] sm:$0xff] %v6235_v47  ;;  %4941 = vpow2.f32 %v1939_v49  ;;  %v2453_v45 = vsub.f32 %v5788_v16, %v6235_v47  ;;  %v2454_v35 = vsub.f32 %v5792_v21, %v6235_v47 }
 0x2f3   : > { %v2489_v30 = vmul.f32 1.442695, %v2453_v45  ;;  %v2491_v37 = vmul.f32 1.442695, %v2454_v35 }
 0x2f4   : > { %v6241_v42 = vpop.xlane.xlu0 %2402 }
 0x2f5   : > { %8147 = vst [vmem:[#allocation83_spill] sm:$0xff] %v6241_v42  ;;  %4943 = vpow2.f32 %v2489_v30  ;;  %v2449_v20 = vsub.f32 %v5776_v24, %v6241_v42  ;;  %v2450_v56 = vsub.f32 %v5781_v22, %v6241_v42 }
 0x2f6   : > { %v6247_v58 = vpop.xlane.xlu1 %1850  ;;  %4945 = vpow2.f32 %v2491_v37  ;;  %v8152_v37 = vld [vmem:[#allocation64_spill] sm:$0xff] }
 0x2f7   : > { %8148 = vst [vmem:[#allocation84_spill] sm:$0xff] %v6247_v58  ;;  %v1897_v16 = vsub.f32 %v5809_v5, %v6247_v58  ;;  %v1898_v21 = vsub.f32 %v5813_v2, %v6247_v58  ;;  %v2481_v0 = vmul.f32 1.442695, %v2449_v20  ;;  %v2483_v19 = vmul.f32 1.442695, %v2450_v56  ;;  %v8151_v2 = vld [vmem:[#allocation63_spill] sm:$0xff] }
 0x2f9   : > { %v1929_v25 = vmul.f32 1.442695, %v1897_v16  ;;  %v1931_v10 = vmul.f32 1.442695, %v1898_v21  ;;  %4947 = vpow2.f32 %v2481_v0  ;;  %v8154_v0 = vld [vmem:[#allocation37_spill] sm:$0xff] }
 0x2fa   : > { %v6253_v49 = vpop.xlane.xlu1 %1859  ;;  %v4940_v24 = vpop.eup %4939  ;;  %4949 = vpow2.f32 %v2483_v19  ;;  %vm8155_vm13 = vcmp.gt.f32.partialorder %v8154_v0, 0.0 }
 0x2fb   : > { %8149 = vst [vmem:[#allocation85_spill] sm:$0xff] %v6253_v49  ;;  %v6255_v45 = vpop.xlane.xlu0 %1853  ;;  %v1903_v22 = vsub.f32 %v5820_v4, %v6253_v49  ;;  %v1904_v5 = vsub.f32 %v5826_v9, %v6253_v49  ;;  %v4942_v35 = vpop.eup %4941  ;;  %4951 = vpow2.f32 %v1929_v25  ;;  %v6267_v16 = vsel %vm1573_vm2, %v4940_v24, 0.0  ;;  %vm8160_vm9 = vmmov %vm8155_vm13 }
 0x2fc   : > { %8150 = vst [vmem:[#allocation86_spill] sm:$0xff] %v6255_v45  ;;  %v1899_v30 = vsub.f32 %v8151_v2, %v6255_v45  ;;  %v1900_v20 = vsub.f32 %v8152_v37, %v6255_v45  ;;  %4953 = vpow2.f32 %v1931_v10  ;;  %v6271_v4 = vsel %vm8155_vm13, %v4942_v35, 0.0 }
 0x2fd   : > { %v1941_v21 = vmul.f32 1.442695, %v1903_v22  ;;  %v1943_v19 = vmul.f32 1.442695, %v1904_v5  ;;  %v2031_v9 = vadd.f32 %v6271_v4, %v6267_v16  ;;  %v8158_v5 = vld [vmem:[#allocation66_spill] sm:$0xff] }
 0x2fe   : > { %v1933_v25 = vmul.f32 1.442695, %v1899_v30  ;;  %v1935_v26 = vmul.f32 1.442695, %v1900_v20 }
 0x2ff   : > { %v6275_v47 = vpop.xlane.xlu0 %1868  ;;  %v4944_v2 = vpop.eup %4943  ;;  %2032 = vadd.xlane.f32.xlu1 %v2031_v9  ;;  %4955 = vpow2.f32 %v1941_v21 }
 0x300   : > { %8156 = vst [vmem:[#allocation63_spill] sm:$0xff] %v6275_v47  ;;  %v1909_v37 = vsub.f32 %v5852_v23, %v6275_v47  ;;  %v6279_v24 = vpop.xlane.xlu1 %2411  ;;  %v4946_v10 = vpop.eup %4945  ;;  %v6287_v30 = vsel %vm1573_vm2, %v4944_v2, 0.0  ;;  %4957 = vpow2.f32 %v1943_v19 }
 0x301   : > { %8157 = vst [vmem:[#allocation64_spill] sm:$0xff] %v6279_v24  ;;  %v2455_v22 = vsub.f32 %v5860_v3, %v6279_v24  ;;  %v2456_v35 = vsub.f32 %v8158_v5, %v6279_v24  ;;  %8159 = vst [vmem:[#allocation36_spill] sm:$0xff] %v6287_v30  ;;  %v6291_v23 = vsel %vm8160_vm9, %v4946_v10, 0.0  ;;  %4959 = vpow2.f32 %v1933_v25  ;;  %v8163_v25 = vld [vmem:[#allocation65_spill] sm:$0xff]  ;;  %v8173_v24 = vld [vmem:[#allocation70_spill] sm:$0xff] }
 0x302   : > { %v1953_v20 = vmul.f32 1.442695, %v1909_v37  ;;  %8161 = vst [vmem:[#allocation37_spill] sm:$0xff] %v6291_v23  ;;  %v2583_v21 = vadd.f32 %v6291_v23, %v6287_v30  ;;  %4961 = vpow2.f32 %v1935_v26  ;;  %v1910_v2 = vsub.f32 %v8163_v25, %v6275_v47 }
 0x303   : > { %v2493_v9 = vmul.f32 1.442695, %v2455_v22  ;;  %v2495_v49 = vmul.f32 1.442695, %v2456_v35  ;;  %v4948_v3 = vpop.eup %4947 }
 0x304   : > { %v6295_v45 = vpop.xlane.xlu1 %2405  ;;  %v4950_v5 = vpop.eup %4949  ;;  %4963 = vpow2.f32 %v1953_v20  ;;  %2584 = vadd.xlane.f32.xlu0 %v2583_v21  ;;  %v8169_v20 = vld [vmem:[#allocation67_spill] sm:$0xff]  ;;  %v8172_v21 = vld [vmem:[#allocation69_spill] sm:$0xff] }
 0x305   : > { %8162 = vst [vmem:[#allocation66_spill] sm:$0xff] %v6295_v45  ;;  %v2451_v56 = vsub.f32 %v5879_v36, %v6295_v45  ;;  %v2452_v0 = vsub.f32 %v5883_v50, %v6295_v45  ;;  %v4952_v19 = vpop.eup %4951  ;;  %4965 = vpow2.f32 %v2493_v9  ;;  %v6319_v9 = vsel %vm1569_vm4, %v4948_v3, 0.0 }
 0x306   : > { %v6303_v37 = vpop.xlane.xlu0 %2420  ;;  %v4954_v10 = vpop.eup %4953  ;;  %4967 = vpow2.f32 %v2495_v49  ;;  %v6311_v50 = vsel %vm1569_vm4, %v4952_v19, 0.0  ;;  %8167 = vst [vmem:[#allocation38_spill] sm:$0xff] %v6319_v9 }
 0x307   : > { %8164 = vst [vmem:[#allocation65_spill] sm:$0xff] %v6303_v37  ;;  %v2485_v26 = vmul.f32 1.442695, %v2451_v56  ;;  %v2487_v22 = vmul.f32 1.442695, %v2452_v0  ;;  %v2461_v35 = vsub.f32 %v5892_v61, %v6303_v37  ;;  %v2462_v36 = vsub.f32 %v5897_v63, %v6303_v37 }
 0x308   : > { %v6315_v25 = vsel %vm1570_vm5, %v4954_v10, 0.0  ;;  %v6325_v63 = vsel %vm1570_vm5, %v4950_v5, 0.0  ;;  %v1955_v56 = vmul.f32 1.442695, %v1910_v2 }
 0x309   : > { %4969 = vpow2.f32 %v2485_v26  ;;  %v2505_v49 = vmul.f32 1.442695, %v2461_v35  ;;  %v2025_v61 = vadd.f32 %v6315_v25, %v6311_v50  ;;  %v2507_v0 = vmul.f32 1.442695, %v2462_v36  ;;  %v4956_v10 = vpop.eup %4955  ;;  %v8170_v26 = vld [vmem:[#allocation68_spill] sm:$0xff] }
 0x30a   : > { %4971 = vpow2.f32 %v2487_v22  ;;  %v6327_v19 = vpop.xlane.xlu0 %1862  ;;  %v4958_v37 = vpop.eup %4957  ;;  %v2577_v5 = vadd.f32 %v6325_v63, %v6319_v9 }
 0x30b   : > { %8168 = vst [vmem:[#allocation39_spill] sm:$0xff] %v6327_v19  ;;  %4973 = vpow2.f32 %v2505_v49  ;;  %v1905_v3 = vsub.f32 %v8169_v20, %v6327_v19  ;;  %v1906_v35 = vsub.f32 %v8170_v26, %v6327_v19  ;;  %2026 = vadd.xlane.f32.xlu0 %v2025_v61  ;;  %v4960_v2 = vpop.eup %4959  ;;  %v8174_v26 = vld [vmem:[#allocation40_spill] sm:$0xff] }
 0x30c   : > { %4975 = vpow2.f32 %v2507_v0  ;;  %v4962_v45 = vpop.eup %4961  ;;  %vm8175_vm2 = vcmp.gt.f32.partialorder %v8174_v26, 0.0  ;;  %v8176_v0 = vld [vmem:[#allocation41_spill] sm:$0xff] }
 0x30d   : > { %v6333_v47 = vpop.xlane.xlu1 %1871  ;;  %v1945_v22 = vmul.f32 1.442695, %v1905_v3  ;;  %v1947_v36 = vmul.f32 1.442695, %v1906_v35  ;;  %4977 = vpow2.f32 %v1955_v56  ;;  %v6343_v61 = vsel %vm8175_vm2, %v4956_v10, 0.0  ;;  %v8180_v56 = vld [vmem:[#allocation72_spill] sm:$0xff]  ;;  %vm8181_vm5 = vmmov %vm8175_vm2 }
 0x30e   : > { %8171 = vst [vmem:[#allocation67_spill] sm:$0xff] %v6333_v47  ;;  %v1911_v49 = vsub.f32 %v8172_v21, %v6333_v47  ;;  %v1912_v20 = vsub.f32 %v8173_v24, %v6333_v47  ;;  %vm8177_vm4 = vcmp.gt.f32.partialorder %v8176_v0, 0.0  ;;  %v4964_v42 = vpop.eup %4963  ;;  %v8179_v24 = vld [vmem:[#allocation71_spill] sm:$0xff] }
 0x30f   : > { %v6347_v19 = vsel %vm8177_vm4, %v4958_v37, 0.0  ;;  %2578 = vadd.xlane.f32.xlu0 %v2577_v5  ;;  %v4966_v21 = vpop.eup %4965  ;;  %4979 = vpow2.f32 %v1945_v22  ;;  %vm8183_vm3 = vmmov %vm8177_vm4 }
 0x310   : > { %v1957_v58 = vmul.f32 1.442695, %v1911_v49  ;;  %v1959_v3 = vmul.f32 1.442695, %v1912_v20  ;;  %v6349_v35 = vpop.xlane.xlu0 %2414  ;;  %v4968_v10 = vpop.eup %4967  ;;  %4981 = vpow2.f32 %v1947_v36  ;;  %v2034_v37 = vadd.f32 %v6347_v19, %v6343_v61 }
 0x311   : > { %8178 = vst [vmem:[#allocation68_spill] sm:$0xff] %v6349_v35  ;;  %v2457_v47 = vsub.f32 %v8179_v24, %v6349_v35  ;;  %v2458_v30 = vsub.f32 %v8180_v56, %v6349_v35  ;;  %v6359_v49 = vsel %vm8181_vm5, %v4966_v21, 0.0  ;;  %v6363_v22 = vsel %vm8183_vm3, %v4968_v10, 0.0  ;;  %v8184_v35 = vld [vmem:[#allocation42_spill] sm:$0xff]  ;;  %v8186_v21 = vld [vmem:[#allocation43_spill] sm:$0xff] }
 0x312   : > { %8182 = vst [vmem:[#allocation69_spill] sm:$0xff] %v6359_v49  ;;  %4983 = vpow2.f32 %v1957_v58  ;;  %v2586_v36 = vadd.f32 %v6363_v22, %v6359_v49  ;;  %vm8185_vm14 = vcmp.gt.f32.partialorder %v8184_v35, 0.0  ;;  %vm8187_vm11 = vcmp.gt.f32.partialorder %v8186_v21, 0.0 }
 0x313   : > { %v2497_v20 = vmul.f32 1.442695, %v2457_v47  ;;  %v2499_v5 = vmul.f32 1.442695, %v2458_v30  ;;  %v4970_v24 = vpop.eup %4969  ;;  %4985 = vpow2.f32 %v1959_v3  ;;  %2035 = vadd.xlane.f32.xlu0 %v2034_v37  ;;  %v6369_v26 = vsel %vm8185_vm14, %v4960_v2, 0.0  ;;  %v8189_v37 = vld [vmem:[#allocation44_spill] sm:$0xff]  ;;  %vm8195_vm9 = vmmov %vm8185_vm14 }
 0x314   : > { %v4972_v56 = vpop.eup %4971  ;;  %v6373_v47 = vsel %vm8187_vm11, %v4962_v45, 0.0  ;;  %2587 = vadd.xlane.f32.xlu1 %v2586_v36  ;;  %vm8190_vm0 = vcmp.gt.f32.partialorder %v8189_v37, 0.0  ;;  %v8192_v45 = vld [vmem:[#allocation45_spill] sm:$0xff]  ;;  %v6393_v36 = vsel %vm8195_vm9, %v4970_v24, 0.0  ;;  %vm8196_vm2 = vmmov %vm8187_vm11 }
 0x315   : > { %4987 = vpow2.f32 %v2497_v20  ;;  %v4974_v58 = vpop.eup %4973  ;;  %v2028_v2 = vadd.f32 %v6373_v47, %v6369_v26  ;;  %vm8193_vm13 = vcmp.gt.f32.partialorder %v8192_v45, 0.0  ;;  %vm8198_vm4 = vmmov %vm8190_vm0 }
 0x316   : > { %4989 = vpow2.f32 %v2499_v5  ;;  %v4976_v0 = vpop.eup %4975  ;;  %v6385_v20 = vsel %vm8190_vm0, %v4974_v58, 0.0  ;;  %v6405_v35 = vsel %vm8198_vm4, %v4964_v42, 0.0  ;;  %vm8200_vm5 = vmmov %vm8193_vm13 }
 0x317   : > { %v6375_v30 = vpop.xlane.xlu1 %2423  ;;  %8191 = vst [vmem:[#allocation40_spill] sm:$0xff] %v6385_v20  ;;  %v6389_v5 = vsel %vm8193_vm13, %v4976_v0, 0.0  ;;  %v4978_v49 = vpop.eup %4977  ;;  %8199 = vst [vmem:[#allocation72_spill] sm:$0xff] %v6405_v35 }
 0x318   : > { %8188 = vst [vmem:[#allocation70_spill] sm:$0xff] %v6375_v30  ;;  %v2463_v3 = vsub.f32 %v5975_v11, %v6375_v30  ;;  %v2464_v10 = vsub.f32 %v5983_v39, %v6375_v30  ;;  %8194 = vst [vmem:[#allocation41_spill] sm:$0xff] %v6389_v5  ;;  %v2595_v39 = vadd.f32 %v6389_v5, %v6385_v20  ;;  %v6399_v30 = vsel %vm8196_vm2, %v4972_v56, 0.0  ;;  %v8203_v20 = vld [vmem:[#allocation46_spill] sm:$0xff] }
 0x319   : > { %2029 = vadd.xlane.f32.xlu1 %v2028_v2  ;;  %v4980_v58 = vpop.eup %4979  ;;  %v2580_v21 = vadd.f32 %v6399_v30, %v6393_v36  ;;  %v6413_v56 = vsel %vm8200_vm5, %v4978_v49, 0.0  ;;  %vm8204_vm3 = vcmp.gt.f32.partialorder %v8203_v20, 0.0  ;;  %vm8257_vm5 = vcmp.gt.f32.partialorder %v5723_v17, 0.0 }
 0x31a   : > { %v2509_v11 = vmul.f32 1.442695, %v2463_v3  ;;  %v2511_v23 = vmul.f32 1.442695, %v2464_v10  ;;  %2596 = vadd.xlane.f32.xlu0 %v2595_v39  ;;  %v4982_v24 = vpop.eup %4981  ;;  %8201 = vst [vmem:[#allocation42_spill] sm:$0xff] %v6413_v56  ;;  %vm8209_vm11 = vmmov %vm8204_vm3 }
 0x31c   : > { %4991 = vpow2.f32 %v2509_v11  ;;  %v6401_v9 = vpop.xlane.xlu1 %1865  ;;  %v4984_v3 = vpop.eup %4983 }
 0x31d   : > { %8197 = vst [vmem:[#allocation71_spill] sm:$0xff] %v6401_v9  ;;  %4993 = vpow2.f32 %v2511_v23  ;;  %v1907_v0 = vsub.f32 %v6010_v38, %v6401_v9  ;;  %v1908_v10 = vsub.f32 %v6014_v28, %v6401_v9  ;;  %v4986_v2 = vpop.eup %4985  ;;  %2581 = vadd.xlane.f32.xlu1 %v2580_v21  ;;  %v2043_v38 = vadd.f32 %v6413_v56, %v6405_v35  ;;  %v8240_v35 = vld [vmem:[#allocation74_spill] sm:$0xff]  ;;  %v8242_v56 = vld [vmem:[#allocation77_spill] sm:$0xff] }
 0x31f   : > { %v1949_v37 = vmul.f32 1.442695, %v1907_v0  ;;  %v4988_v42 = vpop.eup %4987  ;;  %v1951_v11 = vmul.f32 1.442695, %v1908_v10  ;;  %v8206_v0 = vld [vmem:[#allocation47_spill] sm:$0xff]  ;;  %v6435_v10 = vsel %vm8209_vm11, %v4980_v58, 0.0 }
 0x320   : > { %v6417_v23 = vpop.xlane.xlu1 %2417  ;;  %v4990_v39 = vpop.eup %4989  ;;  %v6427_v28 = vsel %vm8204_vm3, %v4988_v42, 0.0  ;;  %vm8207_vm14 = vcmp.gt.f32.partialorder %v8206_v0, 0.0  ;;  %8210 = vst [vmem:[#allocation46_spill] sm:$0xff] %v6435_v10  ;;  %v8213_v42 = vld [vmem:[#allocation50_spill] sm:$0xff] }
 0x321   : > { %8202 = vst [vmem:[#allocation43_spill] sm:$0xff] %v6417_v23  ;;  %4995 = vpow2.f32 %v1949_v37  ;;  %v2459_v49 = vsub.f32 %v6030_v6, %v6417_v23  ;;  %v2460_v45 = vsub.f32 %v6034_v59, %v6417_v23  ;;  %8205 = vst [vmem:[#allocation44_spill] sm:$0xff] %v6427_v28  ;;  %v6431_v21 = vsel %vm8207_vm14, %v4990_v39, 0.0  ;;  %2044 = vadd.xlane.f32.xlu1 %v2043_v38  ;;  %v8216_v39 = vld [vmem:[#allocation51_spill] sm:$0xff] }
 0x322   : > { %4997 = vpow2.f32 %v1951_v11  ;;  %8208 = vst [vmem:[#allocation45_spill] sm:$0xff] %v6431_v21  ;;  %vm8211_vm0 = vmmov %vm8207_vm14  ;;  %v2589_v59 = vadd.f32 %v6431_v21, %v6427_v28  ;;  %vm8214_vm13 = vcmp.gt.f32.partialorder %v8213_v42, 0.0  ;;  %vm8217_vm9 = vcmp.gt.f32.partialorder %v8216_v39, 0.0 }
 0x323   : > { %v6439_v37 = vsel %vm8211_vm0, %v4982_v24, 0.0  ;;  %v2501_v6 = vmul.f32 1.442695, %v2459_v49  ;;  %v2503_v9 = vmul.f32 1.442695, %v2460_v45  ;;  %v6445_v11 = vsel %vm8214_vm13, %v4984_v3, 0.0  ;;  %vm8219_vm2 = vmmov %vm8214_vm13 }
 0x324   : > { %8212 = vst [vmem:[#allocation47_spill] sm:$0xff] %v6439_v37  ;;  %8215 = vst [vmem:[#allocation50_spill] sm:$0xff] %v6445_v11  ;;  %v6449_v23 = vsel %vm8217_vm9, %v4986_v2, 0.0  ;;  %2590 = vadd.xlane.f32.xlu0 %v2589_v59  ;;  %v2037_v20 = vadd.f32 %v6439_v37, %v6435_v10  ;;  %v8236_v59 = vld [vmem:[#allocation2_spill] sm:$0xff] }
 0x325   : > { %8218 = vst [vmem:[#allocation51_spill] sm:$0xff] %v6449_v23  ;;  %4999 = vpow2.f32 %v2501_v6  ;;  %v2046_v38 = vadd.f32 %v6449_v23, %v6445_v11  ;;  %vm8221_vm4 = vmmov %vm8217_vm9 }
 0x326   : > { %v4992_v58 = vpop.eup %4991  ;;  %5001 = vpow2.f32 %v2503_v9  ;;  %2038 = vadd.xlane.f32.xlu1 %v2037_v20  ;;  %vm8260_vm14 = vmmov %vm8257_vm5 }
 0x327   : > { %v4994_v24 = vpop.eup %4993  ;;  %v6457_v3 = vsel %vm8219_vm2, %v4992_v58, 0.0 }
 0x328   : > { %8220 = vst [vmem:[#allocation87_spill] sm:$0xff] %v6457_v3  ;;  %v6461_v2 = vsel %vm8221_vm4, %v4994_v24, 0.0  ;;  %2047 = vadd.xlane.f32.xlu0 %v2046_v38 }
 0x329   : > { %8222 = vst [vmem:[#allocation88_spill] sm:$0xff] %v6461_v2  ;;  %v2598_v49 = vadd.f32 %v6461_v2, %v6457_v3 }
 0x32b   : > { %v4996_v45 = vpop.eup %4995  ;;  %2599 = vadd.xlane.f32.xlu1 %v2598_v49  ;;  %v6483_v49 = vpop.xlane.xlu0 %1880 }
 0x32c   : > { %v4998_v9 = vpop.eup %4997  ;;  %v6467_v6 = vsel %vm1579_vm8, %v4996_v45, 0.0  ;;  %8229 = vst [vmem:[#allocation91_spill] sm:$0xff] %v6483_v49 }
 0x32d   : > { %8224 = vst [vmem:[#allocation48_spill] sm:$0xff] %v6467_v6  ;;  %v6471_v42 = vsel %vm1580_vm10, %v4998_v9, 0.0  ;;  %v6487_v9 = vpop.xlane.xlu1 %1883 }
 0x32e   : > { %8226 = vst [vmem:[#allocation49_spill] sm:$0xff] %v6471_v42  ;;  %v2040_v39 = vadd.f32 %v6471_v42, %v6467_v6  ;;  %8230 = vst [vmem:[#allocation92_spill] sm:$0xff] %v6487_v9  ;;  %v8244_v6 = vld [vmem:[#allocation78_spill] sm:$0xff] }
 0x32f   : > { %v5000_v20 = vpop.eup %4999  ;;  %v6489_v3 = vpop.xlane.xlu0 %2432 }
 0x330   : > { %v5002_v58 = vpop.eup %5001  ;;  %v6477_v24 = vsel %vm1579_vm8, %v5000_v20, 0.0  ;;  %2041 = vadd.xlane.f32.xlu0 %v2040_v39  ;;  %8231 = vst [vmem:[#allocation93_spill] sm:$0xff] %v6489_v3 }
 0x331   : > { %8227 = vst [vmem:[#allocation89_spill] sm:$0xff] %v6477_v24  ;;  %v6481_v38 = vsel %vm1580_vm10, %v5002_v58, 0.0  ;;  %v6491_v5 = vpop.xlane.xlu1 %2435  ;;  %v8237_v58 = vld [vmem:[#allocation3_spill] sm:$0xff] }
 0x332   : > { %8228 = vst [vmem:[#allocation90_spill] sm:$0xff] %v6481_v38  ;;  %v2592_v45 = vadd.f32 %v6481_v38, %v6477_v24  ;;  %8232 = vst [vmem:[#allocation94_spill] sm:$0xff] %v6491_v5  ;;  %v1918_v24 = vsub.f32 %v8240_v35, %v6483_v49 }
 0x333   : > { %v6493_v0 = vpop.xlane.xlu0 %1874 }
 0x334   : > { %2593 = vadd.xlane.f32.xlu1 %v2592_v45  ;;  %8233 = vst [vmem:[#allocation95_spill] sm:$0xff] %v6493_v0  ;;  %v8238_v45 = vld [vmem:[#allocation73_spill] sm:$0xff]  ;;  %v1914_v10 = vsub.f32 %v8244_v6, %v6493_v0 }
 0x335   : > { %v6495_v20 = vpop.xlane.xlu1 %1877  ;;  %v1917_v28 = vsub.f32 %v8238_v45, %v6483_v49  ;;  %v1971_v45 = vmul.f32 1.442695, %v1918_v24 }
 0x336   : > { %8234 = vst [vmem:[#allocation96_spill] sm:$0xff] %v6495_v20  ;;  %v1915_v35 = vsub.f32 %v6132_v41, %v6495_v20  ;;  %v8247_v41 = vld [vmem:[#allocation75_spill] sm:$0xff] }
 0x337   : > { %v6497_v39 = vpop.xlane.xlu0 %2426 }
 0x338   : > { %8235 = vst [vmem:[#allocation97_spill] sm:$0xff] %v6497_v39  ;;  %v2465_v38 = vsub.f32 %v6055_v27, %v6497_v39  ;;  %v2466_v21 = vsub.f32 %v6059_v8, %v6497_v39  ;;  %v1916_v27 = vsub.f32 %v6139_v54, %v6495_v20  ;;  %v1965_v24 = vmul.f32 1.442695, %v1915_v35 }
 0x339   : > { %v6505_v2 = vpop.xlane.xlu1 %2429  ;;  %v2471_v35 = vsub.f32 %v6116_v53, %v6491_v5 }
 0x33a   : > { %8239 = vst [vmem:[#allocation2_spill] sm:$0xff] %v6505_v2  ;;  %v2513_v42 = vmul.f32 1.442695, %v2465_v38  ;;  %v2515_v49 = vmul.f32 1.442695, %v2466_v21  ;;  %v2468_v6 = vsub.f32 %v6149_v1, %v6505_v2  ;;  %v2469_v21 = vsub.f32 %v8247_v41, %v6489_v3 }
 0x33b   : > { %v6509_v11 = vpop.xlane.xlu0 %1892  ;;  %v1967_v39 = vmul.f32 1.442695, %v1916_v27  ;;  %v1920_v1 = vsub.f32 %v6088_v13, %v6487_v9 }
 0x33c   : > { %8241 = vst [vmem:[#allocation3_spill] sm:$0xff] %v6509_v11  ;;  %v1925_v53 = vsub.f32 %v6063_v7, %v6509_v11 }
 0x33f   : > { %v6517_v23 = vpop.xlane.xlu1 %1895  ;;  %v6523_v37 = vpop.xlane.xlu0 %2444 }
 0x340   : > { %8243 = vst [vmem:[#allocation73_spill] sm:$0xff] %v6517_v23  ;;  %8245 = vst [vmem:[#allocation74_spill] sm:$0xff] %v6523_v37 }
 0x343   : > { %v6535_v54 = vpop.xlane.xlu0 %1886 }
 0x344   : > { %v6531_v38 = vpop.xlane.xlu1 %2447  ;;  %8248 = vst [vmem:[#allocation78_spill] sm:$0xff] %v6535_v54  ;;  %v1921_v13 = vsub.f32 %v6154_v57, %v6535_v54 }
 0x345   : > { %2767 = vrot.lane.b32.xlu1 %v8236_v59, %s5203_s21  ;;  %v1969_v59 = vmul.f32 1.442695, %v1917_v28  ;;  %v2467_v28 = vsub.f32 %v6145_v43, %v6505_v2  ;;  %8246 = vst [vmem:[#allocation77_spill] sm:$0xff] %v6531_v38  ;;  %v1919_v43 = vsub.f32 %v6084_v15, %v6487_v9  ;;  %v3207_v9 = vld [vmem:[%s6758_s26 + $0x38] sm:$0xff] }
 0x346   : > { %2751 = vrot.lane.b32.xlu0 %v8237_v58, %s5203_s21  ;;  %v1913_v58 = vsub.f32 %v8242_v56, %v6493_v0  ;;  %v1963_v56 = vmul.f32 1.442695, %v1914_v10  ;;  %v1977_v7 = vmul.f32 1.442695, %v1921_v13  ;;  %v8258_v13 = vld [vmem:[#allocation54_spill] sm:$0xff]  ;;  %s5207_s21 = smov 2  }
 0x347   : > { %5003 = vpow2.f32 %v1969_v59  ;;  %v8249_v59 = vld [vmem:[#allocation76_spill] sm:$0xff]  ;;  %v1973_v41 = vmul.f32 1.442695, %v1919_v43  ;;  %v6549_v15 = vpop.xlane.xlu0 %2438  ;;  %vm8259_vm3 = vcmp.gt.f32.partialorder %v8258_v13, 0.0 }
 0x348   : > { %v1961_v8 = vmul.f32 1.442695, %v1913_v58  ;;  %5005 = vpow2.f32 %v1971_v45  ;;  %v2470_v10 = vsub.f32 %v8249_v59, %v6489_v3  ;;  %v2519_v58 = vmul.f32 1.442695, %v2468_v6  ;;  %v6545_v27 = vpop.xlane.xlu1 %1889  ;;  %8251 = vst [vmem:[#allocation76_spill] sm:$0xff] %v6549_v15  ;;  %vm8261_vm11 = vmmov %vm8259_vm3  ;;  %v3205_v3 = vld [vmem:[%s6758_s26 + $0x28] sm:$0xff] }
 0x349   : > { %5007 = vpow2.f32 %v2513_v42  ;;  %v2517_v42 = vmul.f32 1.442695, %v2467_v28  ;;  %v2521_v45 = vmul.f32 1.442695, %v2469_v21  ;;  %8250 = vst [vmem:[#allocation75_spill] sm:$0xff] %v6545_v27  ;;  %v2473_v21 = vsub.f32 %v6168_v14, %v6549_v15 }
 0x34a   : > { %5009 = vpow2.f32 %v2515_v49  ;;  %v2523_v49 = vmul.f32 1.442695, %v2470_v10  ;;  %v1975_v28 = vmul.f32 1.442695, %v1920_v1  ;;  %v1926_v10 = vsub.f32 %v6069_v46, %v6509_v11 }
 0x34b   : > { %5011 = vpow2.f32 %v1961_v8  ;;  %v2472_v8 = vsub.f32 %v6120_v55, %v6491_v5  ;;  %v2525_v55 = vmul.f32 1.442695, %v2471_v35  ;;  %v1923_v43 = vsub.f32 %v6211_v18, %v6545_v27 }
 0x34c   : > { %5013 = vpow2.f32 %v1963_v56  ;;  %v6565_v1 = vpop.xlane.xlu1 %2441  ;;  %v2474_v35 = vsub.f32 %v6172_v62, %v6549_v15 }
 0x34d   : > { %5015 = vpow2.f32 %v1965_v24  ;;  %v1922_v24 = vsub.f32 %v6162_v44, %v6535_v54  ;;  %v2527_v57 = vmul.f32 1.442695, %v2472_v8  ;;  %v1924_v44 = vsub.f32 %v6215_v60, %v6545_v27  ;;  %8252 = vst [vmem:[#allocation98_spill] sm:$0xff] %v6565_v1  ;;  %v3204_v27 = vld [vmem:[%s6758_s26 + $0x20] sm:$0xff] }
 0x34e   : > { %5017 = vpow2.f32 %v1967_v39  ;;  %v1981_v11 = vmul.f32 1.442695, %v1923_v43  ;;  %v2475_v62 = vsub.f32 %v6221_v32, %v6565_v1  ;;  %v8262_v43 = vld [vmem:[#allocation79_spill] sm:$0xff] }
 0x34f   : > { %5019 = vpow2.f32 %v2517_v42  ;;  %v1979_v46 = vmul.f32 1.442695, %v1922_v24  ;;  %v1987_v24 = vmul.f32 1.442695, %v1926_v10 }
 0x350   : > { %5021 = vpow2.f32 %v2519_v58  ;;  %v8253_v58 = vld [vmem:[#allocation52_spill] sm:$0xff]  ;;  %v2533_v13 = vmul.f32 1.442695, %v2475_v62 }
 0x351   : > { %v5004_v56 = vpop.eup %5003  ;;  %5023 = vpow2.f32 %v2521_v45  ;;  %vm8254_vm8 = vcmp.gt.f32.partialorder %v8253_v58, 0.0 }
 0x352   : > { %v5006_v39 = vpop.eup %5005  ;;  %5025 = vpow2.f32 %v2523_v49  ;;  %v6569_v14 = vsel %vm8254_vm8, %v5004_v56, 0.0  ;;  %v1985_v49 = vmul.f32 1.442695, %v1925_v53  ;;  %vm8272_vm2 = vmmov %vm8254_vm8 }
 0x353   : > { %v5008_v6 = vpop.eup %5007  ;;  %5027 = vpow2.f32 %v1973_v41  ;;  %v8255_v41 = vld [vmem:[#allocation53_spill] sm:$0xff] }
 0x354   : > { %v5010_v59 = vpop.eup %5009  ;;  %5029 = vpow2.f32 %v1975_v28  ;;  %vm8256_vm10 = vcmp.gt.f32.partialorder %v8255_v41, 0.0  ;;  %v2529_v28 = vmul.f32 1.442695, %v2473_v21  ;;  %v6579_v60 = vsel %vm8257_vm5, %v5008_v6, 0.0 }
 0x355   : > { %v5012_v42 = vpop.eup %5011  ;;  %v6575_v18 = vsel %vm8256_vm10, %v5006_v39, 0.0  ;;  %5031 = vpow2.f32 %v2525_v55  ;;  %v6583_v56 = vsel %vm8259_vm3, %v5010_v59, 0.0  ;;  %v1983_v39 = vmul.f32 1.442695, %v1924_v44  ;;  %vm8273_vm4 = vmmov %vm8256_vm10 }
 0x356   : > { %v5014_v45 = vpop.eup %5013  ;;  %5033 = vpow2.f32 %v2527_v57  ;;  %v2476_v55 = vsub.f32 %v6225_v12, %v6565_v1  ;;  %v6591_v6 = vsel %vm8260_vm14, %v5012_v42, 0.0  ;;  %v2531_v59 = vmul.f32 1.442695, %v2474_v35  ;;  %v8264_v42 = vld [vmem:[#allocation56_spill] sm:$0xff]  ;;  %v3203_v1 = vld [vmem:[%s6758_s26 + $0x18] sm:$0xff] }
 0x357   : > { %v5016_v8 = vpop.eup %5015  ;;  %5035 = vpow2.f32 %v1977_v7  ;;  %v2601_v10 = vadd.f32 %v6583_v56, %v6579_v60  ;;  %v6597_v57 = vsel %vm8261_vm11, %v5014_v45, 0.0  ;;  %v2477_v7 = vsub.f32 %v8262_v43, %v6523_v37  ;;  %v8266_v35 = vld [vmem:[#allocation80_spill] sm:$0xff] }
 0x358   : > { %v5018_v53 = vpop.eup %5017  ;;  %5037 = vpow2.f32 %v1979_v46  ;;  %v6603_v17 = vsel %vm1587_vm1, %v5016_v8, 0.0  ;;  %vm8265_vm0 = vcmp.gt.f32.partialorder %v8264_v42, 0.0  ;;  %v2478_v15 = vsub.f32 %v8266_v35, %v6523_v37  ;;  %v8268_v42 = vld [vmem:[#allocation59_spill] sm:$0xff] }
 0x359   : > { %v5020_v21 = vpop.eup %5019  ;;  %5039 = vpow2.f32 %v2529_v28  ;;  %v6607_v44 = vsel %vm8265_vm0, %v5018_v53, 0.0  ;;  %v1927_v45 = vsub.f32 %v6183_v51, %v6517_v23  ;;  %v1928_v28 = vsub.f32 %v6187_v52, %v6517_v23  ;;  %vm8267_vm13 = vmmov %vm8265_vm0 }
 0x35a   : > { %v5022_v32 = vpop.eup %5021  ;;  %5041 = vpow2.f32 %v1981_v11  ;;  %v2535_v8 = vmul.f32 1.442695, %v2476_v55  ;;  %v2049_v53 = vadd.f32 %v6597_v57, %v6591_v6  ;;  %v2052_v35 = vadd.f32 %v6607_v44, %v6603_v17 }
 0x35b   : > { %v5024_v46 = vpop.eup %5023  ;;  %5043 = vpow2.f32 %v1983_v39  ;;  %v6621_v51 = vsel %vm1587_vm1, %v5020_v21, 0.0  ;;  %v6625_v11 = vsel %vm8267_vm13, %v5022_v32, 0.0  ;;  %v2537_v52 = vmul.f32 1.442695, %v2477_v7 }
 0x35c   : > { %v5026_v43 = vpop.eup %5025  ;;  %5045 = vpow2.f32 %v2531_v59  ;;  %v1989_v39 = vmul.f32 1.442695, %v1927_v45  ;;  %v2479_v55 = vsub.f32 %v6197_v40, %v6531_v38  ;;  %v2055_v59 = vadd.f32 %v6575_v18, %v6569_v14  ;;  %v8270_v45 = vld [vmem:[#allocation60_spill] sm:$0xff] }
 0x35d   : > { %v5028_v54 = vpop.eup %5027  ;;  %5047 = vpow2.f32 %v1985_v49  ;;  %v1991_v21 = vmul.f32 1.442695, %v1928_v28  ;;  %v2480_v12 = vsub.f32 %v6205_v31, %v6531_v38  ;;  %v2604_v49 = vadd.f32 %v6625_v11, %v6621_v51 }
 0x35e   : > { %v5030_v62 = vpop.eup %5029  ;;  %5049 = vpow2.f32 %v2533_v13  ;;  %v2539_v7 = vmul.f32 1.442695, %v2478_v15  ;;  %vm8269_vm1 = vcmp.gt.f32.partialorder %v8268_v42, 0.0  ;;  %vm8271_vm9 = vcmp.gt.f32.partialorder %v8270_v45, 0.0 }
 0x35f   : > { %5051 = vpow2.f32 %v2535_v8  ;;  %v6637_v40 = vsel %vm8269_vm1, %v5028_v54, 0.0  ;;  %v6641_v13 = vsel %vm8271_vm9, %v5030_v62, 0.0  ;;  %v6645_v31 = vsel %vm8272_vm2, %v5024_v46, 0.0  ;;  %vm8274_vm8 = vmmov %vm8269_vm1 }
 0x360   : > { %5053 = vpow2.f32 %v1987_v24  ;;  %v6649_v28 = vsel %vm8273_vm4, %v5026_v43, 0.0  ;;  %v2541_v24 = vmul.f32 1.442695, %v2479_v55  ;;  %v2543_v8 = vmul.f32 1.442695, %v2480_v12  ;;  %vm8275_vm10 = vmmov %vm8271_vm9  ;;  %v8278_v55 = vld [vmem:[#allocation62_spill] sm:$0xff] }
 0x361   : > { %5055 = vpow2.f32 %v2537_v52  ;;  %v2607_v58 = vadd.f32 %v6649_v28, %v6645_v31  ;;  %v8276_v52 = vld [vmem:[#allocation61_spill] sm:$0xff]  ;;  %vm8279_vm3 = vcmp.gt.f32.partialorder %v8278_v55, 0.0 }
 0x362   : > { %5057 = vpow2.f32 %v1989_v39  ;;  %vm8277_vm5 = vcmp.gt.f32.partialorder %v8276_v52, 0.0  ;;  %vm8281_vm11 = vmmov %vm8279_vm3  ;;  %v8282_v55 = vld [vmem:[#allocation57_spill] sm:$0xff] }
 0x363   : > { %5059 = vpow2.f32 %v1991_v21  ;;  %vm8280_vm14 = vmmov %vm8277_vm5  ;;  %vm8283_vm0 = vcmp.gt.f32.partialorder %v8282_v55, 0.0 }
 0x364   : > { %5061 = vpow2.f32 %v2539_v7 }
 0x365   : > { %2602 = vadd.xlane.f32.xlu0 %v2601_v10  ;;  %v5032_v10 = vpop.eup %5031  ;;  %5063 = vpow2.f32 %v2541_v24 }
 0x366   : > { %v5034_v32 = vpop.eup %5033  ;;  %v6657_v41 = vsel %vm8274_vm8, %v5032_v10, 0.0  ;;  %5065 = vpow2.f32 %v2543_v8 }
 0x367   : > { %v6661_v46 = vsel %vm8275_vm10, %v5034_v32, 0.0 }
 0x368   : > { %v2610_v10 = vadd.f32 %v6661_v46, %v6657_v41 }
 0x369   : > { %2050 = vadd.xlane.f32.xlu1 %v2049_v53  ;;  %2053 = vadd.xlane.f32.xlu0 %v2052_v35  ;;  %v5036_v53 = vpop.eup %5035  ;;  %v2058_v35 = vadd.f32 %v6641_v13, %v6637_v40 }
 0x36a   : > { %v5038_v15 = vpop.eup %5037  ;;  %v6665_v39 = vsel %vm8277_vm5, %v5036_v53, 0.0 }
 0x36b   : > { %v5040_v54 = vpop.eup %5039 }
 0x36c   : > { %v5042_v62 = vpop.eup %5041  ;;  %v6685_v53 = vsel %vm8280_vm14, %v5040_v54, 0.0 }
 0x36d   : > { %2605 = vadd.xlane.f32.xlu1 %v2604_v49  ;;  %2056 = vadd.xlane.f32.xlu0 %v2055_v59  ;;  %v5044_v43 = vpop.eup %5043  ;;  %v6669_v59 = vsel %vm8279_vm3, %v5038_v15, 0.0  ;;  %v6677_v7 = vsel %vm1595_vm15, %v5042_v62, 0.0 }
 0x36e   : > { %v5046_v21 = vpop.eup %5045  ;;  %v2061_v32 = vadd.f32 %v6669_v59, %v6665_v39  ;;  %v6681_v42 = vsel %vm1596_vm12, %v5044_v43, 0.0 }
 0x36f   : > { %v5048_v12 = vpop.eup %5047  ;;  %v6689_v15 = vsel %vm8281_vm11, %v5046_v21, 0.0 }
 0x370   : > { %v5050_v49 = vpop.eup %5049  ;;  %v6705_v21 = vsel %vm8283_vm0, %v5048_v12, 0.0 }
 0x371   : > { %2059 = vadd.xlane.f32.xlu1 %v2058_v35  ;;  %2608 = vadd.xlane.f32.xlu0 %v2607_v58  ;;  %v5052_v45 = vpop.eup %5051  ;;  %v2064_v35 = vadd.f32 %v6681_v42, %v6677_v7  ;;  %v2613_v58 = vadd.f32 %v6689_v15, %v6685_v53  ;;  %v6697_v43 = vsel %vm1595_vm15, %v5050_v49, 0.0  ;;  %vm8286_vm15 = vmmov %vm8283_vm0 }
 0x372   : > { %v5054_v24 = vpop.eup %5053  ;;  %v6701_v54 = vsel %vm1596_vm12, %v5052_v45, 0.0 }
 0x373   : > { %v5056_v8 = vpop.eup %5055  ;;  %v2616_v48 = vadd.f32 %v6701_v54, %v6697_v43 }
 0x374   : > { %v5058_v62 = vpop.eup %5057 }
 0x375   : > { %2611 = vadd.xlane.f32.xlu1 %v2610_v10  ;;  %2062 = vadd.xlane.f32.xlu0 %v2061_v32  ;;  %v5060_v52 = vpop.eup %5059  ;;  %v8284_v10 = vld [vmem:[#allocation58_spill] sm:$0xff]  ;;  %v6717_v45 = vsel %vm1599_vm7, %v5058_v62, 0.0 }
 0x376   : > { %vm8285_vm13 = vcmp.gt.f32.partialorder %v8284_v10, 0.0  ;;  %v5062_v37 = vpop.eup %5061  ;;  %v6721_v12 = vsel %vm1600_vm6, %v5060_v52, 0.0 }
 0x377   : > { %v6709_v32 = vsel %vm8285_vm13, %v5054_v24, 0.0  ;;  %v5064_v49 = vpop.eup %5063  ;;  %v6725_v24 = vsel %vm8286_vm15, %v5056_v8, 0.0  ;;  %vm8288_vm12 = vmmov %vm8285_vm13  ;;  %v2070_v38 = vadd.f32 %v6721_v12, %v6717_v45 }
 0x378   : > { %v2067_v33 = vadd.f32 %v6709_v32, %v6705_v21  ;;  %8287 = vst [vmem:[#allocation52_spill] sm:$0xff] %v6725_v24  ;;  %v6737_v52 = vsel %vm1599_vm7, %v5064_v49, 0.0 }
 0x379   : > { %2065 = vadd.xlane.f32.xlu1 %v2064_v35  ;;  %2614 = vadd.xlane.f32.xlu0 %v2613_v58  ;;  %v5066_v35 = vpop.eup %5065  ;;  %v6729_v58 = vsel %vm8288_vm12, %v5062_v37, 0.0  ;;  %8289 = vst [vmem:[#allocation53_spill] sm:$0xff] %v6737_v52 }
 0x37a   : > { %v2619_v62 = vadd.f32 %v6729_v58, %v6725_v24  ;;  %v6741_v8 = vsel %vm1600_vm6, %v5066_v35, 0.0 }
 0x37b   : > { %8290 = vst [vmem:[#allocation54_spill] sm:$0xff] %v6741_v8  ;;  %v2622_v37 = vadd.f32 %v6741_v8, %v6737_v52 }
 0x37d   : > { %2617 = vadd.xlane.f32.xlu1 %v2616_v48  ;;  %2068 = vadd.xlane.f32.xlu0 %v2067_v33 }
 0x381   : > { %2071 = vadd.xlane.f32.xlu1 %v2070_v38  ;;  %2620 = vadd.xlane.f32.xlu0 %v2619_v62  ;;  %v3200_v62 = vld [vmem:[%s6758_s26] sm:$0xff] }
 0x385   : > { %2623 = vadd.xlane.f32.xlu1 %v2622_v37  ;;  %v3201_v37 = vld [vmem:[%s6758_s26 + $0x8] sm:$0xff] }
 0x386   : > { %v4863_v23 = vpack.i.bf16 %v3201_v37, %v3200_v62  ;;  %v3210_v37 = vld [vmem:[%s6758_s26 + $0x50] sm:$0xff] }
 0x38c   : > { %v2033_v33 = vpop.xlane.xlu1 %2032 }
 0x38d   : > { %vm2075_vm9 = vcmp.eq.f32.partialorder %v2033_v33, 0.0 }
 0x38e   : > { %v6760_v35 = vsel %vm2075_vm9, 1.0, %v2033_v33  ;;  %v3206_v33 = vld [vmem:[%s6758_s26 + $0x30] sm:$0xff] }
 0x38f   : > { %8293 = vst [vmem:[#allocation56_spill] sm:$0xff] %v6760_v35  ;;  %v4878_v62 = vpack.i.bf16 %v3207_v9, %v3206_v33  ;;  %v3214_v9 = vld [vmem:[%s6758_s26 + $0x70] sm:$0xff] }
 0x391   : > { %v6745_v55 = vpop.xlane.xlu0 %2584 }
 0x392   : > { %vm2627_vm8 = vcmp.eq.f32.partialorder %v6745_v55, 0.0 }
 0x397   : > { %4864 = vrot.lane.b32.xlu0 %v4863_v23, %s5206_s30 }
 0x398   : > { %v2027_v10 = vpop.xlane.xlu0 %2026 }
 0x399   : > { %vm2073_vm1 = vcmp.eq.f32.partialorder %v2027_v10, 0.0 }
 0x39a   : > { %v6747_v29 = vsel %vm2073_vm1, 1.0, %v2027_v10  ;;  %v3202_v10 = vld [vmem:[%s6758_s26 + $0x10] sm:$0xff] }
 0x39b   : > { %8291 = vst [vmem:[#allocation79_spill] sm:$0xff] %v6747_v29  ;;  %5067 = vrcp.f32 %v6747_v29  ;;  %v4868_v5 = vpack.i.bf16 %v3203_v1, %v3202_v10  ;;  %v4873_v1 = vpack.i.bf16 %v3205_v3, %v3204_v27  ;;  %v3211_v10 = vld [vmem:[%s6758_s26 + $0x58] sm:$0xff]  ;;  %4879 = vrot.lane.b32.xlu0 %v4878_v62, %s5206_s30 }
 0x39c   : > { %v2579_v48 = vpop.xlane.xlu0 %2578  ;;  %v3215_v27 = vld [vmem:[%s6758_s26 + $0x78] sm:$0xff] }
 0x39d   : > { %vm2625_vm6 = vcmp.eq.f32.partialorder %v2579_v48, 0.0  ;;  %4869 = vrot.lane.b32.xlu1 %v4868_v5, %s5206_s30  ;;  %v4888_v5 = vpack.i.bf16 %v3211_v10, %v3210_v37 }
 0x39e   : > { %v6774_v0 = vsel %vm2625_vm6, 1.0, %v2579_v48  ;;  %v3208_v48 = vld [vmem:[%s6758_s26 + $0x40] sm:$0xff] }
 0x39f   : > { %8294 = vst [vmem:[#allocation80_spill] sm:$0xff] %v6774_v0  ;;  %4889 = vrot.lane.b32.xlu0 %v4888_v5, %s5206_s30 }
 0x3a0   : > { %v2036_v34 = vpop.xlane.xlu0 %2035 }
 0x3a1   : > { %vm2076_vm7 = vcmp.eq.f32.partialorder %v2036_v34, 0.0  ;;  %v2588_v49 = vpop.xlane.xlu1 %2587  ;;  %4874 = vrot.lane.b32.xlu1 %v4873_v1, %s5206_s30 }
 0x3a2   : > { %v6752_v38 = vsel %vm2076_vm7, 1.0, %v2036_v34  ;;  %vm2628_vm10 = vcmp.eq.f32.partialorder %v2588_v49, 0.0 }
 0x3a3   : > { %8292 = vst [vmem:[#allocation55_spill] sm:$0xff] %v6752_v38  ;;  %5069 = vrcp.f32 %v6752_v38  ;;  %v3212_v38 = vld [vmem:[%s6758_s26 + $0x60] sm:$0xff] }
 0x3a4   : > { %5071 = vrcp.f32 %v6760_v35  ;;  %v3209_v35 = vld [vmem:[%s6758_s26 + $0x48] sm:$0xff] }
 0x3a5   : > { %v4883_v3 = vpack.i.bf16 %v3209_v35, %v3208_v48  ;;  %v5068_v29 = vpop.eup %5067  ;;  %v6801_v35 = vsel %vm2627_vm8, 1.0, %v6745_v55  ;;  %v6803_v48 = vsel %vm2628_vm10, 1.0, %v2588_v49 }
 0x3a6   : > { %v2030_v34 = vpop.xlane.xlu1 %2029  ;;  %v2122_v52 = vmul.f32 %v5068_v29, %v6315_v25  ;;  %v2121_v5 = vmul.f32 %v5068_v29, %v6311_v50 }
 0x3a7   : > { %vm2074_vm2 = vcmp.eq.f32.partialorder %v2030_v34, 0.0  ;;  %4884 = vrot.lane.b32.xlu1 %v4883_v3, %s5206_s30 }
 0x3a8   : > { %v6776_v2 = vsel %vm2074_vm2, 1.0, %v2030_v34  ;;  %v6786_v34 = vpop.xlane.xlu0 %2596 }
 0x3a9   : > { %8295 = vst [vmem:[#allocation59_spill] sm:$0xff] %v6776_v2  ;;  %5073 = vrcp.f32 %v6776_v2  ;;  %v3213_v2 = vld [vmem:[%s6758_s26 + $0x68] sm:$0xff]  ;;  %vm2631_vm12 = vcmp.eq.f32.partialorder %v6786_v34, 0.0 }
 0x3aa   : > { %v2582_v20 = vpop.xlane.xlu1 %2581  ;;  %5075 = vrcp.f32 %v6774_v0  ;;  %v4893_v37 = vpack.i.bf16 %v3213_v2, %v3212_v38 }
 0x3ab   : > { %vm2626_vm4 = vcmp.eq.f32.partialorder %v2582_v20, 0.0 }
 0x3ac   : > { %v6788_v23 = vsel %vm2626_vm4, 1.0, %v2582_v20  ;;  %v4898_v20 = vpack.i.bf16 %v3215_v27, %v3214_v9  ;;  %4894 = vrot.lane.b32.xlu1 %v4893_v37, %s5206_s30 }
 0x3ad   : > { %8296 = vst [vmem:[#allocation60_spill] sm:$0xff] %v6788_v23  ;;  %5077 = vrcp.f32 %v6788_v23  ;;  %v5070_v62 = vpop.eup %5069 }
 0x3ae   : > { %v2045_v33 = vpop.xlane.xlu1 %2044  ;;  %v5072_v10 = vpop.eup %5071  ;;  %v2128_v3 = vmul.f32 %v5070_v62, %v6347_v19  ;;  %4899 = vrot.lane.b32.xlu0 %v4898_v20, %s5206_s30  ;;  %5079 = vrcp.f32 %v6803_v48  ;;  %v2127_v27 = vmul.f32 %v5070_v62, %v6343_v61  ;;  %s7322_s30 = scalar_lea.vmem %s7880_s17, %s6750_s28 }
 0x3af   : > { %v2126_v55 = vmul.f32 %v5072_v10, %v6271_v4  ;;  %5081 = vrcp.f32 %v6801_v35  ;;  %vm2079_vm14 = vcmp.eq.f32.partialorder %v2045_v33, 0.0 }
 0x3b1   : > { %v2591_v0 = vpop.xlane.xlu0 %2590  ;;  %v2156_v50 = vpack.c.bf16 %v2128_v3, %v2126_v55  ;;  %v6844_v55 = vsel %vm2631_vm12, 1.0, %v6786_v34 }
 0x3b2   : > { %vm2629_vm11 = vcmp.eq.f32.partialorder %v2591_v0, 0.0  ;;  %8300 = vst [vmem:[#allocation57_spill] sm:$0xff] %v6844_v55 }
 0x3b3   : > { %v5074_v1 = vpop.eup %5073  ;;  %v2039_v23 = vpop.xlane.xlu1 %2038 }
 0x3b4   : > { %v2124_v8 = vmul.f32 %v5074_v1, %v6373_v47  ;;  %v2123_v9 = vmul.f32 %v5074_v1, %v6369_v26  ;;  %v5076_v2 = vpop.eup %5075  ;;  %vm2077_vm5 = vcmp.eq.f32.partialorder %v2039_v23, 0.0 }
 0x3b5   : > { %v2048_v24 = vpop.xlane.xlu0 %2047  ;;  %v2674_v19 = vmul.f32 %v5076_v2, %v6325_v63  ;;  %v6817_v47 = vsel %vm2077_vm5, 1.0, %v2039_v23  ;;  %v6825_v63 = vsel %vm2629_vm11, 1.0, %v2591_v0 }
 0x3b6   : > { %v2154_v25 = vpack.c.bf16 %v2124_v8, %v2122_v52  ;;  %v2153_v49 = vpack.c.bf16 %v2123_v9, %v2121_v5  ;;  %vm2080_vm3 = vcmp.eq.f32.partialorder %v2048_v24, 0.0  ;;  %v6821_v8 = vsel %vm2079_vm14, 1.0, %v2045_v33  ;;  %v8299_v9 = vld [vmem:[#allocation38_spill] sm:$0xff] }
 0x3b7   : > { %v5078_v38 = vpop.eup %5077  ;;  %v6819_v29 = vsel %vm2080_vm3, 1.0, %v2048_v24  ;;  %8297 = vst [vmem:[#allocation61_spill] sm:$0xff] %v6821_v8  ;;  %5083 = vrcp.f32 %v6817_v47  ;;  %v2673_v3 = vmul.f32 %v5076_v2, %v8299_v9 }
 0x3b8   : > { %2914 = vmatprep.mubr.bf16.mxu1 %v2154_v25  ;;  %v2676_v26 = vmul.f32 %v5078_v38, %v6399_v30  ;;  %v2600_v4 = vpop.xlane.xlu1 %2599  ;;  %5085 = vrcp.f32 %v6819_v29  ;;  %v2125_v30 = vmul.f32 %v5072_v10, %v6267_v16  ;;  %v5080_v61 = vpop.eup %5079  ;;  %v2675_v16 = vmul.f32 %v5078_v38, %v6393_v36  ;;  %v8301_v25 = vld [vmem:[#allocation37_spill] sm:$0xff] }
 0x3b9   : > { %2915 = vmatmul.mubr.bf16.vlgmr.msra.gmra.mrb[44].mxu1 %v2153_v49  ;;  %5087 = vrcp.f32 %v6821_v8  ;;  %vm2632_vm13 = vcmp.eq.f32.partialorder %v2600_v4, 0.0  ;;  %v5082_v0 = vpop.eup %5081  ;;  %v2680_v1 = vmul.f32 %v5080_v61, %v6363_v22  ;;  %v8310_v8 = vld [vmem:[#allocation45_spill] sm:$0xff] }
 0x3ba   : > { %2922 = vmatprep.mubr.bf16.mxu1 %v2156_v50  ;;  %v2706_v52 = vpack.c.bf16 %v2676_v26, %v2674_v19  ;;  %v2155_v33 = vpack.c.bf16 %v2127_v27, %v2125_v30  ;;  %v6839_v37 = vsel %vm2632_vm13, 1.0, %v2600_v4  ;;  %v2678_v49 = vmul.f32 %v5082_v0, %v8301_v25  ;;  %v8302_v4 = vld [vmem:[#allocation47_spill] sm:$0xff] }
 0x3bb   : > { %8298 = vst [vmem:[#allocation62_spill] sm:$0xff] %v6839_v37  ;;  %v2705_v19 = vpack.c.bf16 %v2675_v16, %v2673_v3  ;;  %v8307_v16 = vld [vmem:[#allocation51_spill] sm:$0xff] }
 0x3bc   : > { %2817 = vmatprep.mubr.bf16.mxu0 %v2706_v52  ;;  %v2708_v38 = vpack.c.bf16 %v2680_v1, %v2678_v49  ;;  %v8303_v52 = vld [vmem:[#allocation69_spill] sm:$0xff]  ;;  %v8308_v49 = vld [vmem:[#allocation42_spill] sm:$0xff] }
 0x3bd   : > { %v2042_v20 = vpop.xlane.xlu0 %2041  ;;  %v2679_v34 = vmul.f32 %v5080_v61, %v8303_v52 }
 0x3be   : > { %vm2078_vm0 = vcmp.eq.f32.partialorder %v2042_v20, 0.0 }
 0x3bf   : > { %v6830_v24 = vsel %vm2078_vm0, 1.0, %v2042_v20  ;;  %v8304_v20 = vld [vmem:[#allocation49_spill] sm:$0xff] }
 0x3c0   : > { %5089 = vrcp.f32 %v6830_v24 }
 0x3c1   : > { %v2594_v23 = vpop.xlane.xlu1 %2593  ;;  %5091 = vrcp.f32 %v6825_v63  ;;  %2923 = vmatmul.mubr.bf16.gmra.mrb[48].mxu1 %v2155_v33  ;;  %v2752_v5 = vpop.permute.xlu0 %2751 }
 0x3c2   : > { %vm2630_vm15 = vcmp.eq.f32.partialorder %v2594_v23, 0.0  ;;  %v5084_v50 = vpop.eup %5083 }
 0x3c3   : > { %v6834_v62 = vsel %vm2630_vm15, 1.0, %v2594_v23  ;;  %v5086_v36 = vpop.eup %5085  ;;  %v2130_v2 = vmul.f32 %v5084_v50, %v8302_v4  ;;  %v8305_v23 = vld [vmem:[#allocation46_spill] sm:$0xff] }
 0x3c4   : > { %5093 = vrcp.f32 %v6834_v62  ;;  %v5088_v26 = vpop.eup %5087  ;;  %v2129_v33 = vmul.f32 %v5084_v50, %v8305_v23  ;;  %v2136_v9 = vmul.f32 %v5086_v36, %v8307_v16  ;;  %v8316_v16 = vld [vmem:[#allocation44_spill] sm:$0xff] }
 0x3c5   : > { %v2768_v10 = vpop.permute.xlu1 %2767  ;;  %5095 = vrcp.f32 %v6839_v37  ;;  %v8311_v37 = vld [vmem:[#allocation90_spill] sm:$0xff] }
 0x3c6   : > { %4541 = vmatprep.subr.bf16.mxu0 %v2768_v10  ;;  %5097 = vrcp.f32 %v6844_v55  ;;  %v8306_v10 = vld [vmem:[#allocation48_spill] sm:$0xff] }
 0x3c7   : > { %4542 = vmatpush3.bf16.msra.mxu0 %v2752_v5  ;;  %v8309_v55 = vld [vmem:[#allocation36_spill] sm:$0xff] }
 0x3ca   : > { %2818 = vmatmul.mubr.bf16.vlgmr.msra.gmra.mrb[40].mxu0 %v2705_v19  ;;  %v5090_v22 = vpop.eup %5089  ;;  %v2134_v19 = vmul.f32 %v5088_v26, %v8308_v49 }
 0x3cb   : > { %2825 = vmatprep.mubr.bf16.mxu0 %v2708_v38  ;;  %v5092_v27 = vpop.eup %5091  ;;  %v2132_v30 = vmul.f32 %v5090_v22, %v8304_v20  ;;  %v2131_v5 = vmul.f32 %v5090_v22, %v8306_v10  ;;  %v2677_v38 = vmul.f32 %v5082_v0, %v8309_v55  ;;  %v8312_v22 = vld [vmem:[#allocation50_spill] sm:$0xff]  ;;  %v8315_v55 = vld [vmem:[#allocation88_spill] sm:$0xff] }
 0x3cc   : > { %v2682_v4 = vmul.f32 %v5092_v27, %v8310_v8  ;;  %v2160_v52 = vpack.c.bf16 %v2136_v9, %v2134_v19  ;;  %v8317_v9 = vld [vmem:[#allocation41_spill] sm:$0xff]  ;;  %v8318_v19 = vld [vmem:[#allocation87_spill] sm:$0xff] }
 0x3cd   : > { %v2158_v3 = vpack.c.bf16 %v2132_v30, %v2130_v2  ;;  %v2157_v25 = vpack.c.bf16 %v2131_v5, %v2129_v33  ;;  %v2707_v20 = vpack.c.bf16 %v2679_v34, %v2677_v38  ;;  %v2135_v2 = vmul.f32 %v5086_v36, %v8312_v22  ;;  %v8313_v33 = vld [vmem:[#allocation89_spill] sm:$0xff]  ;;  %v8314_v5 = vld [vmem:[#allocation72_spill] sm:$0xff] }
 0x3ce   : > { %v5094_v1 = vpop.eup %5093  ;;  %v2133_v0 = vmul.f32 %v5088_v26, %v8314_v5  ;;  %v8319_v36 = vld [vmem:[#allocation40_spill] sm:$0xff] }
 0x3cf   : > { %v2684_v61 = vmul.f32 %v5094_v1, %v8311_v37  ;;  %2930 = vmatprep.mubr.bf16.mxu1 %v2158_v3  ;;  %v5096_v23 = vpop.eup %5095  ;;  %v2683_v10 = vmul.f32 %v5094_v1, %v8313_v33  ;;  %v2681_v37 = vmul.f32 %v5092_v27, %v8316_v16 }
 0x3d0   : > { %2931 = vmatmul.mubr.bf16.gmra.mrb[52].mxu1 %v2157_v25  ;;  %v5098_v30 = vpop.eup %5097  ;;  %v2688_v8 = vmul.f32 %v5096_v23, %v8315_v55  ;;  %v2159_v3 = vpack.c.bf16 %v2135_v2, %v2133_v0  ;;  %v2687_v38 = vmul.f32 %v5096_v23, %v8318_v19 }
 0x3d1   : > { %v2710_v50 = vpack.c.bf16 %v2684_v61, %v2682_v4  ;;  %2938 = vmatprep.mubr.bf16.mxu1 %v2160_v52  ;;  %v2686_v34 = vmul.f32 %v5098_v30, %v8317_v9  ;;  %v2709_v25 = vpack.c.bf16 %v2683_v10, %v2681_v37  ;;  %v2685_v4 = vmul.f32 %v5098_v30, %v8319_v36 }
 0x3d2   : > { %2826 = vmatmul.mubr.bf16.gmra.mrb[44].mxu0 %v2707_v20 }
 0x3d3   : > { %2833 = vmatprep.mubr.bf16.mxu0 %v2710_v50  ;;  %v2712_v49 = vpack.c.bf16 %v2688_v8, %v2686_v34  ;;  %v2711_v61 = vpack.c.bf16 %v2687_v38, %v2685_v4 }
 0x3d8   : > { %2939 = vmatmul.mubr.bf16.gmra.mrb[56].mxu1 %v2159_v3 }
 0x3da   : > { %2834 = vmatmul.mubr.bf16.gmra.mrb[48].mxu0 %v2709_v25 }
 0x3db   : > { %2841 = vmatprep.mubr.bf16.mxu0 %v2712_v49 }
 0x3e2   : > { %2842 = vmatmul.mubr.bf16.gmra.mrb[52].mxu0 %v2711_v61 }
 0x3f2   : > { %v2603_v1 = vpop.xlane.xlu0 %2602 }
 0x3f3   : > { %vm2633_vm1 = vcmp.eq.f32.partialorder %v2603_v1, 0.0 }
 0x3f4   : > { %v6867_v26 = vsel %vm2633_vm1, 1.0, %v2603_v1  ;;  %vm3280_vm1 = vcmask 261120  }
 0x3f5   : > { %5099 = vrcp.f32 %v6867_v26 }
 0x3f6   : > { %v2051_v52 = vpop.xlane.xlu1 %2050  ;;  %v2054_v27 = vpop.xlane.xlu0 %2053 }
 0x3f7   : > { %vm2081_vm7 = vcmp.eq.f32.partialorder %v2051_v52, 0.0  ;;  %vm2082_vm9 = vcmp.eq.f32.partialorder %v2054_v27, 0.0 }
 0x3f8   : > { %v6870_v20 = vsel %vm2081_vm7, 1.0, %v2051_v52  ;;  %v6872_v50 = vsel %vm2082_vm9, 1.0, %v2054_v27  ;;  %vm8323_vm7 = vcmask 523264  }
 0x3f9   : > { %5101 = vrcp.f32 %v6870_v20  ;;  %vm8324_vm9 = vmmov %vm8323_vm7 }
 0x3fa   : > { %5103 = vrcp.f32 %v6872_v50  ;;  %v2606_v23 = vpop.xlane.xlu1 %2605  ;;  %v2057_v22 = vpop.xlane.xlu0 %2056 }
 0x3fb   : > { %vm2634_vm6 = vcmp.eq.f32.partialorder %v2606_v23, 0.0  ;;  %vm2083_vm2 = vcmp.eq.f32.partialorder %v2057_v22, 0.0 }
 0x3fc   : > { %v6876_v2 = vsel %vm2634_vm6, 1.0, %v2606_v23  ;;  %v6878_v30 = vsel %vm2083_vm2, 1.0, %v2057_v22  ;;  %vm8325_vm6 = vmmov %vm8323_vm7 }
 0x3fd   : > { %5105 = vrcp.f32 %v6876_v2  ;;  %vm8326_vm2 = vmmov %vm8325_vm6 }
 0x3fe   : > { %5107 = vrcp.f32 %v6878_v30  ;;  %v2060_v33 = vpop.xlane.xlu1 %2059  ;;  %v2609_v10 = vpop.xlane.xlu0 %2608 }
 0x3ff   : > { %vm2084_vm4 = vcmp.eq.f32.partialorder %v2060_v33, 0.0  ;;  %vm2635_vm8 = vcmp.eq.f32.partialorder %v2609_v10, 0.0  ;;  %v5100_v55 = vpop.eup %5099 }
 0x400   : > { %v6882_v5 = vsel %vm2084_vm4, 1.0, %v2060_v33  ;;  %v6884_v0 = vsel %vm2635_vm8, 1.0, %v2609_v10  ;;  %v2690_v4 = vmul.f32 %v5100_v55, %v6583_v56  ;;  %vm8327_vm4 = vmmov %vm8326_vm2 }
 0x401   : > { %5109 = vrcp.f32 %v6882_v5  ;;  %vm8328_vm8 = vmmov %vm8326_vm2 }
 0x402   : > { %5111 = vrcp.f32 %v6884_v0  ;;  %v2612_v8 = vpop.xlane.xlu1 %2611  ;;  %v2063_v37 = vpop.xlane.xlu0 %2062 }
 0x403   : > { %v5102_v16 = vpop.eup %5101  ;;  %vm2636_vm10 = vcmp.eq.f32.partialorder %v2612_v8, 0.0  ;;  %vm2085_vm5 = vcmp.eq.f32.partialorder %v2063_v37, 0.0 }
 0x404   : > { %v5104_v3 = vpop.eup %5103  ;;  %v6888_v9 = vsel %vm2636_vm10, 1.0, %v2612_v8  ;;  %v2138_v34 = vmul.f32 %v5102_v16, %v6597_v57  ;;  %v2137_v25 = vmul.f32 %v5102_v16, %v6591_v6  ;;  %v6892_v49 = vsel %vm2085_vm5, 1.0, %v2063_v37  ;;  %vm8329_vm10 = vmmov %vm8326_vm2 }
 0x405   : > { %5113 = vrcp.f32 %v6888_v9  ;;  %v2140_v19 = vmul.f32 %v5104_v3, %v6607_v44  ;;  %v2139_v38 = vmul.f32 %v5104_v3, %v6603_v17  ;;  %v2689_v6 = vmul.f32 %v5100_v55, %v6579_v60  ;;  %vm8330_vm5 = vmmov %vm8326_vm2 }
 0x406   : > { %5115 = vrcp.f32 %v6892_v49  ;;  %v2066_v36 = vpop.xlane.xlu1 %2065  ;;  %v2615_v1 = vpop.xlane.xlu0 %2614 }
 0x407   : > { %v5106_v61 = vpop.eup %5105  ;;  %vm2086_vm3 = vcmp.eq.f32.partialorder %v2066_v36, 0.0  ;;  %v2162_v52 = vpack.c.bf16 %v2140_v19, %v2138_v34  ;;  %v2161_v57 = vpack.c.bf16 %v2139_v38, %v2137_v25  ;;  %vm2637_vm14 = vcmp.eq.f32.partialorder %v2615_v1, 0.0 }
 0x408   : > { %v5108_v27 = vpop.eup %5107  ;;  %v6900_v23 = vsel %vm2086_vm3, 1.0, %v2066_v36  ;;  %v2692_v44 = vmul.f32 %v5106_v61, %v6625_v11  ;;  %v2691_v17 = vmul.f32 %v5106_v61, %v6621_v51  ;;  %v6904_v22 = vsel %vm2637_vm14, 1.0, %v2615_v1 }
 0x409   : > { %5117 = vrcp.f32 %v6900_v23  ;;  %2946 = vmatprep.mubr.bf16.mxu1 %v2162_v52  ;;  %v2142_v55 = vmul.f32 %v5108_v27, %v6575_v18  ;;  %v2141_v11 = vmul.f32 %v5108_v27, %v6569_v14  ;;  %vm3098_vm3 = vcmask 15360  }
 0x40a   : > { %2947 = vmatmul.mubr.bf16.gmra.mrb[60].mxu1 %v2161_v57  ;;  %v2618_v56 = vpop.xlane.xlu1 %2617  ;;  %v2714_v33 = vpack.c.bf16 %v2692_v44, %v2690_v4  ;;  %v2713_v10 = vpack.c.bf16 %v2691_v17, %v2689_v6  ;;  %5119 = vrcp.f32 %v6904_v22  ;;  %v2069_v60 = vpop.xlane.xlu0 %2068  ;;  %vm3115_vm14 = vcmask 31744  }
 0x40b   : > { %v5110_v8 = vpop.eup %5109  ;;  %vm2638_vm11 = vcmp.eq.f32.partialorder %v2618_v56, 0.0  ;;  %vm2087_vm0 = vcmp.eq.f32.partialorder %v2069_v60, 0.0 }
 0x40c   : > { %v5112_v16 = vpop.eup %5111  ;;  %v6910_v51 = vsel %vm2638_vm11, 1.0, %v2618_v56  ;;  %2849 = vmatprep.mubr.bf16.mxu0 %v2714_v33  ;;  %v2144_v37 = vmul.f32 %v5110_v8, %v6641_v13  ;;  %v2143_v3 = vmul.f32 %v5110_v8, %v6637_v40  ;;  %v6914_v34 = vsel %vm2087_vm0, 1.0, %v2069_v60 }
 0x40d   : > { %5121 = vrcp.f32 %v6910_v51  ;;  %2850 = vmatmul.mubr.bf16.gmra.mrb[56].mxu0 %v2713_v10  ;;  %v2694_v36 = vmul.f32 %v5112_v16, %v6649_v28  ;;  %v2693_v4 = vmul.f32 %v5112_v16, %v6645_v31  ;;  %vm3132_vm11 = vcmask 39936  }
 0x40e   : > { %v2072_v25 = vpop.xlane.xlu1 %2071  ;;  %v2164_v19 = vpack.c.bf16 %v2144_v37, %v2142_v55  ;;  %v2163_v38 = vpack.c.bf16 %v2143_v3, %v2141_v11  ;;  %5123 = vrcp.f32 %v6914_v34  ;;  %v2621_v14 = vpop.xlane.xlu0 %2620  ;;  %vm3149_vm0 = vcmask 48128  }
 0x40f   : > { %v5114_v18 = vpop.eup %5113  ;;  %vm2088_vm13 = vcmp.eq.f32.partialorder %v2072_v25, 0.0  ;;  %vm2639_vm15 = vcmp.eq.f32.partialorder %v2621_v14, 0.0 }
 0x410   : > { %v5116_v13 = vpop.eup %5115  ;;  %v6920_v40 = vsel %vm2088_vm13, 1.0, %v2072_v25  ;;  %2954 = vmatprep.mubr.bf16.mxu1 %v2164_v19  ;;  %v2696_v61 = vmul.f32 %v5114_v18, %v6661_v46  ;;  %v2695_v1 = vmul.f32 %v5114_v18, %v6657_v41  ;;  %v6924_v52 = vsel %vm2639_vm15, 1.0, %v2621_v14  ;;  %v8320_v18 = vld [vmem:[#allocation54_spill] sm:$0xff] }
 0x411   : > { %5125 = vrcp.f32 %v6920_v40  ;;  %v2146_v31 = vmul.f32 %v5116_v13, %v6669_v59  ;;  %v2145_v41 = vmul.f32 %v5116_v13, %v6665_v39  ;;  %v8322_v13 = vld [vmem:[#allocation53_spill] sm:$0xff]  ;;  %vm3166_vm13 = vcmask 56320  }
 0x412   : > { %2955 = vmatmul.mubr.bf16.gmra.mrb[64].mxu1 %v2163_v38  ;;  %v2624_v57 = vpop.xlane.xlu1 %2623  ;;  %v2716_v6 = vpack.c.bf16 %v2696_v61, %v2694_v36  ;;  %v2715_v27 = vpack.c.bf16 %v2695_v1, %v2693_v4  ;;  %5127 = vrcp.f32 %v6924_v52  ;;  %v8321_v36 = vld [vmem:[#allocation52_spill] sm:$0xff]  ;;  %v4936_v1 = vld [vmem:[%s7871_s8 + $0x18] sm:$0xff]   ;;  %vm3183_vm15 = vcmask 64512  }
 0x413   : > { %v5118_v28 = vpop.eup %5117  ;;  %vm2640_vm12 = vcmp.eq.f32.partialorder %v2624_v57, 0.0 }
 0x414   : > { %v6929_v44 = vsel %vm2640_vm12, 1.0, %v2624_v57  ;;  %2857 = vmatprep.mubr.bf16.mxu0 %v2716_v6  ;;  %v2148_v46 = vmul.f32 %v5118_v28, %v6681_v42  ;;  %v2147_v17 = vmul.f32 %v5118_v28, %v6677_v7  ;;  %v5120_v56 = vpop.eup %5119 }
 0x415   : > { %5129 = vrcp.f32 %v6929_v44  ;;  %2858 = vmatmul.mubr.bf16.gmra.mrb[60].mxu0 %v2715_v27  ;;  %v2698_v60 = vmul.f32 %v5120_v56, %v6689_v15  ;;  %v2697_v55 = vmul.f32 %v5120_v56, %v6685_v53 }
 0x416   : > { %v2166_v33 = vpack.c.bf16 %v2148_v46, %v2146_v31  ;;  %v2165_v10 = vpack.c.bf16 %v2147_v17, %v2145_v41 }
 0x417   : > { %v5122_v8 = vpop.eup %5121 }
 0x418   : > { %2962 = vmatprep.mubr.bf16.mxu1 %v2166_v33  ;;  %v2700_v59 = vmul.f32 %v5122_v8, %v6701_v54  ;;  %v2699_v42 = vmul.f32 %v5122_v8, %v6697_v43  ;;  %v5124_v11 = vpop.eup %5123 }
 0x419   : > { %v2150_v37 = vmul.f32 %v5124_v11, %v6709_v32  ;;  %v2149_v25 = vmul.f32 %v5124_v11, %v6705_v21  ;;  %v4933_v21 = vld [vmem:[%s7871_s8] sm:$0xff]  }
 0x41a   : > { %2963 = vmatmul.mubr.bf16.gmra.mrb[68].mxu1 %v2165_v10  ;;  %v2718_v39 = vpack.c.bf16 %v2700_v59, %v2698_v60  ;;  %v2717_v7 = vpack.c.bf16 %v2699_v42, %v2697_v55  ;;  %4771 = vmatprep.subr.bf16.mxu0 %v4933_v21 }
 0x41b   : > { %v5126_v16 = vpop.eup %5125  ;;  %4772 = vmatpush3.bf16.msra.mxu0 %v4933_v21 }
 0x41c   : > { %2865 = vmatprep.mubr.bf16.mxu0 %v2718_v39  ;;  %v2152_v3 = vmul.f32 %v5126_v16, %v6721_v12  ;;  %v2151_v15 = vmul.f32 %v5126_v16, %v6717_v45  ;;  %v5128_v19 = vpop.eup %5127  ;;  %v4934_v45 = vld [vmem:[%s7871_s8 + $0x8] sm:$0xff]   ;;  %v6962_v16 = vld [vmem:[%s7869_s6] ss:$0 sm:$0xff] }
 0x41d   : > { %2866 = vmatmul.mubr.bf16.gmra.mrb[64].mxu0 %v2717_v7  ;;  %v2702_v43 = vmul.f32 %v5128_v19, %v6729_v58  ;;  %v2701_v4 = vmul.f32 %v5128_v19, %v8321_v36  ;;  %4773 = vmatprep.subr.bf16.mxu0 %v4934_v45  ;;  %v4935_v58 = vld [vmem:[%s7871_s8 + $0x10] sm:$0xff]  }
 0x41e   : > { %v2168_v54 = vpack.c.bf16 %v2152_v3, %v2150_v37  ;;  %v2167_v53 = vpack.c.bf16 %v2151_v15, %v2149_v25  ;;  %v4865_v15 = vpop.permute.xlu0 %4864 }
 0x41f   : > { %v5130_v38 = vpop.eup %5129  ;;  %4774 = vmatpush3.bf16.msra.mxu0 %v4934_v45 }
 0x420   : > { %2970 = vmatprep.mubr.bf16.mxu1 %v2168_v54  ;;  %v2704_v14 = vmul.f32 %v5130_v38, %v8320_v18  ;;  %v2703_v32 = vmul.f32 %v5130_v38, %v8322_v13  ;;  %4775 = vmatprep.subr.bf16.mxu0 %v4935_v58 }
 0x422   : > { %2971 = vmatmul.mubr.bf16.gmra.mrb[72].mxu1 %v2167_v53  ;;  %v2720_v12 = vpack.c.bf16 %v2704_v14, %v2702_v43  ;;  %v2719_v61 = vpack.c.bf16 %v2703_v32, %v2701_v4  ;;  %v4867_v14 = vunpack.i.h.bf16 %v4865_v15  ;;  %v4866_v32 = vunpack.i.l.bf16 %v4865_v15 }
 0x423   : > { %4776 = vmatpush3.bf16.msra.mxu0 %v4935_v58 }
 0x424   : > { %2873 = vmatprep.mubr.bf16.mxu0 %v2720_v12  ;;  %4777 = vmatprep.subr.bf16.mxu0 %v4936_v1 }
 0x425   : > { %2874 = vmatmul.mubr.bf16.gmra.mrb[68].mxu0 %v2719_v61 }
 0x427   : > { %4778 = vmatpush3.bf16.msra.mxu0 %v4936_v1 }
 0x48c   : > { %v4607_v57 = vpop.f32.mrb[44].mxu1 }
 0x48d   : > { %v4608_v6 = vpop.f32.mrb[45].mxu1 }
 0x48e   : > { %v4609_v27 = vadd.f32 %v4608_v6, %v4607_v57  ;;  %v4610_v28 = vpop.f32.mrb[46].mxu1 }
 0x48f   : > { %v4611_v31 = vpop.f32.mrb[47].mxu1 }
 0x490   : > { %v4612_v46 = vadd.f32 %v4611_v31, %v4610_v28 }
 0x494   : > { %v4613_v41 = vpop.f32.mrb[48].mxu1 }
 0x495   : > { %v4614_v17 = vpop.f32.mrb[49].mxu1 }
 0x496   : > { %v4615_v56 = vadd.f32 %v4614_v17, %v4613_v41  ;;  %v4616_v33 = vpop.f32.mrb[50].mxu1 }
 0x497   : > { %v4617_v10 = vpop.f32.mrb[51].mxu1 }
 0x498   : > { %v4618_v8 = vadd.f32 %v4617_v10, %v4616_v33  ;;  %v4870_v33 = vpop.permute.xlu1 %4869 }
 0x49d   : > { %v4543_v60 = vpop.f32.mrb[40].mxu0 }
 0x49e   : > { %v4544_v59 = vpop.f32.mrb[41].mxu0 }
 0x49f   : > { %v4545_v55 = vadd.f32 %v4544_v59, %v4543_v60  ;;  %v4546_v42 = vpop.f32.mrb[42].mxu0 }
 0x4a0   : > { %v4547_v11 = vpop.f32.mrb[43].mxu0 }
 0x4a1   : > { %v2917_v39 = vadd.f32 %v4609_v27, %v4545_v55  ;;  %v4548_v7 = vadd.f32 %v4547_v11, %v4546_v42 }
 0x4a3   : > { %v2979_v37 = vmul.f32 0.5, %v2917_v39  ;;  %v2920_v3 = vadd.f32 %v4612_v46, %v4548_v7  ;;  %v4619_v25 = vpop.f32.mrb[52].mxu1  ;;  %v4872_v7 = vunpack.i.h.bf16 %v4870_v33 }
 0x4a4   : > { %v4620_v53 = vpop.f32.mrb[53].mxu1 }
 0x4a5   : > { %v3002_v19 = vadd.f32 %v6962_v16, %v2979_v37  ;;  %v2980_v54 = vmul.f32 0.5, %v2920_v3  ;;  %v4549_v38 = vpop.f32.mrb[44].mxu0  ;;  %v4621_v43 = vadd.f32 %v4620_v53, %v4619_v25  ;;  %v4622_v18 = vpop.f32.mrb[54].mxu1  ;;  %v4871_v25 = vunpack.i.l.bf16 %v4870_v33 }
 0x4a6   : > { %v4550_v36 = vpop.f32.mrb[45].mxu0  ;;  %v4623_v61 = vpop.f32.mrb[55].mxu1 }
 0x4a7   : > { %v3018_v4 = vmax.f32 %v3002_v19, 0.0  ;;  %v3003_v13 = vadd.f32 %v6962_v16, %v2980_v54  ;;  %v4551_v12 = vadd.f32 %v4550_v36, %v4549_v38  ;;  %v4552_v21 = vpop.f32.mrb[46].mxu0  ;;  %v4624_v45 = vadd.f32 %v4623_v61, %v4622_v18 }
 0x4a8   : > { %v4553_v58 = vpop.f32.mrb[47].mxu0 }
 0x4a9   : > { %v3019_v1 = vmax.f32 %v3003_v13, 0.0  ;;  %v2925_v57 = vadd.f32 %v4615_v56, %v4551_v12  ;;  %v4554_v6 = vadd.f32 %v4553_v58, %v4552_v21  ;;  %v3281_v27 = vsel %vm3280_vm1, %v3018_v4, %v4866_v32  ;;  %v4875_v12 = vpop.permute.xlu1 %4874 }
 0x4ab   : > { %v3282_v28 = vsel %vm3280_vm1, %v3019_v1, %v4867_v14  ;;  %v2981_v31 = vmul.f32 0.5, %v2925_v57  ;;  %v2928_v46 = vadd.f32 %v4618_v8, %v4554_v6  ;;  %v4625_v17 = vpop.f32.mrb[56].mxu1  ;;  %v4877_v57 = vunpack.i.h.bf16 %v4875_v12 }
 0x4ac   : > { %v3297_v41 = vpack.c.bf16 %v3282_v28, %v3281_v27  ;;  %v4626_v59 = vpop.f32.mrb[57].mxu1  ;;  %v4876_v28 = vunpack.i.l.bf16 %v4875_v12 }
 0x4ad   : > { %v3004_v10 = vadd.f32 %v6962_v16, %v2981_v31  ;;  %v2982_v60 = vmul.f32 0.5, %v2928_v46  ;;  %v4555_v55 = vpop.f32.mrb[48].mxu0  ;;  %v4627_v42 = vadd.f32 %v4626_v59, %v4625_v17  ;;  %v4628_v11 = vpop.f32.mrb[58].mxu1 }
 0x4ae   : > { %v4556_v39 = vpop.f32.mrb[49].mxu0  ;;  %4779 = vmatprep.mubr.msk.bf16.mxu0 %vm8323_vm7, %v3297_v41  ;;  %v4629_v8 = vpop.f32.mrb[59].mxu1 }
 0x4af   : > { %v3020_v56 = vmax.f32 %v3004_v10, 0.0  ;;  %v3005_v37 = vadd.f32 %v6962_v16, %v2982_v60  ;;  %v4557_v3 = vadd.f32 %v4556_v39, %v4555_v55  ;;  %v4558_v15 = vpop.f32.mrb[50].mxu0  ;;  %v4630_v19 = vadd.f32 %v4629_v8, %v4628_v11  ;;  %v4880_v11 = vpop.permute.xlu0 %4879 }
 0x4b0   : > { %v4559_v54 = vpop.f32.mrb[51].mxu0 }
 0x4b1   : > { %v3021_v53 = vmax.f32 %v3005_v37, 0.0  ;;  %v2933_v38 = vadd.f32 %v4621_v43, %v4557_v3  ;;  %v4560_v18 = vadd.f32 %v4559_v54, %v4558_v15  ;;  %v3283_v36 = vsel %vm3280_vm1, %v3020_v56, %v4871_v25 }
 0x4b2   : > { %v4882_v3 = vunpack.i.h.bf16 %v4880_v11  ;;  %v4881_v25 = vunpack.i.l.bf16 %v4880_v11 }
 0x4b3   : > { %v2983_v14 = vmul.f32 0.5, %v2933_v38  ;;  %v3284_v4 = vsel %vm3280_vm1, %v3021_v53, %v4872_v7  ;;  %v2936_v13 = vadd.f32 %v4624_v45, %v4560_v18 }
 0x4b4   : > { %v3298_v32 = vpack.c.bf16 %v3284_v4, %v3283_v36 }
 0x4b5   : > { %v3006_v61 = vadd.f32 %v6962_v16, %v2983_v14  ;;  %v2984_v21 = vmul.f32 0.5, %v2936_v13  ;;  %v4561_v58 = vpop.f32.mrb[52].mxu0 }
 0x4b6   : > { %v4562_v1 = vpop.f32.mrb[53].mxu0  ;;  %4780 = vmatmul.mubr.msk.bf16.vlgmr.msra.gmra.mrb[72].mxu0 %vm8324_vm9, %v3298_v32 }
 0x4b7   : > { %v3022_v6 = vmax.f32 %v3006_v61, 0.0  ;;  %v3007_v43 = vadd.f32 %v6962_v16, %v2984_v21  ;;  %v4563_v27 = vadd.f32 %v4562_v1, %v4561_v58  ;;  %v4564_v31 = vpop.f32.mrb[54].mxu0 }
 0x4b8   : > { %v4565_v46 = vpop.f32.mrb[55].mxu0 }
 0x4b9   : > { %v3023_v41 = vmax.f32 %v3007_v43, 0.0  ;;  %v2941_v17 = vadd.f32 %v4627_v42, %v4563_v27  ;;  %v4566_v45 = vadd.f32 %v4565_v46, %v4564_v31  ;;  %v3285_v10 = vsel %vm3280_vm1, %v3022_v6, %v4876_v28  ;;  %v4885_v31 = vpop.permute.xlu1 %4884 }
 0x4bb   : > { %v2985_v33 = vmul.f32 0.5, %v2941_v17  ;;  %v3286_v60 = vsel %vm3280_vm1, %v3023_v41, %v4877_v57  ;;  %v2944_v59 = vadd.f32 %v4630_v19, %v4566_v45 }
 0x4bc   : > { %v3299_v55 = vpack.c.bf16 %v3286_v60, %v3285_v10  ;;  %v4887_v60 = vunpack.i.h.bf16 %v4885_v31 }
 0x4bd   : > { %v3008_v39 = vadd.f32 %v6962_v16, %v2985_v33  ;;  %v2986_v7 = vmul.f32 0.5, %v2944_v59 }
 0x4be   : > { %4783 = vmatprep.mubr.msk.bf16.mxu0 %vm8325_vm6, %v3299_v55 }
 0x4bf   : > { %v3024_v56 = vmax.f32 %v3008_v39, 0.0  ;;  %v3009_v37 = vadd.f32 %v6962_v16, %v2986_v7  ;;  %v4886_v39 = vunpack.i.l.bf16 %v4885_v31 }
 0x4c1   : > { %v3025_v42 = vmax.f32 %v3009_v37, 0.0  ;;  %v3287_v8 = vsel %vm3280_vm1, %v3024_v56, %v4881_v25 }
 0x4c3   : > { %v3288_v15 = vsel %vm3280_vm1, %v3025_v42, %v4882_v3 }
 0x4c4   : > { %v3300_v54 = vpack.c.bf16 %v3288_v15, %v3287_v8 }
 0x4c6   : > { %4784 = vmatmul.mubr.msk.bf16.gmra.mrb[76].mxu0 %vm8326_vm2, %v3300_v54 }
 0x4dd   : > { %v4631_v19 = vpop.f32.mrb[60].mxu1 }
 0x4de   : > { %v4632_v53 = vpop.f32.mrb[61].mxu1 }
 0x4df   : > { %v4633_v38 = vadd.f32 %v4632_v53, %v4631_v19  ;;  %v4634_v18 = vpop.f32.mrb[62].mxu1 }
 0x4e0   : > { %v4635_v14 = vpop.f32.mrb[63].mxu1  ;;  %v4567_v36 = vpop.f32.mrb[56].mxu0 }
 0x4e1   : > { %v4636_v4 = vadd.f32 %v4635_v14, %v4634_v18  ;;  %v4568_v13 = vpop.f32.mrb[57].mxu0 }
 0x4e2   : > { %v4569_v32 = vadd.f32 %v4568_v13, %v4567_v36  ;;  %v4570_v12 = vpop.f32.mrb[58].mxu0  ;;  %v4890_v36 = vpop.permute.xlu0 %4889 }
 0x4e3   : > { %v4571_v61 = vpop.f32.mrb[59].mxu0 }
 0x4e4   : > { %v2949_v21 = vadd.f32 %v4633_v38, %v4569_v32  ;;  %v4572_v58 = vadd.f32 %v4571_v61, %v4570_v12 }
 0x4e5   : > { %v4637_v1 = vpop.f32.mrb[64].mxu1 }
 0x4e6   : > { %v2987_v57 = vmul.f32 0.5, %v2949_v21  ;;  %v2952_v6 = vadd.f32 %v4636_v4, %v4572_v58  ;;  %v4638_v43 = vpop.f32.mrb[65].mxu1  ;;  %v4892_v21 = vunpack.i.h.bf16 %v4890_v36 }
 0x4e7   : > { %v4639_v27 = vadd.f32 %v4638_v43, %v4637_v1  ;;  %v4640_v28 = vpop.f32.mrb[66].mxu1 }
 0x4e8   : > { %v3010_v46 = vadd.f32 %v6962_v16, %v2987_v57  ;;  %v2988_v41 = vmul.f32 0.5, %v2952_v6  ;;  %v4641_v17 = vpop.f32.mrb[67].mxu1  ;;  %v4573_v45 = vpop.f32.mrb[60].mxu0  ;;  %v4891_v6 = vunpack.i.l.bf16 %v4890_v36 }
 0x4e9   : > { %v4642_v33 = vadd.f32 %v4641_v17, %v4640_v28  ;;  %v4574_v10 = vpop.f32.mrb[61].mxu0 }
 0x4ea   : > { %v3026_v59 = vmax.f32 %v3010_v46, 0.0  ;;  %v3011_v55 = vadd.f32 %v6962_v16, %v2988_v41  ;;  %v4575_v11 = vadd.f32 %v4574_v10, %v4573_v45  ;;  %v4576_v7 = vpop.f32.mrb[62].mxu0 }
 0x4eb   : > { %v4577_v56 = vpop.f32.mrb[63].mxu0 }
 0x4ec   : > { %v3027_v37 = vmax.f32 %v3011_v55, 0.0  ;;  %v2957_v3 = vadd.f32 %v4639_v27, %v4575_v11  ;;  %v4578_v25 = vadd.f32 %v4577_v56, %v4576_v7  ;;  %v3289_v15 = vsel %vm3280_vm1, %v3026_v59, %v4886_v39  ;;  %v4895_v7 = vpop.permute.xlu1 %4894 }
 0x4ed   : > { %v4643_v42 = vpop.f32.mrb[68].mxu1 }
 0x4ee   : > { %v2989_v8 = vmul.f32 0.5, %v2957_v3  ;;  %v3290_v54 = vsel %vm3280_vm1, %v3027_v37, %v4887_v60  ;;  %v2960_v19 = vadd.f32 %v4642_v33, %v4578_v25  ;;  %v4644_v53 = vpop.f32.mrb[69].mxu1 }
 0x4ef   : > { %v3301_v38 = vpack.c.bf16 %v3290_v54, %v3289_v15  ;;  %v4645_v18 = vadd.f32 %v4644_v53, %v4643_v42  ;;  %v4646_v14 = vpop.f32.mrb[70].mxu1  ;;  %v4897_v15 = vunpack.i.h.bf16 %v4895_v7 }
 0x4f0   : > { %v3012_v4 = vadd.f32 %v6962_v16, %v2989_v8  ;;  %v2990_v13 = vmul.f32 0.5, %v2960_v19  ;;  %v4647_v32 = vpop.f32.mrb[71].mxu1  ;;  %v4579_v12 = vpop.f32.mrb[64].mxu0 }
 0x4f1   : > { %v4648_v61 = vadd.f32 %v4647_v32, %v4646_v14  ;;  %v4580_v58 = vpop.f32.mrb[65].mxu0  ;;  %4787 = vmatprep.mubr.msk.bf16.mxu0 %vm8327_vm4, %v3301_v38  ;;  %v4896_v38 = vunpack.i.l.bf16 %v4895_v7 }
 0x4f2   : > { %v3028_v1 = vmax.f32 %v3012_v4, 0.0  ;;  %v3013_v57 = vadd.f32 %v6962_v16, %v2990_v13  ;;  %v4581_v43 = vadd.f32 %v4580_v58, %v4579_v12  ;;  %v4582_v27 = vpop.f32.mrb[66].mxu0 }
 0x4f3   : > { %v4583_v28 = vpop.f32.mrb[67].mxu0 }
 0x4f4   : > { %v3029_v31 = vmax.f32 %v3013_v57, 0.0  ;;  %v2965_v46 = vadd.f32 %v4645_v18, %v4581_v43  ;;  %v4584_v41 = vadd.f32 %v4583_v28, %v4582_v27  ;;  %v3291_v45 = vsel %vm3280_vm1, %v3028_v1, %v4891_v6  ;;  %v4900_v1 = vpop.permute.xlu0 %4899 }
 0x4f5   : > { %v4649_v17 = vpop.f32.mrb[72].mxu1  ;;  %v4902_v28 = vunpack.i.h.bf16 %v4900_v1 }
 0x4f6   : > { %v3292_v33 = vsel %vm3280_vm1, %v3029_v31, %v4892_v21  ;;  %v2991_v10 = vmul.f32 0.5, %v2965_v46  ;;  %v2968_v60 = vadd.f32 %v4648_v61, %v4584_v41  ;;  %v4650_v59 = vpop.f32.mrb[73].mxu1  ;;  %v4901_v31 = vunpack.i.l.bf16 %v4900_v1 }
 0x4f7   : > { %v3302_v55 = vpack.c.bf16 %v3292_v33, %v3291_v45  ;;  %v4651_v11 = vadd.f32 %v4650_v59, %v4649_v17  ;;  %v4652_v39 = vpop.f32.mrb[74].mxu1  ;;  %v7007_v33 = vld [vmem:[%s7872_s9] ss:$0 sm:$0xff] }
 0x4f8   : > { %v3014_v56 = vadd.f32 %v6962_v16, %v2991_v10  ;;  %v2992_v37 = vmul.f32 0.5, %v2968_v60  ;;  %v4653_v3 = vpop.f32.mrb[75].mxu1  ;;  %v4585_v25 = vpop.f32.mrb[68].mxu0 }
 0x4f9   : > { %v4654_v42 = vadd.f32 %v4653_v3, %v4652_v39  ;;  %v4586_v8 = vpop.f32.mrb[69].mxu0  ;;  %4788 = vmatmul.mubr.msk.bf16.gmra.mrb[80].mxu0 %vm8328_vm8, %v3302_v55 }
 0x4fa   : > { %v3030_v54 = vmax.f32 %v3014_v56, 0.0  ;;  %v3015_v19 = vadd.f32 %v6962_v16, %v2992_v37  ;;  %v4587_v53 = vadd.f32 %v4586_v8, %v4585_v25  ;;  %v4588_v18 = vpop.f32.mrb[70].mxu0 }
 0x4fb   : > { %v4589_v14 = vpop.f32.mrb[71].mxu0 }
 0x4fc   : > { %v3031_v36 = vmax.f32 %v3015_v19, 0.0  ;;  %v2973_v4 = vadd.f32 %v4651_v11, %v4587_v53  ;;  %v4590_v13 = vadd.f32 %v4589_v14, %v4588_v18  ;;  %v3293_v12 = vsel %vm3280_vm1, %v3030_v54, %v4896_v38 }
 0x4fe   : > { %v2993_v32 = vmul.f32 0.5, %v2973_v4  ;;  %v3294_v61 = vsel %vm3280_vm1, %v3031_v36, %v4897_v15  ;;  %v2976_v21 = vadd.f32 %v4654_v42, %v4590_v13 }
 0x4ff   : > { %v3303_v58 = vpack.c.bf16 %v3294_v61, %v3293_v12 }
 0x500   : > { %v3016_v57 = vadd.f32 %v6962_v16, %v2993_v32  ;;  %v2994_v6 = vmul.f32 0.5, %v2976_v21 }
 0x501   : > { %4791 = vmatprep.mubr.msk.bf16.mxu0 %vm8329_vm10, %v3303_v58 }
 0x502   : > { %v3032_v43 = vmax.f32 %v3016_v57, 0.0  ;;  %v3017_v27 = vadd.f32 %v6962_v16, %v2994_v6 }
 0x504   : > { %v3033_v46 = vmax.f32 %v3017_v27, 0.0  ;;  %v3295_v41 = vsel %vm3280_vm1, %v3032_v43, %v4901_v31 }
 0x506   : > { %v3296_v17 = vsel %vm3280_vm1, %v3033_v46, %v4902_v28 }
 0x507   : > { %v3304_v45 = vpack.c.bf16 %v3296_v17, %v3295_v41 }
 0x509   : > { %4792 = vmatmul.mubr.msk.bf16.gmra.mrb[84].mxu0 %vm8330_vm5, %v3304_v45 }
 0x589   : > { %v4781_v10 = vpop.f32.mrb[72].mxu0 }
 0x58a   : > { %v3402_v60 = vpop.f32.mrb[73].mxu0  ;;  %v7016_v39 = vadd.f32 %v4781_v10, %v7007_v33 }
 0x58b   : > { %v7010_v59 = vadd.f32 %v7007_v33, %v3402_v60  ;;  %v4782_v16 = vpop.f32.mrb[74].mxu0 }
 0x58c   : > { %v7013_v55 = vadd.f32 %v4782_v16, %v7007_v33  ;;  %v3405_v11 = vpop.f32.mrb[75].mxu0  ;;  %v3467_v42 = vmax.f32 %v7016_v39, 0.0 }
 0x58d   : > { %v3465_v7 = vmax.f32 %v7010_v59, 0.0  ;;  %v7020_v56 = vadd.f32 %v7007_v33, %v3405_v11 }
 0x58e   : > { %v3468_v37 = vmax.f32 %v7013_v55, 0.0  ;;  %v3487_v54 = vsel %vm3280_vm1, %v3467_v42, 0.0 }
 0x58f   : > { %v3466_v3 = vmax.f32 %v7020_v56, 0.0  ;;  %v3481_v25 = vsel %vm3280_vm1, %v3465_v7, 0.0 }
 0x590   : > { %3482 = vadd.xlane.f32.xlu1 %v3481_v25  ;;  %v3490_v15 = vsel %vm3280_vm1, %v3468_v37, 0.0 }
 0x591   : > { %v3484_v8 = vsel %vm3280_vm1, %v3466_v3, 0.0 }
 0x592   : > { %3485 = vadd.xlane.f32.xlu0 %v3484_v8 }
 0x594   : > { %3491 = vadd.xlane.f32.xlu1 %v3490_v15 }
 0x596   : > { %3488 = vadd.xlane.f32.xlu0 %v3487_v54 }
 0x599   : > { %v4785_v19 = vpop.f32.mrb[76].mxu0 }
 0x59a   : > { %v3418_v53 = vpop.f32.mrb[77].mxu0  ;;  %v7038_v38 = vadd.f32 %v4785_v19, %v7007_v33 }
 0x59b   : > { %v7041_v18 = vadd.f32 %v7007_v33, %v3418_v53  ;;  %v4786_v14 = vpop.f32.mrb[78].mxu0 }
 0x59c   : > { %v3421_v36 = vpop.f32.mrb[79].mxu0  ;;  %v7045_v13 = vadd.f32 %v4786_v14, %v7007_v33  ;;  %v3471_v12 = vmax.f32 %v7038_v38, 0.0 }
 0x59d   : > { %v3469_v4 = vmax.f32 %v7041_v18, 0.0  ;;  %v7048_v32 = vadd.f32 %v7007_v33, %v3421_v36 }
 0x59e   : > { %v3472_v58 = vmax.f32 %v7045_v13, 0.0  ;;  %v3499_v57 = vsel %vm3280_vm1, %v3471_v12, 0.0  ;;  %v4937_v13 = vld [vmem:[%s7875_s12] sm:$0xff]  }
 0x59f   : > { %v3470_v61 = vmax.f32 %v7048_v32, 0.0  ;;  %v3493_v21 = vsel %vm3280_vm1, %v3469_v4, 0.0  ;;  %4795 = vmatprep.subr.bf16.mxu0 %v4937_v13 }
 0x5a0   : > { %3494 = vadd.xlane.f32.xlu0 %v3493_v21  ;;  %v3502_v6 = vsel %vm3280_vm1, %v3472_v58, 0.0  ;;  %4796 = vmatpush3.bf16.msra.mxu0 %v4937_v13 }
 0x5a1   : > { %v3496_v1 = vsel %vm3280_vm1, %v3470_v61, 0.0 }
 0x5a2   : > { %3497 = vadd.xlane.f32.xlu1 %v3496_v1 }
 0x5a4   : > { %3500 = vadd.xlane.f32.xlu0 %v3499_v57 }
 0x5a6   : > { %3503 = vadd.xlane.f32.xlu1 %v3502_v6 }
 0x5cc   : > { %v4789_v43 = vpop.f32.mrb[80].mxu0 }
 0x5cd   : > { %v3434_v27 = vpop.f32.mrb[81].mxu0  ;;  %v7066_v28 = vadd.f32 %v4789_v43, %v7007_v33 }
 0x5ce   : > { %v7069_v31 = vadd.f32 %v7007_v33, %v3434_v27  ;;  %v4790_v46 = vpop.f32.mrb[82].mxu0 }
 0x5cf   : > { %v3437_v41 = vpop.f32.mrb[83].mxu0  ;;  %v7073_v45 = vadd.f32 %v4790_v46, %v7007_v33  ;;  %v3475_v60 = vmax.f32 %v7066_v28, 0.0 }
 0x5d0   : > { %v3473_v17 = vmax.f32 %v7069_v31, 0.0  ;;  %v7076_v10 = vadd.f32 %v7007_v33, %v3437_v41 }
 0x5d1   : > { %v3476_v25 = vmax.f32 %v7073_v45, 0.0  ;;  %v3511_v15 = vsel %vm3280_vm1, %v3475_v60, 0.0 }
 0x5d2   : > { %v3474_v16 = vmax.f32 %v7076_v10, 0.0  ;;  %v3505_v11 = vsel %vm3280_vm1, %v3473_v17, 0.0 }
 0x5d3   : > { %3506 = vadd.xlane.f32.xlu0 %v3505_v11  ;;  %v3514_v54 = vsel %vm3280_vm1, %v3476_v25, 0.0 }
 0x5d4   : > { %v3508_v8 = vsel %vm3280_vm1, %v3474_v16, 0.0 }
 0x5d5   : > { %3509 = vadd.xlane.f32.xlu1 %v3508_v8 }
 0x5d7   : > { %3512 = vadd.xlane.f32.xlu0 %v3511_v15 }
 0x5d9   : > { %3515 = vadd.xlane.f32.xlu1 %v3514_v54 }
 0x5dc   : > { %v4793_v19 = vpop.f32.mrb[84].mxu0 }
 0x5dd   : > { %v3450_v53 = vpop.f32.mrb[85].mxu0  ;;  %v7094_v14 = vadd.f32 %v4793_v19, %v7007_v33 }
 0x5de   : > { %v7097_v36 = vadd.f32 %v7007_v33, %v3450_v53  ;;  %v4794_v21 = vpop.f32.mrb[86].mxu0 }
 0x5df   : > { %v3453_v1 = vpop.f32.mrb[87].mxu0  ;;  %v7101_v6 = vadd.f32 %v4794_v21, %v7007_v33  ;;  %v8059_v27 = vmax.f32 %v7094_v14, 0.0 }
 0x5e0   : > { %v3477_v57 = vmax.f32 %v7097_v36, 0.0  ;;  %v7104_v43 = vadd.f32 %v7007_v33, %v3453_v1 }
 0x5e1   : > { %v3480_v11 = vmax.f32 %v7101_v6, 0.0  ;;  %v3523_v33 = vsel %vm3280_vm1, %v8059_v27, 0.0  ;;  %v8333_v6 = vld [vmem:[#allocation11_spill] sm:$0xff] }
 0x5e2   : > { %v8060_v46 = vmax.f32 %v7104_v43, 0.0  ;;  %v3517_v41 = vsel %vm3280_vm1, %v3477_v57, 0.0 }
 0x5e3   : > { %3518 = vadd.xlane.f32.xlu0 %v3517_v41  ;;  %v3526_v15 = vsel %vm3280_vm1, %v3480_v11, 0.0 }
 0x5e4   : > { %v3520_v8 = vsel %vm3280_vm1, %v8060_v46, 0.0 }
 0x5e5   : > { %3521 = vadd.xlane.f32.xlu1 %v3520_v8 }
 0x5e7   : > { %3524 = vadd.xlane.f32.xlu0 %v3523_v33 }
 0x5e9   : > { %3527 = vadd.xlane.f32.xlu1 %v3526_v15 }
 0x61d   : > { %v3483_v54 = vpop.xlane.xlu1 %3482 }
 0x61e   : > { %v3530_v19 = vmul.f32 0.03125, %v3483_v54 }
 0x61f   : > { %v3486_v53 = vpop.xlane.xlu0 %3485 }
 0x620   : > { %v7123_v21 = vsub.f32 %v3465_v7, %v3530_v19  ;;  %v3531_v1 = vmul.f32 0.03125, %v3486_v53 }
 0x621   : > { %v3492_v41 = vpop.xlane.xlu1 %3491 }
 0x622   : > { %v7127_v8 = vsub.f32 %v3466_v3, %v3531_v1  ;;  %v3533_v27 = vmul.f32 0.03125, %v3492_v41  ;;  %v3562_v33 = vmul.f32 %v7123_v21, %v7123_v21 }
 0x623   : > { %v3489_v46 = vpop.xlane.xlu0 %3488 }
 0x624   : > { %v7133_v15 = vsub.f32 %v3468_v37, %v3533_v27  ;;  %v3532_v54 = vmul.f32 0.03125, %v3489_v46  ;;  %v3578_v59 = vsel %vm3280_vm1, %v3562_v33, 0.0  ;;  %v3563_v7 = vmul.f32 %v7127_v8, %v7127_v8 }
 0x625   : > { %3579 = vadd.xlane.f32.xlu0 %v3578_v59 }
 0x626   : > { %v7140_v56 = vsub.f32 %v3467_v42, %v3532_v54  ;;  %v3581_v3 = vsel %vm3280_vm1, %v3563_v7, 0.0  ;;  %v3565_v19 = vmul.f32 %v7133_v15, %v7133_v15 }
 0x627   : > { %3582 = vadd.xlane.f32.xlu1 %v3581_v3 }
 0x628   : > { %v3564_v55 = vmul.f32 %v7140_v56, %v7140_v56  ;;  %v3587_v27 = vsel %vm3280_vm1, %v3565_v19, 0.0 }
 0x62a   : > { %v3584_v37 = vsel %vm3280_vm1, %v3564_v55, 0.0 }
 0x62b   : > { %3585 = vadd.xlane.f32.xlu0 %v3584_v37  ;;  %3588 = vadd.xlane.f32.xlu1 %v3587_v27 }
 0x62d   : > { %v3495_v46 = vpop.xlane.xlu0 %3494 }
 0x62e   : > { %v3534_v53 = vmul.f32 0.03125, %v3495_v46 }
 0x62f   : > { %v3498_v39 = vpop.xlane.xlu1 %3497 }
 0x630   : > { %v7151_v42 = vsub.f32 %v3469_v4, %v3534_v53  ;;  %v3535_v1 = vmul.f32 0.03125, %v3498_v39 }
 0x631   : > { %v3501_v41 = vpop.xlane.xlu0 %3500 }
 0x632   : > { %v7155_v33 = vsub.f32 %v3470_v61, %v3535_v1  ;;  %v3536_v54 = vmul.f32 0.03125, %v3501_v41  ;;  %v3566_v59 = vmul.f32 %v7151_v42, %v7151_v42 }
 0x633   : > { %v3504_v7 = vpop.xlane.xlu1 %3503 }
 0x634   : > { %v7161_v3 = vsub.f32 %v3471_v12, %v3536_v54  ;;  %v3537_v19 = vmul.f32 0.03125, %v3504_v7  ;;  %v3590_v18 = vsel %vm3280_vm1, %v3566_v59, 0.0  ;;  %v3567_v4 = vmul.f32 %v7155_v33, %v7155_v33 }
 0x635   : > { %3591 = vadd.xlane.f32.xlu0 %v3590_v18 }
 0x636   : > { %v7168_v32 = vsub.f32 %v3472_v58, %v3537_v19  ;;  %v3593_v61 = vsel %vm3280_vm1, %v3567_v4, 0.0  ;;  %v3568_v55 = vmul.f32 %v7161_v3, %v7161_v3  ;;  %v4938_v58 = vld [vmem:[%s7875_s12 + $0x8] sm:$0xff]  }
 0x637   : > { %3594 = vadd.xlane.f32.xlu1 %v3593_v61  ;;  %4797 = vmatprep.subr.bf16.mxu0 %v4938_v58 }
 0x638   : > { %v3596_v38 = vsel %vm3280_vm1, %v3568_v55, 0.0  ;;  %v3569_v12 = vmul.f32 %v7168_v32, %v7168_v32  ;;  %4798 = vmatpush3.bf16.msra.mxu0 %v4938_v58  ;;  %v8331_v58 = vmax.f32 %v7104_v43, 0.0 }
 0x639   : > { %3597 = vadd.xlane.f32.xlu0 %v3596_v38 }
 0x63a   : > { %v3599_v37 = vsel %vm3280_vm1, %v3569_v12, 0.0 }
 0x63b   : > { %3600 = vadd.xlane.f32.xlu1 %v3599_v37 }
 0x660   : > { %v3507_v27 = vpop.xlane.xlu0 %3506 }
 0x661   : > { %v3538_v46 = vmul.f32 0.03125, %v3507_v27 }
 0x662   : > { %v3510_v53 = vpop.xlane.xlu1 %3509 }
 0x663   : > { %v7185_v39 = vsub.f32 %v3473_v17, %v3538_v46  ;;  %v3539_v1 = vmul.f32 0.03125, %v3510_v53 }
 0x664   : > { %v3513_v41 = vpop.xlane.xlu0 %3512 }
 0x665   : > { %v7189_v54 = vsub.f32 %v3474_v16, %v3539_v1  ;;  %v3540_v59 = vmul.f32 0.03125, %v3513_v41  ;;  %v3570_v7 = vmul.f32 %v7185_v39, %v7185_v39  ;;  %v8332_v41 = vmax.f32 %v7094_v14, 0.0 }
 0x666   : > { %v3516_v19 = vpop.xlane.xlu1 %3515 }
 0x667   : > { %v7195_v18 = vsub.f32 %v3475_v60, %v3540_v59  ;;  %v3541_v4 = vmul.f32 0.03125, %v3516_v19  ;;  %v3602_v31 = vsel %vm3280_vm1, %v3570_v7, 0.0  ;;  %v3571_v17 = vmul.f32 %v7189_v54, %v7189_v54 }
 0x668   : > { %3603 = vadd.xlane.f32.xlu0 %v3602_v31 }
 0x669   : > { %v7202_v10 = vsub.f32 %v3476_v25, %v3541_v4  ;;  %v3605_v16 = vsel %vm3280_vm1, %v3571_v17, 0.0  ;;  %v3572_v61 = vmul.f32 %v7195_v18, %v7195_v18 }
 0x66a   : > { %3606 = vadd.xlane.f32.xlu1 %v3605_v16  ;;  %v8335_v16 = vld [vmem:[#allocation5_spill] sm:$0xff] }
 0x66b   : > { %v3608_v28 = vsel %vm3280_vm1, %v3572_v61, 0.0  ;;  %v3573_v60 = vmul.f32 %v7202_v10, %v7202_v10  ;;  %v8336_v61 = vld [vmem:[#allocation8_spill] sm:$0xff] }
 0x66c   : > { %3609 = vadd.xlane.f32.xlu0 %v3608_v28  ;;  %v8337_v28 = vld [vmem:[#allocation15_spill] sm:$0xff] }
 0x66d   : > { %v3611_v55 = vsel %vm3280_vm1, %v3573_v60, 0.0  ;;  %v8338_v60 = vld [vmem:[#allocation18_spill] sm:$0xff] }
 0x66e   : > { %3612 = vadd.xlane.f32.xlu1 %v3611_v55  ;;  %v8339_v55 = vld [vmem:[#allocation13_spill] sm:$0xff] }
 0x670   : > { %v3519_v38 = vpop.xlane.xlu0 %3518 }
 0x671   : > { %v3542_v12 = vmul.f32 0.03125, %v3519_v38  ;;  %v8340_v38 = vld [vmem:[#allocation16_spill] sm:$0xff] }
 0x672   : > { %v3522_v45 = vpop.xlane.xlu1 %3521 }
 0x673   : > { %v7213_v25 = vsub.f32 %v3477_v57, %v3542_v12  ;;  %v3543_v37 = vmul.f32 0.03125, %v3522_v45  ;;  %v8341_v12 = vld [vmem:[#allocation25_spill] sm:$0xff]  ;;  %v8342_v45 = vld [vmem:[#allocation27_spill] sm:$0xff] }
 0x674   : > { %v3525_v13 = vpop.xlane.xlu0 %3524 }
 0x675   : > { %v7217_v27 = vsub.f32 %v8331_v58, %v3543_v37  ;;  %v3544_v46 = vmul.f32 0.03125, %v3525_v13  ;;  %v3574_v53 = vmul.f32 %v7213_v25, %v7213_v25  ;;  %v8343_v37 = vld [vmem:[#allocation23_spill] sm:$0xff]  ;;  %v8344_v13 = vld [vmem:[#allocation26_spill] sm:$0xff] }
 0x676   : > { %v3528_v1 = vpop.xlane.xlu1 %3527 }
 0x677   : > { %v7223_v59 = vsub.f32 %v8332_v41, %v3544_v46  ;;  %v3545_v7 = vmul.f32 0.03125, %v3528_v1  ;;  %v3614_v36 = vsel %vm3280_vm1, %v3574_v53, 0.0  ;;  %v3575_v57 = vmul.f32 %v7217_v27, %v7217_v27 }
 0x678   : > { %3615 = vadd.xlane.f32.xlu0 %v3614_v36 }
 0x679   : > { %v7230_v43 = vsub.f32 %v3480_v11, %v3545_v7  ;;  %v3617_v19 = vsel %vm3280_vm1, %v3575_v57, 0.0  ;;  %v3576_v4 = vmul.f32 %v7223_v59, %v7223_v59  ;;  %v8334_v11 = vld [vmem:[#allocation6_spill] sm:$0xff] }
 0x67a   : > { %3618 = vadd.xlane.f32.xlu1 %v3617_v19 }
 0x67b   : > { %v3620_v14 = vsel %vm3280_vm1, %v3576_v4, 0.0  ;;  %v3577_v31 = vmul.f32 %v7230_v43, %v7230_v43 }
 0x67c   : > { %3621 = vadd.xlane.f32.xlu0 %v3620_v14 }
 0x67d   : > { %v3623_v17 = vsel %vm3280_vm1, %v3577_v31, 0.0 }
 0x67e   : > { %3624 = vadd.xlane.f32.xlu1 %v3623_v17 }
 0x68f   : > { %3052 = vrot.lane.b32.xlu1 %v8333_v6, %s5207_s21  ;;  %v7266_v6 = vld [vmem:[%s7873_s10] ss:$0 sm:$0xff] }
 0x692   : > { %3050 = vrot.lane.b32.xlu0 %v8334_v11, %s5207_s21 }
 0x693   : > { %3054 = vrot.lane.b32.xlu1 %v8335_v16, %s5207_s21 }
 0x696   : > { %3056 = vrot.lane.b32.xlu0 %v8336_v61, %s5207_s21 }
 0x697   : > { %3058 = vrot.lane.b32.xlu1 %v8337_v28, %s5207_s21 }
 0x69a   : > { %3060 = vrot.lane.b32.xlu0 %v8338_v60, %s5207_s21 }
 0x69b   : > { %3062 = vrot.lane.b32.xlu1 %v8339_v55, %s5207_s21 }
 0x69e   : > { %3064 = vrot.lane.b32.xlu0 %v8340_v38, %s5207_s21 }
 0x69f   : > { %3066 = vrot.lane.b32.xlu1 %v8341_v12, %s5207_s21  ;;  %v7274_v12 = vld [vmem:[%s7874_s11] ss:$0 sm:$0xff] }
 0x6a2   : > { %3068 = vrot.lane.b32.xlu0 %v8342_v45, %s5207_s21 }
 0x6a3   : > { %3070 = vrot.lane.b32.xlu1 %v8343_v37, %s5207_s21 }
 0x6a6   : > { %3072 = vrot.lane.b32.xlu0 %v8344_v13, %s5207_s21 }
 0x6b2   : > { %v3580_v58 = vpop.xlane.xlu0 %3579 }
 0x6b3   : > { %v3626_v46 = vmul.f32 0.03125, %v3580_v58 }
 0x6b4   : > { %v3583_v53 = vpop.xlane.xlu1 %3582 }
 0x6b5   : > { %v3642_v1 = vadd.f32 1e-05, %v3626_v46  ;;  %v3627_v41 = vmul.f32 0.03125, %v3583_v53 }
 0x6b7   : > { %5131 = vrsqrt.f32 %v3642_v1  ;;  %v3643_v7 = vadd.f32 1e-05, %v3627_v41 }
 0x6b8   : > { %v3586_v36 = vpop.xlane.xlu0 %3585  ;;  %v3589_v57 = vpop.xlane.xlu1 %3588 }
 0x6b9   : > { %5133 = vrsqrt.f32 %v3643_v7  ;;  %v3628_v19 = vmul.f32 0.03125, %v3586_v36  ;;  %v3629_v4 = vmul.f32 0.03125, %v3589_v57 }
 0x6bb   : > { %v3644_v14 = vadd.f32 1e-05, %v3628_v19  ;;  %v3645_v31 = vadd.f32 1e-05, %v3629_v4 }
 0x6bd   : > { %5135 = vrsqrt.f32 %v3644_v14 }
 0x6be   : > { %5137 = vrsqrt.f32 %v3645_v31 }
 0x6c1   : > { %v5132_v17 = vpop.eup %5131 }
 0x6c2   : > { %v3674_v11 = vmul.f32 %v5132_v17, %v7123_v21  ;;  %v3592_v16 = vpop.xlane.xlu0 %3591 }
 0x6c3   : > { %v5134_v61 = vpop.eup %5133  ;;  %v3630_v28 = vmul.f32 0.03125, %v3592_v16 }
 0x6c4   : > { %v3675_v60 = vmul.f32 %v5134_v61, %v7127_v8  ;;  %v3595_v55 = vpop.xlane.xlu1 %3594  ;;  %v3697_v38 = vmul.f32 %v7266_v6, %v3674_v11 }
 0x6c5   : > { %v3646_v45 = vadd.f32 1e-05, %v3630_v28  ;;  %v3631_v37 = vmul.f32 0.03125, %v3595_v55 }
 0x6c6   : > { %v3598_v13 = vpop.xlane.xlu0 %3597  ;;  %v3698_v58 = vmul.f32 %v7266_v6, %v3675_v60  ;;  %v3720_v7 = vadd.f32 %v7274_v12, %v3697_v38 }
 0x6c7   : > { %v5136_v46 = vpop.eup %5135  ;;  %5139 = vrsqrt.f32 %v3646_v45  ;;  %v3647_v21 = vadd.f32 1e-05, %v3631_v37  ;;  %v3632_v53 = vmul.f32 0.03125, %v3598_v13 }
 0x6c8   : > { %v5138_v1 = vpop.eup %5137  ;;  %v3676_v8 = vmul.f32 %v5136_v46, %v7140_v56  ;;  %v3601_v41 = vpop.xlane.xlu1 %3600  ;;  %v3721_v36 = vadd.f32 %v7274_v12, %v3698_v58 }
 0x6c9   : > { %v3677_v57 = vmul.f32 %v5138_v1, %v7133_v15  ;;  %5141 = vrsqrt.f32 %v3647_v21  ;;  %v3648_v19 = vadd.f32 1e-05, %v3632_v53  ;;  %v3633_v4 = vmul.f32 0.03125, %v3601_v41 }
 0x6ca   : > { %v3699_v14 = vmul.f32 %v7266_v6, %v3676_v8  ;;  %v3736_v31 = vpack.c.bf16 %v3721_v36, %v3720_v7 }
 0x6cb   : > { %v3700_v17 = vmul.f32 %v7266_v6, %v3677_v57  ;;  %5143 = vrsqrt.f32 %v3648_v19  ;;  %v3649_v11 = vadd.f32 1e-05, %v3633_v4 }
 0x6cc   : > { %v3722_v16 = vadd.f32 %v7274_v12, %v3699_v14  ;;  %4799 = vmatprep.mubr.msk.bf16.mxu0 %vm3280_vm1, %v3736_v31 }
 0x6cd   : > { %v3723_v56 = vadd.f32 %v7274_v12, %v3700_v17  ;;  %5145 = vrsqrt.f32 %v3649_v11 }
 0x6cf   : > { %v3737_v61 = vpack.c.bf16 %v3723_v56, %v3722_v16 }
 0x6d1   : > { %v5140_v28 = vpop.eup %5139  ;;  %4800 = vmatmul.mubr.msk.bf16.vlgmr.msra.gmra.mrb[88].mxu0 %vm3280_vm1, %v3737_v61 }
 0x6d2   : > { %v3678_v15 = vmul.f32 %v5140_v28, %v7151_v42 }
 0x6d3   : > { %v5142_v60 = vpop.eup %5141 }
 0x6d4   : > { %v3679_v55 = vmul.f32 %v5142_v60, %v7155_v33  ;;  %v3701_v38 = vmul.f32 %v7266_v6, %v3678_v15 }
 0x6d5   : > { %v5144_v45 = vpop.eup %5143 }
 0x6d6   : > { %v3680_v37 = vmul.f32 %v5144_v45, %v7161_v3  ;;  %v3702_v13 = vmul.f32 %v7266_v6, %v3679_v55  ;;  %v3724_v21 = vadd.f32 %v7274_v12, %v3701_v38 }
 0x6d7   : > { %v5146_v58 = vpop.eup %5145 }
 0x6d8   : > { %v3681_v46 = vmul.f32 %v5146_v58, %v7168_v32  ;;  %v3725_v53 = vadd.f32 %v7274_v12, %v3702_v13  ;;  %v3703_v1 = vmul.f32 %v7266_v6, %v3680_v37 }
 0x6da   : > { %v3738_v42 = vpack.c.bf16 %v3725_v53, %v3724_v21  ;;  %v3704_v8 = vmul.f32 %v7266_v6, %v3681_v46  ;;  %v3726_v33 = vadd.f32 %v7274_v12, %v3703_v1 }
 0x6dc   : > { %4803 = vmatprep.mubr.msk.bf16.mxu0 %vm3280_vm1, %v3738_v42  ;;  %v3727_v3 = vadd.f32 %v7274_v12, %v3704_v8 }
 0x6de   : > { %v3739_v41 = vpack.c.bf16 %v3727_v3, %v3726_v33 }
 0x6e0   : > { %4804 = vmatmul.mubr.msk.bf16.gmra.mrb[92].mxu0 %vm3280_vm1, %v3739_v41 }
 0x6f5   : > { %v3604_v7 = vpop.xlane.xlu0 %3603 }
 0x6f6   : > { %v3634_v32 = vmul.f32 0.03125, %v3604_v7 }
 0x6f7   : > { %v3607_v36 = vpop.xlane.xlu1 %3606 }
 0x6f8   : > { %v3650_v57 = vadd.f32 1e-05, %v3634_v32  ;;  %v3635_v19 = vmul.f32 0.03125, %v3607_v36 }
 0x6f9   : > { %v3610_v4 = vpop.xlane.xlu0 %3609 }
 0x6fa   : > { %5147 = vrsqrt.f32 %v3650_v57  ;;  %v3651_v14 = vadd.f32 1e-05, %v3635_v19  ;;  %v3636_v31 = vmul.f32 0.03125, %v3610_v4 }
 0x6fb   : > { %v3613_v17 = vpop.xlane.xlu1 %3612 }
 0x6fc   : > { %5149 = vrsqrt.f32 %v3651_v14  ;;  %v3652_v11 = vadd.f32 1e-05, %v3636_v31  ;;  %v3637_v16 = vmul.f32 0.03125, %v3613_v17  ;;  %v8346_v31 = vld [vmem:[#allocation84_spill] sm:$0xff] }
 0x6fe   : > { %5151 = vrsqrt.f32 %v3652_v11  ;;  %v3653_v56 = vadd.f32 1e-05, %v3637_v16 }
 0x700   : > { %5153 = vrsqrt.f32 %v3653_v56 }
 0x704   : > { %v5148_v61 = vpop.eup %5147 }
 0x705   : > { %v3682_v28 = vmul.f32 %v5148_v61, %v7185_v39  ;;  %v3616_v15 = vpop.xlane.xlu0 %3615  ;;  %v8347_v61 = vld [vmem:[#allocation83_spill] sm:$0xff] }
 0x706   : > { %v5150_v60 = vpop.eup %5149  ;;  %v3638_v55 = vmul.f32 0.03125, %v3616_v15  ;;  %v8348_v15 = vld [vmem:[#allocation10_spill] sm:$0xff] }
 0x707   : > { %v3683_v38 = vmul.f32 %v5150_v60, %v7189_v54  ;;  %v3619_v45 = vpop.xlane.xlu1 %3618  ;;  %v3705_v37 = vmul.f32 %v7266_v6, %v3682_v28 }
 0x708   : > { %v5152_v13 = vpop.eup %5151  ;;  %v3654_v58 = vadd.f32 1e-05, %v3638_v55  ;;  %v3639_v46 = vmul.f32 0.03125, %v3619_v45  ;;  %v8349_v55 = vld [vmem:[#allocation79_spill] sm:$0xff]  ;;  %v8350_v45 = vld [vmem:[#allocation86_spill] sm:$0xff] }
 0x709   : > { %v3684_v21 = vmul.f32 %v5152_v13, %v7195_v18  ;;  %v3622_v53 = vpop.xlane.xlu0 %3621  ;;  %v3706_v1 = vmul.f32 %v7266_v6, %v3683_v38  ;;  %v3728_v54 = vadd.f32 %v7274_v12, %v3705_v37 }
 0x70a   : > { %v5154_v42 = vpop.eup %5153  ;;  %5155 = vrsqrt.f32 %v3654_v58  ;;  %v3655_v8 = vadd.f32 1e-05, %v3639_v46  ;;  %v3640_v39 = vmul.f32 0.03125, %v3622_v53  ;;  %v8351_v46 = vld [vmem:[#allocation80_spill] sm:$0xff]  ;;  %v8352_v53 = vld [vmem:[#allocation66_spill] sm:$0xff] }
 0x70b   : > { %v3685_v33 = vmul.f32 %v5154_v42, %v7202_v10  ;;  %v3625_v3 = vpop.xlane.xlu1 %3624  ;;  %v3729_v41 = vadd.f32 %v7274_v12, %v3706_v1  ;;  %v3707_v7 = vmul.f32 %v7266_v6, %v3684_v21  ;;  %v8345_v10 = vld [vmem:[#allocation7_spill] sm:$0xff]  ;;  %v8353_v42 = vld [vmem:[#allocation9_spill] sm:$0xff] }
 0x70c   : > { %5157 = vrsqrt.f32 %v3655_v8  ;;  %v3656_v32 = vadd.f32 1e-05, %v3640_v39  ;;  %v3641_v18 = vmul.f32 0.03125, %v3625_v3  ;;  %v8354_v39 = vld [vmem:[#allocation59_spill] sm:$0xff]  ;;  %v8355_v3 = vld [vmem:[#allocation85_spill] sm:$0xff] }
 0x70d   : > { %v3051_v36 = vpop.permute.xlu0 %3050  ;;  %v3740_v57 = vpack.c.bf16 %v3729_v41, %v3728_v54  ;;  %v3708_v19 = vmul.f32 %v7266_v6, %v3685_v33  ;;  %v3730_v16 = vadd.f32 %v7274_v12, %v3707_v7 }
 0x70e   : > { %5159 = vrsqrt.f32 %v3656_v32  ;;  %v3657_v4 = vadd.f32 1e-05, %v3641_v18  ;;  %v3099_v14 = vsel %vm3098_vm3, %v8345_v10, %v3051_v36  ;;  %v8356_v32 = vld [vmem:[#allocation60_spill] sm:$0xff] }
 0x70f   : > { %v3116_v17 = vsel %vm3115_vm14, %v3099_v14, %v8346_v31  ;;  %4807 = vmatprep.mubr.msk.bf16.mxu0 %vm3280_vm1, %v3740_v57  ;;  %v3053_v11 = vpop.permute.xlu1 %3052  ;;  %v3731_v56 = vadd.f32 %v7274_v12, %v3708_v19  ;;  %v8357_v36 = vld [vmem:[#allocation64_spill] sm:$0xff]  ;;  %v8359_v14 = vld [vmem:[#allocation55_spill] sm:$0xff] }
 0x710   : > { %5161 = vrsqrt.f32 %v3657_v4  ;;  %v3133_v28 = vsel %vm3132_vm11, %v3116_v17, %v8347_v61  ;;  %v3100_v60 = vsel %vm3098_vm3, %v8348_v15, %v3053_v11  ;;  %v8358_v19 = vld [vmem:[#allocation4_spill] sm:$0xff]  ;;  %v8360_v17 = vld [vmem:[#allocation81_spill] sm:$0xff] }
 0x711   : > { %v3150_v38 = vsel %vm3149_vm0, %v3133_v28, %v8349_v55  ;;  %v3117_v37 = vsel %vm3115_vm14, %v3100_v60, %v8350_v45  ;;  %v3057_v13 = vpop.permute.xlu0 %3056  ;;  %v3741_v58 = vpack.c.bf16 %v3731_v56, %v3730_v16  ;;  %v8361_v28 = vld [vmem:[#allocation82_spill] sm:$0xff]  ;;  %v8362_v60 = vld [vmem:[#allocation19_spill] sm:$0xff] }
 0x712   : > { %v3167_v21 = vsel %vm3166_vm13, %v3150_v38, %v8351_v46  ;;  %v3134_v1 = vsel %vm3132_vm11, %v3117_v37, %v8352_v53  ;;  %v3102_v8 = vsel %vm3098_vm3, %v8353_v42, %v3057_v13  ;;  %v8363_v38 = vld [vmem:[#allocation56_spill] sm:$0xff]  ;;  %v8364_v37 = vld [vmem:[#allocation71_spill] sm:$0xff] }
 0x713   : > { %3184 = vst.msk [vmem:[%s7322_s30] sm:$0xff] %vm3183_vm15, %v3167_v21  ;;  %v3151_v33 = vsel %vm3149_vm0, %v3134_v1, %v8354_v39  ;;  %v3119_v54 = vsel %vm3115_vm14, %v3102_v8, %v8355_v3  ;;  %4808 = vmatmul.mubr.msk.bf16.gmra.mrb[96].mxu0 %vm3280_vm1, %v3741_v58  ;;  %v3055_v41 = vpop.permute.xlu1 %3054  ;;  %v8365_v53 = vld [vmem:[#allocation43_spill] sm:$0xff] }
 0x714   : > { %v5156_v7 = vpop.eup %5155  ;;  %v3168_v18 = vsel %vm3166_vm13, %v3151_v33, %v8356_v32  ;;  %v3136_v57 = vsel %vm3132_vm11, %v3119_v54, %v8357_v36  ;;  %v3101_v4 = vsel %vm3098_vm3, %v8358_v19, %v3055_v41  ;;  %v8367_v33 = vld [vmem:[#allocation39_spill] sm:$0xff]  ;;  %v8368_v32 = vld [vmem:[#allocation68_spill] sm:$0xff] }
 0x715   : > { %v3686_v10 = vmul.f32 %v5156_v7, %v7213_v25  ;;  %3185 = vst.msk [vmem:[%s7322_s30 + $0x8] sm:$0xff] %vm3183_vm15, %v3168_v18  ;;  %v3153_v31 = vsel %vm3149_vm0, %v3136_v57, %v8359_v14  ;;  %v3118_v11 = vsel %vm3115_vm14, %v3101_v4, %v8360_v17  ;;  %v3061_v16 = vpop.permute.xlu0 %3060  ;;  %v8370_v4 = vld [vmem:[#allocation67_spill] sm:$0xff]  ;;  %v8371_v17 = vld [vmem:[#allocation70_spill] sm:$0xff] }
 0x716   : > { %v5158_v56 = vpop.eup %5157  ;;  %v3170_v61 = vsel %vm3166_vm13, %v3153_v31, %v6803_v48  ;;  %v3135_v15 = vsel %vm3132_vm11, %v3118_v11, %v8361_v28  ;;  %v3104_v25 = vsel %vm3098_vm3, %v8362_v60, %v3061_v16  ;;  %v8372_v16 = vld [vmem:[#allocation12_spill] sm:$0xff] }
 0x717   : > { %v3687_v55 = vmul.f32 %v5158_v56, %v7217_v27  ;;  %3187 = vst.msk [vmem:[%s7322_s30 + $0x18] sm:$0xff] %vm3183_vm15, %v3170_v61  ;;  %v3152_v45 = vsel %vm3149_vm0, %v3135_v15, %v8363_v38  ;;  %v3121_v13 = vsel %vm3115_vm14, %v3104_v25, %v8364_v37  ;;  %v3059_v58 = vpop.permute.xlu1 %3058  ;;  %v3709_v46 = vmul.f32 %v7266_v6, %v3686_v10  ;;  %v8366_v27 = vld [vmem:[#allocation14_spill] sm:$0xff]  ;;  %v8373_v61 = vld [vmem:[#allocation63_spill] sm:$0xff]  ;;  %v8375_v38 = vld [vmem:[#allocation65_spill] sm:$0xff] }
 0x718   : > { %v5160_v48 = vpop.eup %5159  ;;  %v3169_v21 = vsel %vm3166_vm13, %v3152_v45, %v6801_v35  ;;  %v3138_v1 = vsel %vm3132_vm11, %v3121_v13, %v8365_v53  ;;  %v3103_v42 = vsel %vm3098_vm3, %v8366_v27, %v3059_v58  ;;  %v8374_v25 = vld [vmem:[#allocation62_spill] sm:$0xff]  ;;  %v8376_v37 = vld [vmem:[#allocation24_spill] sm:$0xff] }
 0x719   : > { %v3688_v8 = vmul.f32 %v5160_v48, %v7223_v59  ;;  %3186 = vst.msk [vmem:[%s7322_s30 + $0x10] sm:$0xff] %vm3183_vm15, %v3169_v21  ;;  %v3155_v39 = vsel %vm3149_vm0, %v3138_v1, %v6830_v24  ;;  %v3120_v3 = vsel %vm3115_vm14, %v3103_v42, %v8367_v33  ;;  %v3065_v54 = vpop.permute.xlu0 %3064  ;;  %v3710_v41 = vmul.f32 %v7266_v6, %v3687_v55  ;;  %v8369_v59 = vld [vmem:[#allocation17_spill] sm:$0xff]  ;;  %v8380_v42 = vld [vmem:[#allocation2_spill] sm:$0xff] }
 0x71a   : > { %v5162_v35 = vpop.eup %5161  ;;  %v3172_v7 = vsel %vm3166_vm13, %v3155_v39, %v6834_v62  ;;  %v3137_v18 = vsel %vm3132_vm11, %v3120_v3, %v8368_v32  ;;  %v3106_v36 = vsel %vm3098_vm3, %v8369_v59, %v3065_v54  ;;  %v3732_v57 = vadd.f32 %v7274_v12, %v3709_v46  ;;  %v8378_v46 = vld [vmem:[#allocation96_spill] sm:$0xff]  ;;  %v8379_v1 = vld [vmem:[#allocation57_spill] sm:$0xff]  ;;  %v8382_v54 = vld [vmem:[#allocation95_spill] sm:$0xff] }
 0x71b   : > { %v3689_v24 = vmul.f32 %v5162_v35, %v7230_v43  ;;  %3189 = vst.msk [vmem:[%s7322_s30 + $0x28] sm:$0xff] %vm3183_vm15, %v3172_v7  ;;  %v3154_v19 = vsel %vm3149_vm0, %v3137_v18, %v6817_v47  ;;  %v3123_v10 = vsel %vm3115_vm14, %v3106_v36, %v8370_v4  ;;  %v3063_v62 = vpop.permute.xlu1 %3062  ;;  %v3733_v14 = vadd.f32 %v7274_v12, %v3710_v41  ;;  %v8381_v39 = vld [vmem:[#allocation21_spill] sm:$0xff]  ;;  %v8384_v59 = vld [vmem:[#allocation22_spill] sm:$0xff] }
 0x71c   : > { %v3171_v31 = vsel %vm3166_vm13, %v3154_v19, %v6825_v63  ;;  %v3140_v11 = vsel %vm3132_vm11, %v3123_v10, %v8371_v17  ;;  %v3105_v43 = vsel %vm3098_vm3, %v8372_v16, %v3063_v62  ;;  %v3711_v56 = vmul.f32 %v7266_v6, %v3688_v8  ;;  %v8383_v32 = vld [vmem:[#allocation97_spill] sm:$0xff]  ;;  %v8386_v4 = vld [vmem:[#allocation94_spill] sm:$0xff]  ;;  %v8387_v62 = vld [vmem:[#allocation20_spill] sm:$0xff] }
 0x71d   : > { %3188 = vst.msk [vmem:[%s7322_s30 + $0x20] sm:$0xff] %vm3183_vm15, %v3171_v31  ;;  %v3157_v47 = vsel %vm3149_vm0, %v3140_v11, %v6819_v29  ;;  %v3122_v28 = vsel %vm3115_vm14, %v3105_v43, %v8373_v61  ;;  %v3069_v15 = vpop.permute.xlu0 %3068  ;;  %v3742_v60 = vpack.c.bf16 %v3733_v14, %v3732_v57  ;;  %v3712_v63 = vmul.f32 %v7266_v6, %v3689_v24  ;;  %v8377_v29 = vld [vmem:[#allocation61_spill] sm:$0xff]  ;;  %v8385_v57 = vld [vmem:[#allocation92_spill] sm:$0xff]  ;;  %v8388_v31 = vld [vmem:[#allocation91_spill] sm:$0xff] }
 0x71e   : > { %v3174_v55 = vsel %vm3166_vm13, %v3157_v47, %v8374_v25  ;;  %v3139_v45 = vsel %vm3132_vm11, %v3122_v28, %v8375_v38  ;;  %v3108_v13 = vsel %vm3098_vm3, %v8376_v37, %v3069_v15  ;;  %v3734_v21 = vadd.f32 %v7274_v12, %v3711_v56  ;;  %v8389_v16 = vld [vmem:[#allocation93_spill] sm:$0xff] }
 0x71f   : > { %3191 = vst.msk [vmem:[%s7322_s30 + $0x38] sm:$0xff] %vm3183_vm15, %v3174_v55  ;;  %v3156_v58 = vsel %vm3149_vm0, %v3139_v45, %v8377_v29  ;;  %v3125_v48 = vsel %vm3115_vm14, %v3108_v13, %v8378_v46  ;;  %4811 = vmatprep.mubr.msk.bf16.mxu0 %vm3280_vm1, %v3742_v60  ;;  %v3067_v6 = vpop.permute.xlu1 %3066  ;;  %v3735_v53 = vadd.f32 %v7274_v12, %v3712_v63 }
 0x720   : > { %v3173_v27 = vsel %vm3166_vm13, %v3156_v58, %v8379_v1  ;;  %v3142_v8 = vsel %vm3132_vm11, %v3125_v48, %v8380_v42  ;;  %v3107_v33 = vsel %vm3098_vm3, %v8381_v39, %v3067_v6 }
 0x721   : > { %3190 = vst.msk [vmem:[%s7322_s30 + $0x30] sm:$0xff] %vm3183_vm15, %v3173_v27  ;;  %v3159_v3 = vsel %vm3149_vm0, %v3142_v8, %v6872_v50  ;;  %v3124_v41 = vsel %vm3115_vm14, %v3107_v33, %v8382_v54  ;;  %v3073_v35 = vpop.permute.xlu0 %3072  ;;  %v3743_v12 = vpack.c.bf16 %v3735_v53, %v3734_v21 }
 0x722   : > { %v3176_v7 = vsel %vm3166_vm13, %v3159_v3, %v6876_v2  ;;  %v3141_v18 = vsel %vm3132_vm11, %v3124_v41, %v8383_v32  ;;  %v3110_v36 = vsel %vm3098_vm3, %v8384_v59, %v3073_v35 }
 0x723   : > { %3193 = vst.msk [vmem:[%s7322_s30 + $0x48] sm:$0xff] %vm3183_vm15, %v3176_v7  ;;  %v3158_v50 = vsel %vm3149_vm0, %v3141_v18, %v6870_v20  ;;  %v3127_v24 = vsel %vm3115_vm14, %v3110_v36, %v8385_v57  ;;  %4812 = vmatmul.mubr.msk.bf16.gmra.mrb[100].mxu0 %vm3280_vm1, %v3743_v12  ;;  %v3071_v19 = vpop.permute.xlu1 %3070 }
 0x724   : > { %v3175_v2 = vsel %vm3166_vm13, %v3158_v50, %v6867_v26  ;;  %v3144_v10 = vsel %vm3132_vm11, %v3127_v24, %v8386_v4  ;;  %v3109_v14 = vsel %vm3098_vm3, %v8387_v62, %v3071_v19 }
 0x725   : > { %3192 = vst.msk [vmem:[%s7322_s30 + $0x40] sm:$0xff] %vm3183_vm15, %v3175_v2  ;;  %v3161_v20 = vsel %vm3149_vm0, %v3144_v10, %v6882_v5  ;;  %v3126_v17 = vsel %vm3115_vm14, %v3109_v14, %v8388_v31  ;;  %v7482_v5 = vld [vmem:[%s7876_s13] ss:$0 sm:$0xff] }
 0x726   : > { %v3178_v11 = vsel %vm3166_vm13, %v3161_v20, %v6888_v9  ;;  %v3143_v26 = vsel %vm3132_vm11, %v3126_v17, %v8389_v16 }
 0x727   : > { %3195 = vst.msk [vmem:[%s7322_s30 + $0x58] sm:$0xff] %vm3183_vm15, %v3178_v11  ;;  %v3160_v43 = vsel %vm3149_vm0, %v3143_v26, %v6878_v30 }
 0x728   : > { %v3177_v56 = vsel %vm3166_vm13, %v3160_v43, %v6884_v0 }
 0x729   : > { %3194 = vst.msk [vmem:[%s7322_s30 + $0x50] sm:$0xff] %vm3183_vm15, %v3177_v56 }
 0x7a4   : > { %v4801_v47 = vpop.f32.mrb[88].mxu0 }
 0x7a5   : > { %v7485_v9 = vadd.f32 %v4801_v47, %v7482_v5  ;;  %v3825_v61 = vpop.f32.mrb[89].mxu0 }
 0x7a6   : > { %v7488_v28 = vadd.f32 %v7482_v5, %v3825_v61  ;;  %v4802_v15 = vpop.f32.mrb[90].mxu0 }
 0x7a7   : > { %v3890_v30 = vmax.f32 %v7485_v9, 0.0  ;;  %v7492_v0 = vadd.f32 %v4802_v15, %v7482_v5  ;;  %v3828_v60 = vpop.f32.mrb[91].mxu0 }
 0x7a8   : > { %v7495_v63 = vadd.f32 %v7482_v5, %v3828_v60  ;;  %v3888_v25 = vmax.f32 %v7488_v28, 0.0 }
 0x7a9   : > { %v3891_v55 = vmax.f32 %v7492_v0, 0.0  ;;  %v3910_v38 = vsel %vm3183_vm15, %v3890_v30, 0.0 }
 0x7aa   : > { %3911 = vadd.xlane.f32.xlu0 %v3910_v38  ;;  %v3889_v45 = vmax.f32 %v7495_v63, 0.0  ;;  %v3904_v13 = vsel %vm3183_vm15, %v3888_v25, 0.0 }
 0x7ab   : > { %v3913_v37 = vsel %vm3183_vm15, %v3891_v55, 0.0 }
 0x7ac   : > { %3914 = vadd.xlane.f32.xlu1 %v3913_v37  ;;  %v3907_v29 = vsel %vm3183_vm15, %v3889_v45, 0.0 }
 0x7ae   : > { %3905 = vadd.xlane.f32.xlu0 %v3904_v13 }
 0x7b0   : > { %3908 = vadd.xlane.f32.xlu1 %v3907_v29 }
 0x7b3   : > { %v4805_v58 = vpop.f32.mrb[92].mxu0 }
 0x7b4   : > { %v7513_v46 = vadd.f32 %v4805_v58, %v7482_v5  ;;  %v3841_v48 = vpop.f32.mrb[93].mxu0  ;;  %v8390_v58 = vld [vmem:[#allocation33_spill] sm:$0xff] }
 0x7b5   : > { %v7516_v6 = vadd.f32 %v7482_v5, %v3841_v48  ;;  %v4806_v21 = vpop.f32.mrb[94].mxu0  ;;  %v8391_v48 = vld [vmem:[#allocation35_spill] sm:$0xff] }
 0x7b6   : > { %v3894_v53 = vmax.f32 %v7513_v46, 0.0  ;;  %v7520_v1 = vadd.f32 %v4806_v21, %v7482_v5  ;;  %v3844_v27 = vpop.f32.mrb[95].mxu0 }
 0x7b7   : > { %v7523_v42 = vadd.f32 %v7482_v5, %v3844_v27  ;;  %v3892_v8 = vmax.f32 %v7516_v6, 0.0 }
 0x7b8   : > { %v3895_v39 = vmax.f32 %v7520_v1, 0.0  ;;  %v3922_v33 = vsel %vm3183_vm15, %v3894_v53, 0.0 }
 0x7b9   : > { %3923 = vadd.xlane.f32.xlu0 %v3922_v33  ;;  %v3893_v3 = vmax.f32 %v7523_v42, 0.0  ;;  %v3916_v41 = vsel %vm3183_vm15, %v3892_v8, 0.0 }
 0x7ba   : > { %v3925_v54 = vsel %vm3183_vm15, %v3895_v39, 0.0 }
 0x7bb   : > { %3926 = vadd.xlane.f32.xlu1 %v3925_v54  ;;  %v3919_v35 = vsel %vm3183_vm15, %v3893_v3, 0.0 }
 0x7bd   : > { %3917 = vadd.xlane.f32.xlu0 %v3916_v41 }
 0x7bf   : > { %3920 = vadd.xlane.f32.xlu1 %v3919_v35 }
 0x7e6   : > { %v4809_v12 = vpop.f32.mrb[96].mxu0 }
 0x7e7   : > { %v7541_v7 = vadd.f32 %v4809_v12, %v7482_v5  ;;  %v3857_v32 = vpop.f32.mrb[97].mxu0 }
 0x7e8   : > { %v7544_v18 = vadd.f32 %v7482_v5, %v3857_v32  ;;  %v4810_v59 = vpop.f32.mrb[98].mxu0 }
 0x7e9   : > { %v3898_v36 = vmax.f32 %v7541_v7, 0.0  ;;  %v7548_v50 = vadd.f32 %v4810_v59, %v7482_v5  ;;  %v3860_v57 = vpop.f32.mrb[99].mxu0 }
 0x7ea   : > { %v7551_v24 = vadd.f32 %v7482_v5, %v3860_v57  ;;  %v3896_v19 = vmax.f32 %v7544_v18, 0.0 }
 0x7eb   : > { %v3899_v2 = vmax.f32 %v7548_v50, 0.0  ;;  %v3934_v4 = vsel %vm3183_vm15, %v3898_v36, 0.0 }
 0x7ec   : > { %3935 = vadd.xlane.f32.xlu0 %v3934_v4  ;;  %v3897_v10 = vmax.f32 %v7551_v24, 0.0  ;;  %v3928_v14 = vsel %vm3183_vm15, %v3896_v19, 0.0 }
 0x7ed   : > { %v3937_v62 = vsel %vm3183_vm15, %v3899_v2, 0.0 }
 0x7ee   : > { %3938 = vadd.xlane.f32.xlu1 %v3937_v62  ;;  %v3931_v20 = vsel %vm3183_vm15, %v3897_v10, 0.0 }
 0x7f0   : > { %3929 = vadd.xlane.f32.xlu0 %v3928_v14 }
 0x7f2   : > { %3932 = vadd.xlane.f32.xlu1 %v3931_v20 }
 0x7f6   : > { %v4813_v31 = vpop.f32.mrb[100].mxu0 }
 0x7f7   : > { %v7569_v17 = vadd.f32 %v4813_v31, %v7482_v5  ;;  %v3873_v11 = vpop.f32.mrb[101].mxu0 }
 0x7f8   : > { %v7572_v16 = vadd.f32 %v7482_v5, %v3873_v11  ;;  %v4814_v26 = vpop.f32.mrb[102].mxu0 }
 0x7f9   : > { %v3902_v43 = vmax.f32 %v7569_v17, 0.0  ;;  %v7576_v56 = vadd.f32 %v4814_v26, %v7482_v5  ;;  %v3876_v47 = vpop.f32.mrb[103].mxu0 }
 0x7fa   : > { %v7579_v61 = vadd.f32 %v7482_v5, %v3876_v47  ;;  %v3900_v15 = vmax.f32 %v7572_v16, 0.0 }
 0x7fb   : > { %v3903_v60 = vmax.f32 %v7576_v56, 0.0  ;;  %v3946_v38 = vsel %vm3183_vm15, %v3902_v43, 0.0 }
 0x7fc   : > { %3947 = vadd.xlane.f32.xlu0 %v3946_v38  ;;  %v3901_v37 = vmax.f32 %v7579_v61, 0.0  ;;  %v3940_v5 = vsel %vm3183_vm15, %v3900_v15, 0.0 }
 0x7fd   : > { %v3949_v13 = vsel %vm3183_vm15, %v3903_v60, 0.0 }
 0x7fe   : > { %3950 = vadd.xlane.f32.xlu1 %v3949_v13  ;;  %v3943_v29 = vsel %vm3183_vm15, %v3901_v37, 0.0 }
 0x800   : > { %3941 = vadd.xlane.f32.xlu0 %v3940_v5 }
 0x802   : > { %3944 = vadd.xlane.f32.xlu1 %v3943_v29 }
 0x813   : > { %3074 = vrot.lane.b32.xlu1 %v8390_v58, %s5207_s21 }
 0x816   : > { %3076 = vrot.lane.b32.xlu0 %v8391_v48, %s5207_s21 }
 0x837   : > { %v3912_v21 = vpop.xlane.xlu0 %3911 }
 0x838   : > { %v3955_v27 = vmul.f32 0.125, %v3912_v21 }
 0x839   : > { %v3915_v33 = vpop.xlane.xlu1 %3914 }
 0x83a   : > { %v7602_v54 = vsub.f32 %v3890_v30, %v3955_v27  ;;  %v3956_v41 = vmul.f32 0.125, %v3915_v33 }
 0x83b   : > { %v3906_v35 = vpop.xlane.xlu0 %3905 }
 0x83c   : > { %v7606_v12 = vsub.f32 %v3891_v55, %v3956_v41  ;;  %v3953_v32 = vmul.f32 0.125, %v3906_v35  ;;  %v3987_v59 = vmul.f32 %v7602_v54, %v7602_v54 }
 0x83d   : > { %v3909_v57 = vpop.xlane.xlu1 %3908 }
 0x83e   : > { %v7612_v4 = vsub.f32 %v3888_v25, %v3953_v32  ;;  %v3954_v62 = vmul.f32 0.125, %v3909_v57  ;;  %v4007_v9 = vsel %vm3183_vm15, %v3987_v59, 0.0  ;;  %v3988_v30 = vmul.f32 %v7606_v12, %v7606_v12 }
 0x83f   : > { %4008 = vadd.xlane.f32.xlu0 %v4007_v9 }
 0x840   : > { %v7619_v0 = vsub.f32 %v3889_v45, %v3954_v62  ;;  %v4010_v55 = vsel %vm3183_vm15, %v3988_v30, 0.0  ;;  %v3985_v14 = vmul.f32 %v7612_v4, %v7612_v4 }
 0x841   : > { %4011 = vadd.xlane.f32.xlu1 %v4010_v55 }
 0x842   : > { %v4001_v28 = vsel %vm3183_vm15, %v3985_v14, 0.0  ;;  %v3986_v25 = vmul.f32 %v7619_v0, %v7619_v0 }
 0x843   : > { %4002 = vadd.xlane.f32.xlu0 %v4001_v28 }
 0x844   : > { %v4004_v20 = vsel %vm3183_vm15, %v3986_v25, 0.0 }
 0x845   : > { %4005 = vadd.xlane.f32.xlu1 %v4004_v20 }
 0x846   : > { %v3924_v31 = vpop.xlane.xlu0 %3923 }
 0x847   : > { %v3959_v11 = vmul.f32 0.125, %v3924_v31 }
 0x848   : > { %v3927_v63 = vpop.xlane.xlu1 %3926 }
 0x849   : > { %v7630_v45 = vsub.f32 %v3894_v53, %v3959_v11  ;;  %v3960_v26 = vmul.f32 0.125, %v3927_v63 }
 0x84a   : > { %v3918_v47 = vpop.xlane.xlu0 %3917 }
 0x84b   : > { %v7634_v38 = vsub.f32 %v3895_v39, %v3960_v26  ;;  %v3957_v13 = vmul.f32 0.125, %v3918_v47  ;;  %v3991_v5 = vmul.f32 %v7630_v45, %v7630_v45 }
 0x84c   : > { %v3921_v29 = vpop.xlane.xlu1 %3920 }
 0x84d   : > { %v7640_v58 = vsub.f32 %v3892_v8, %v3957_v13  ;;  %v3958_v48 = vmul.f32 0.125, %v3921_v29  ;;  %v4019_v46 = vsel %vm3183_vm15, %v3991_v5, 0.0  ;;  %v3992_v53 = vmul.f32 %v7634_v38, %v7634_v38 }
 0x84e   : > { %4020 = vadd.xlane.f32.xlu0 %v4019_v46 }
 0x84f   : > { %v7647_v1 = vsub.f32 %v3893_v3, %v3958_v48  ;;  %v4022_v39 = vsel %vm3183_vm15, %v3992_v53, 0.0  ;;  %v3989_v21 = vmul.f32 %v7640_v58, %v7640_v58  ;;  %v8393_v53 = vld [vmem:[#allocation75_spill] sm:$0xff] }
 0x850   : > { %4023 = vadd.xlane.f32.xlu1 %v4022_v39 }
 0x851   : > { %v4013_v6 = vsel %vm3183_vm15, %v3989_v21, 0.0  ;;  %v3990_v8 = vmul.f32 %v7647_v1, %v7647_v1 }
 0x852   : > { %4014 = vadd.xlane.f32.xlu0 %v4013_v6  ;;  %v8394_v6 = vld [vmem:[#allocation98_spill] sm:$0xff] }
 0x853   : > { %v4016_v27 = vsel %vm3183_vm15, %v3990_v8, 0.0 }
 0x854   : > { %4017 = vadd.xlane.f32.xlu1 %v4016_v27 }
 0x879   : > { %v3936_v33 = vpop.xlane.xlu0 %3935 }
 0x87a   : > { %v3963_v41 = vmul.f32 0.125, %v3936_v33 }
 0x87b   : > { %v3939_v42 = vpop.xlane.xlu1 %3938 }
 0x87c   : > { %v7658_v3 = vsub.f32 %v3898_v36, %v3963_v41  ;;  %v3964_v35 = vmul.f32 0.125, %v3939_v42  ;;  %v8396_v42 = vld [vmem:[#allocation78_spill] sm:$0xff] }
 0x87d   : > { %v3930_v32 = vpop.xlane.xlu0 %3929 }
 0x87e   : > { %v7662_v59 = vsub.f32 %v3899_v2, %v3964_v35  ;;  %v3961_v57 = vmul.f32 0.125, %v3930_v32  ;;  %v3995_v62 = vmul.f32 %v7658_v3, %v7658_v3 }
 0x87f   : > { %v3933_v9 = vpop.xlane.xlu1 %3932 }
 0x880   : > { %v7668_v30 = vsub.f32 %v3896_v19, %v3961_v57  ;;  %v3962_v55 = vmul.f32 0.125, %v3933_v9  ;;  %v4031_v7 = vsel %vm3183_vm15, %v3995_v62, 0.0  ;;  %v3996_v36 = vmul.f32 %v7662_v59, %v7662_v59  ;;  %v8397_v57 = vld [vmem:[#allocation76_spill] sm:$0xff] }
 0x881   : > { %4032 = vadd.xlane.f32.xlu0 %v4031_v7  ;;  %v8398_v7 = vld [vmem:[#allocation31_spill] sm:$0xff] }
 0x882   : > { %v7675_v50 = vsub.f32 %v3897_v10, %v3962_v55  ;;  %v4034_v2 = vsel %vm3183_vm15, %v3996_v36, 0.0  ;;  %v3993_v14 = vmul.f32 %v7668_v30, %v7668_v30 }
 0x883   : > { %4035 = vadd.xlane.f32.xlu1 %v4034_v2 }
 0x884   : > { %v4025_v18 = vsel %vm3183_vm15, %v3993_v14, 0.0  ;;  %v3994_v19 = vmul.f32 %v7675_v50, %v7675_v50 }
 0x885   : > { %4026 = vadd.xlane.f32.xlu0 %v4025_v18 }
 0x886   : > { %v4028_v28 = vsel %vm3183_vm15, %v3994_v19, 0.0 }
 0x887   : > { %4029 = vadd.xlane.f32.xlu1 %v4028_v28 }
 0x889   : > { %v3948_v25 = vpop.xlane.xlu0 %3947 }
 0x88a   : > { %v3967_v20 = vmul.f32 0.125, %v3948_v25 }
 0x88b   : > { %v3951_v24 = vpop.xlane.xlu1 %3950 }
 0x88c   : > { %v7686_v10 = vsub.f32 %v3902_v43, %v3967_v20  ;;  %v3968_v31 = vmul.f32 0.125, %v3951_v24 }
 0x88d   : > { %v3942_v11 = vpop.xlane.xlu0 %3941 }
 0x88e   : > { %v7690_v63 = vsub.f32 %v3903_v60, %v3968_v31  ;;  %v3965_v26 = vmul.f32 0.125, %v3942_v11  ;;  %v3999_v47 = vmul.f32 %v7686_v10, %v7686_v10  ;;  %v8392_v60 = vld [vmem:[#allocation32_spill] sm:$0xff] }
 0x88f   : > { %v3945_v13 = vpop.xlane.xlu1 %3944 }
 0x890   : > { %v7696_v5 = vsub.f32 %v3900_v15, %v3965_v26  ;;  %v3966_v29 = vmul.f32 0.125, %v3945_v13  ;;  %v4043_v17 = vsel %vm3183_vm15, %v3999_v47, 0.0  ;;  %v4000_v43 = vmul.f32 %v7690_v63, %v7690_v63  ;;  %v7743_v26 = vld [vmem:[%s7877_s14] ss:$0 sm:$0xff] }
 0x891   : > { %4044 = vadd.xlane.f32.xlu0 %v4043_v17  ;;  %v3077_v48 = vpop.permute.xlu0 %3076 }
 0x892   : > { %v7703_v56 = vsub.f32 %v3901_v37, %v3966_v29  ;;  %v3112_v46 = vsel %vm3098_vm3, %v8392_v60, %v3077_v48  ;;  %v4046_v16 = vsel %vm3183_vm15, %v4000_v43, 0.0  ;;  %v3997_v15 = vmul.f32 %v7696_v5, %v7696_v5  ;;  %v8395_v37 = vld [vmem:[#allocation29_spill] sm:$0xff]  ;;  %v7749_v43 = vld [vmem:[%s7878_s15] ss:$0 sm:$0xff] }
 0x893   : > { %v3129_v39 = vsel %vm3115_vm14, %v3112_v46, %v8393_v53  ;;  %4047 = vadd.xlane.f32.xlu1 %v4046_v16  ;;  %v3075_v21 = vpop.permute.xlu1 %3074 }
 0x894   : > { %v3146_v61 = vsel %vm3132_vm11, %v3129_v39, %v8394_v6  ;;  %v3111_v8 = vsel %vm3098_vm3, %v8395_v37, %v3075_v21  ;;  %v4037_v27 = vsel %vm3183_vm15, %v3997_v15, 0.0  ;;  %v3998_v33 = vmul.f32 %v7703_v56, %v7703_v56 }
 0x895   : > { %v3163_v41 = vsel %vm3149_vm0, %v3146_v61, %v6900_v23  ;;  %v3128_v35 = vsel %vm3115_vm14, %v3111_v8, %v8396_v42  ;;  %4038 = vadd.xlane.f32.xlu0 %v4037_v27 }
 0x896   : > { %v3180_v32 = vsel %vm3166_vm13, %v3163_v41, %v6910_v51  ;;  %v3145_v62 = vsel %vm3132_vm11, %v3128_v35, %v8397_v57  ;;  %v4040_v9 = vsel %vm3183_vm15, %v3998_v33, 0.0  ;;  %v8399_v51 = vld [vmem:[#allocation34_spill] sm:$0xff] }
 0x897   : > { %3197 = vst.msk [vmem:[%s7322_s30 + $0x68] sm:$0xff] %vm3183_vm15, %v3180_v32  ;;  %v3162_v55 = vsel %vm3149_vm0, %v3145_v62, %v6892_v49  ;;  %4041 = vadd.xlane.f32.xlu1 %v4040_v9 }
 0x898   : > { %v3179_v23 = vsel %vm3166_vm13, %v3162_v55, %v6904_v22 }
 0x899   : > { %3196 = vst.msk [vmem:[%s7322_s30 + $0x60] sm:$0xff] %vm3183_vm15, %v3179_v23 }
 0x8a8   : > { %3078 = vrot.lane.b32.xlu1 %v8398_v7, %s5207_s21 }
 0x8ab   : > { %3080 = vrot.lane.b32.xlu0 %v8399_v51, %s5207_s21 }
 0x8cc   : > { %v4009_v36 = vpop.xlane.xlu0 %4008 }
 0x8cd   : > { %v4051_v2 = vmul.f32 0.125, %v4009_v36 }
 0x8ce   : > { %v4012_v14 = vpop.xlane.xlu1 %4011 }
 0x8cf   : > { %v4067_v18 = vadd.f32 1e-05, %v4051_v2  ;;  %v4052_v19 = vmul.f32 0.125, %v4012_v14 }
 0x8d0   : > { %v4003_v28 = vpop.xlane.xlu0 %4002 }
 0x8d1   : > { %5163 = vrsqrt.f32 %v4067_v18  ;;  %v4068_v49 = vadd.f32 1e-05, %v4052_v19  ;;  %v4049_v25 = vmul.f32 0.125, %v4003_v28 }
 0x8d2   : > { %v4006_v20 = vpop.xlane.xlu1 %4005 }
 0x8d3   : > { %5165 = vrsqrt.f32 %v4068_v49  ;;  %v4065_v22 = vadd.f32 1e-05, %v4049_v25  ;;  %v4050_v24 = vmul.f32 0.125, %v4006_v20 }
 0x8d5   : > { %5167 = vrsqrt.f32 %v4065_v22  ;;  %v4066_v31 = vadd.f32 1e-05, %v4050_v24 }
 0x8d7   : > { %5169 = vrsqrt.f32 %v4066_v31 }
 0x8db   : > { %v5164_v11 = vpop.eup %5163  ;;  %v4021_v47 = vpop.xlane.xlu0 %4020 }
 0x8dc   : > { %v4099_v13 = vmul.f32 %v5164_v11, %v7602_v54  ;;  %v4055_v29 = vmul.f32 0.125, %v4021_v47 }
 0x8dd   : > { %v5166_v17 = vpop.eup %5165  ;;  %v4024_v48 = vpop.xlane.xlu1 %4023 }
 0x8de   : > { %v4122_v60 = vmul.f32 %v7743_v26, %v4099_v13  ;;  %v4100_v46 = vmul.f32 %v5166_v17, %v7606_v12  ;;  %v4071_v16 = vadd.f32 1e-05, %v4055_v29  ;;  %v4056_v15 = vmul.f32 0.125, %v4024_v48 }
 0x8df   : > { %v5168_v53 = vpop.eup %5167  ;;  %v4015_v54 = vpop.xlane.xlu0 %4014 }
 0x8e0   : > { %v4145_v39 = vadd.f32 %v7749_v43, %v4122_v60  ;;  %v4123_v21 = vmul.f32 %v7743_v26, %v4100_v46  ;;  %v4097_v6 = vmul.f32 %v5168_v53, %v7612_v4  ;;  %5171 = vrsqrt.f32 %v4071_v16 }
 0x8e1   : > { %v5170_v61 = vpop.eup %5169  ;;  %v4072_v12 = vadd.f32 1e-05, %v4056_v15  ;;  %v4053_v37 = vmul.f32 0.125, %v4015_v54  ;;  %v4018_v8 = vpop.xlane.xlu1 %4017 }
 0x8e2   : > { %4161 = vst.msk [vmem:[%s7757_s23 + $0x10] sm:$0xff] %vm3183_vm15, %v4145_v39  ;;  %v4146_v27 = vadd.f32 %v7749_v43, %v4123_v21  ;;  %v4120_v33 = vmul.f32 %v7743_v26, %v4097_v6  ;;  %v4098_v41 = vmul.f32 %v5170_v61, %v7619_v0  ;;  %v4054_v42 = vmul.f32 0.125, %v4018_v8 }
 0x8e3   : > { %5173 = vrsqrt.f32 %v4072_v12  ;;  %v4069_v35 = vadd.f32 1e-05, %v4053_v37 }
 0x8e4   : > { %4162 = vst.msk [vmem:[%s7757_s23 + $0x18] sm:$0xff] %vm3183_vm15, %v4146_v27  ;;  %v4143_v4 = vadd.f32 %v7749_v43, %v4120_v33  ;;  %v4121_v32 = vmul.f32 %v7743_v26, %v4098_v41  ;;  %v4070_v57 = vadd.f32 1e-05, %v4054_v42 }
 0x8e5   : > { %5175 = vrsqrt.f32 %v4069_v35 }
 0x8e6   : > { %4159 = vst.msk [vmem:[%s7757_s23] sm:$0xff] %vm3183_vm15, %v4143_v4  ;;  %v4144_v62 = vadd.f32 %v7749_v43, %v4121_v32  ;;  %5177 = vrsqrt.f32 %v4070_v57 }
 0x8e8   : > { %4160 = vst.msk [vmem:[%s7757_s23 + $0x8] sm:$0xff] %vm3183_vm15, %v4144_v62 }
 0x8ea   : > { %v5172_v0 = vpop.eup %5171 }
 0x8eb   : > { %v4103_v9 = vmul.f32 %v5172_v0, %v7630_v45 }
 0x8ed   : > { %v5174_v55 = vpop.eup %5173  ;;  %v4126_v23 = vmul.f32 %v7743_v26, %v4103_v9 }
 0x8ee   : > { %v4104_v7 = vmul.f32 %v5174_v55, %v7634_v38 }
 0x8ef   : > { %v5176_v51 = vpop.eup %5175  ;;  %v4149_v36 = vadd.f32 %v7749_v43, %v4126_v23  ;;  %v8400_v23 = vld [vmem:[#allocation30_spill] sm:$0xff] }
 0x8f0   : > { %v5178_v2 = vpop.eup %5177  ;;  %v4127_v14 = vmul.f32 %v7743_v26, %v4104_v7  ;;  %v4101_v18 = vmul.f32 %v5176_v51, %v7640_v58  ;;  %v8401_v51 = vld [vmem:[#allocation73_spill] sm:$0xff] }
 0x8f1   : > { %4165 = vst.msk [vmem:[%s7757_s23 + $0x30] sm:$0xff] %vm3183_vm15, %v4149_v36  ;;  %v4102_v19 = vmul.f32 %v5178_v2, %v7647_v1 }
 0x8f2   : > { %v4150_v45 = vadd.f32 %v7749_v43, %v4127_v14  ;;  %v4124_v28 = vmul.f32 %v7743_v26, %v4101_v18  ;;  %v8402_v14 = vld [vmem:[#allocation77_spill] sm:$0xff] }
 0x8f3   : > { %v4125_v49 = vmul.f32 %v7743_v26, %v4102_v19  ;;  %v8403_v19 = vld [vmem:[#allocation28_spill] sm:$0xff] }
 0x8f4   : > { %4166 = vst.msk [vmem:[%s7757_s23 + $0x38] sm:$0xff] %vm3183_vm15, %v4150_v45  ;;  %v4147_v38 = vadd.f32 %v7749_v43, %v4124_v28 }
 0x8f5   : > { %v4148_v25 = vadd.f32 %v7749_v43, %v4125_v49  ;;  %v8404_v49 = vld [vmem:[#allocation3_spill] sm:$0xff] }
 0x8f6   : > { %4163 = vst.msk [vmem:[%s7757_s23 + $0x20] sm:$0xff] %vm3183_vm15, %v4147_v38 }
 0x8f7   : > { %4164 = vst.msk [vmem:[%s7757_s23 + $0x28] sm:$0xff] %vm3183_vm15, %v4148_v25 }
 0x90e   : > { %v4033_v58 = vpop.xlane.xlu0 %4032 }
 0x90f   : > { %v4059_v20 = vmul.f32 0.125, %v4033_v58  ;;  %v8405_v58 = vld [vmem:[#allocation74_spill] sm:$0xff] }
 0x910   : > { %v4036_v22 = vpop.xlane.xlu1 %4035 }
 0x911   : > { %v4075_v1 = vadd.f32 1e-05, %v4059_v20  ;;  %v4060_v24 = vmul.f32 0.125, %v4036_v22 }
 0x912   : > { %v4027_v31 = vpop.xlane.xlu0 %4026 }
 0x913   : > { %5179 = vrsqrt.f32 %v4075_v1  ;;  %v4076_v11 = vadd.f32 1e-05, %v4060_v24  ;;  %v4057_v47 = vmul.f32 0.125, %v4027_v31 }
 0x914   : > { %v4030_v13 = vpop.xlane.xlu1 %4029 }
 0x915   : > { %5181 = vrsqrt.f32 %v4076_v11  ;;  %v4073_v29 = vadd.f32 1e-05, %v4057_v47  ;;  %v4058_v17 = vmul.f32 0.125, %v4030_v13 }
 0x917   : > { %5183 = vrsqrt.f32 %v4073_v29  ;;  %v4074_v48 = vadd.f32 1e-05, %v4058_v17 }
 0x919   : > { %5185 = vrsqrt.f32 %v4074_v48 }
 0x91d   : > { %v5180_v60 = vpop.eup %5179 }
 0x91e   : > { %v4107_v46 = vmul.f32 %v5180_v60, %v7658_v3  ;;  %v4045_v16 = vpop.xlane.xlu0 %4044 }
 0x91f   : > { %v5182_v15 = vpop.eup %5181  ;;  %v4063_v53 = vmul.f32 0.125, %v4045_v16 }
 0x920   : > { %v4130_v54 = vmul.f32 %v7743_v26, %v4107_v46  ;;  %v4108_v39 = vmul.f32 %v5182_v15, %v7662_v59  ;;  %v4048_v21 = vpop.xlane.xlu1 %4047 }
 0x921   : > { %v5184_v6 = vpop.eup %5183  ;;  %v4079_v61 = vadd.f32 1e-05, %v4063_v53  ;;  %v4064_v12 = vmul.f32 0.125, %v4048_v21 }
 0x922   : > { %v4153_v37 = vadd.f32 %v7749_v43, %v4130_v54  ;;  %v4131_v8 = vmul.f32 %v7743_v26, %v4108_v39  ;;  %v4105_v27 = vmul.f32 %v5184_v6, %v7668_v30  ;;  %v4039_v3 = vpop.xlane.xlu0 %4038 }
 0x923   : > { %v5186_v33 = vpop.eup %5185  ;;  %5187 = vrsqrt.f32 %v4079_v61  ;;  %v4080_v41 = vadd.f32 1e-05, %v4064_v12  ;;  %v4061_v42 = vmul.f32 0.125, %v4039_v3 }
 0x924   : > { %4169 = vst.msk [vmem:[%s7757_s23 + $0x50] sm:$0xff] %vm3183_vm15, %v4153_v37  ;;  %v4154_v59 = vadd.f32 %v7749_v43, %v4131_v8  ;;  %v4128_v35 = vmul.f32 %v7743_v26, %v4105_v27  ;;  %v4106_v4 = vmul.f32 %v5186_v33, %v7675_v50  ;;  %v4042_v32 = vpop.xlane.xlu1 %4041 }
 0x925   : > { %5189 = vrsqrt.f32 %v4080_v41  ;;  %v4077_v57 = vadd.f32 1e-05, %v4061_v42  ;;  %v4062_v62 = vmul.f32 0.125, %v4042_v32 }
 0x926   : > { %4170 = vst.msk [vmem:[%s7757_s23 + $0x58] sm:$0xff] %vm3183_vm15, %v4154_v59  ;;  %v4151_v30 = vadd.f32 %v7749_v43, %v4128_v35  ;;  %v4129_v0 = vmul.f32 %v7743_v26, %v4106_v4  ;;  %v3081_v9 = vpop.permute.xlu0 %3080 }
 0x927   : > { %5191 = vrsqrt.f32 %v4077_v57  ;;  %v4078_v55 = vadd.f32 1e-05, %v4062_v62  ;;  %v3114_v7 = vsel %vm3098_vm3, %v8400_v23, %v3081_v9 }
 0x928   : > { %4167 = vst.msk [vmem:[%s7757_s23 + $0x40] sm:$0xff] %vm3183_vm15, %v4151_v30  ;;  %v4152_v50 = vadd.f32 %v7749_v43, %v4129_v0  ;;  %v3131_v36 = vsel %vm3115_vm14, %v3114_v7, %v8401_v51  ;;  %v3079_v2 = vpop.permute.xlu1 %3078 }
 0x929   : > { %5193 = vrsqrt.f32 %v4078_v55  ;;  %v3148_v18 = vsel %vm3132_vm11, %v3131_v36, %v8402_v14  ;;  %v3113_v45 = vsel %vm3098_vm3, %v8403_v19, %v3079_v2 }
 0x92a   : > { %4168 = vst.msk [vmem:[%s7757_s23 + $0x48] sm:$0xff] %vm3183_vm15, %v4152_v50  ;;  %v3165_v28 = vsel %vm3149_vm0, %v3148_v18, %v6920_v40  ;;  %v3130_v38 = vsel %vm3115_vm14, %v3113_v45, %v8404_v49 }
 0x92b   : > { %v3182_v25 = vsel %vm3166_vm13, %v3165_v28, %v6929_v44  ;;  %v3147_v20 = vsel %vm3132_vm11, %v3130_v38, %v8405_v58 }
 0x92c   : > { %3199 = vst.msk [vmem:[%s7322_s30 + $0x78] sm:$0xff] %vm3183_vm15, %v3182_v25  ;;  %v3164_v22 = vsel %vm3149_vm0, %v3147_v20, %v6914_v34 }
 0x92d   : > { %v5188_v1 = vpop.eup %5187  ;;  %v3181_v40 = vsel %vm3166_vm13, %v3164_v22, %v6924_v52 }
 0x92e   : > { %v4111_v24 = vmul.f32 %v5188_v1, %v7686_v10  ;;  %3198 = vst.msk [vmem:[%s7322_s30 + $0x70] sm:$0xff] %vm3183_vm15, %v3181_v40 }
 0x92f   : > { %v5190_v44 = vpop.eup %5189 }
 0x930   : > { %v4134_v31 = vmul.f32 %v7743_v26, %v4111_v24  ;;  %v4112_v11 = vmul.f32 %v5190_v44, %v7690_v63 }
 0x931   : > { %v5192_v47 = vpop.eup %5191 }
 0x932   : > { %v4157_v13 = vadd.f32 %v7749_v43, %v4134_v31  ;;  %v4135_v34 = vmul.f32 %v7743_v26, %v4112_v11  ;;  %v4109_v29 = vmul.f32 %v5192_v47, %v7696_v5 }
 0x933   : > { %v5194_v17 = vpop.eup %5193 }
 0x934   : > { %4173 = vst.msk [vmem:[%s7757_s23 + $0x70] sm:$0xff] %vm3183_vm15, %v4157_v13  ;;  %v4158_v52 = vadd.f32 %v7749_v43, %v4135_v34  ;;  %v4132_v10 = vmul.f32 %v7743_v26, %v4109_v29  ;;  %v4110_v48 = vmul.f32 %v5194_v17, %v7703_v56 }
 0x936   : > { %4174 = vst.msk [vmem:[%s7757_s23 + $0x78] sm:$0xff] %vm3183_vm15, %v4158_v52  ;;  %v4155_v63 = vadd.f32 %v7749_v43, %v4132_v10  ;;  %v4133_v60 = vmul.f32 %v7743_v26, %v4110_v48 }
 0x938   : > { %4171 = vst.msk [vmem:[%s7757_s23 + $0x60] sm:$0xff] %vm3183_vm15, %v4155_v63  ;;  %v4156_v46 = vadd.f32 %v7749_v43, %v4133_v60 }
 0x93a   : > { %4172 = vst.msk [vmem:[%s7757_s23 + $0x68] sm:$0xff] %vm3183_vm15, %v4156_v46 }
 0x93b PF: > { %s28_s24 = sadd.s32 1, %s5201_s24  }
 0x93c   : > { %p25_p4 = scmp.ge.s32.totalorder %s28_s24, 4  }
 0x93e   :  { %27 = sbr.rel (!%p25_p4) target bundleno = 3 (0x3), region = 132 }

</bundles_post_ra>
